<compile_context>
chip_gen: v7x
topology: tpu7x:2x2x1
jax: 0.10.0
libtpu: 0.0.40
codegen_flags: <defaults>
</compile_context>

<pallas_src>
import numpy as np

import jax
import jax.numpy as jnp
from jax.experimental import pallas as pl
from jax.experimental.pallas import tpu as pltpu


# ---------------------------------------------------------------------------
# Trace-time constant helpers (pure numpy -> baked as constants, no XLA ops)
# ---------------------------------------------------------------------------

def _row_selection(oh, h):
    """(4, oh, h) 0/1 matrix: S[kh, oy, r] = 1 iff r == 2*oy + kh - 1.

    S[kh] @ act gathers padded input rows 2*oy + kh (pad=1); out-of-range rows
    produce all-zero rows, i.e. exactly the zero padding."""
    s = np.zeros((4, oh, h), np.float32)
    for kh in range(4):
        for oy in range(oh):
            r = 2 * oy + kh - 1
            if 0 <= r < h:
                s[kh, oy, r] = 1.0
    return s


def _col_band(w, ow):
    """(w, 4, ow) 0/1 mask: T[u, kw, ox] = 1 iff u == 2*ox + kw - 1."""
    t = np.zeros((w, 4, ow), np.float32)
    for u in range(w):
        for ox in range(ow):
            kw = u + 1 - 2 * ox
            if 0 <= kw < 4:
                t[u, kw, ox] = 1.0
    return t


# ---------------------------------------------------------------------------
# Pallas kernel: all five layers for one sample, entirely in VMEM
# ---------------------------------------------------------------------------

def _disc_kernel(x_ref, s1_ref, b1_ref, s2_ref, b2_ref, s3_ref, b3_ref,
                 s4_ref, b4_ref, w5_ref, out_ref):

    def conv_lrelu(act, s_ref, b_ref):
        # act: (H, W*Cin)  ->  (H/2, (W/2)*Cout), LeakyReLU(0.2) fused.
        acc = None
        for kh in range(4):
            rows = jnp.dot(s_ref[kh], act, preferred_element_type=jnp.float32)
            part = jnp.dot(rows, b_ref[kh], preferred_element_type=jnp.float32)
            acc = part if acc is None else acc + part
        return jnp.where(acc >= 0, acc, 0.2 * acc)

    act = x_ref[0]                            # (64, 64*C0)
    act = conv_lrelu(act, s1_ref, b1_ref)     # (32, 32*fd)
    act = conv_lrelu(act, s2_ref, b2_ref)     # (16, 16*2fd)
    act = conv_lrelu(act, s3_ref, b3_ref)     # (8,  8*4fd)
    act = conv_lrelu(act, s4_ref, b4_ref)     # (4,  4*8fd)
    # Final 4x4 valid conv == full dot with the flattened kernel.
    out_ref[...] = jnp.sum(act * w5_ref[...], axis=(0, 1), keepdims=True)[None]


# ---------------------------------------------------------------------------
# Wrapper
# ---------------------------------------------------------------------------

def wgan_discriminator_forward(x_nchw, params):
    """Forward pass of WGANDiscriminator; returns a 1-D array (== .view(-1))."""
    n, c0, hgt, wid = x_nchw.shape
    assert hgt == 64 and wid == 64, "this WGAN discriminator expects 64x64 inputs"

    # One-time layout op: channels-last, lanes = (w, c) flattened.
    x_l = jnp.transpose(x_nchw, (0, 2, 3, 1)).reshape(n, hgt, wid * c0)
    x_l = x_l.astype(jnp.float32)

    operands = [x_l]
    in_specs = [pl.BlockSpec((1, hgt, wid * c0), lambda i: (i, 0, 0))]

    h, w = hgt, wid
    flops = 0
    for wt in params[:4]:
        cout, cin, _, _ = wt.shape
        oh, ow = h // 2, w // 2
        sel = jnp.asarray(_row_selection(oh, h))                     # (4, oh, h)
        band = jnp.asarray(_col_band(w, ow))                         # (w, 4, ow)
        # BW[kh, u*cin+ci, ox*cout+co] = W[co, ci, kh, u+1-2*ox] (0 outside band)
        bw = jnp.einsum("ukx,oihk->huixo", band, wt.astype(jnp.float32))
        bw = bw.reshape(4, w * cin, ow * cout)
        operands += [sel, bw]
        in_specs += [
            pl.BlockSpec(sel.shape, lambda i: (0, 0, 0)),
            pl.BlockSpec(bw.shape, lambda i: (0, 0, 0)),
        ]
        flops += 2 * 4 * (oh * h * (w * cin) + oh * (w * cin) * (ow * cout))
        h, w = oh, ow

    w5 = params[4]                                                   # (1, c4, 4, 4)
    c4 = w5.shape[1]
    w5_mat = jnp.transpose(w5[0], (1, 2, 0)).reshape(h, w * c4)      # (4, 4*c4)
    operands.append(w5_mat)
    in_specs.append(pl.BlockSpec(w5_mat.shape, lambda i: (0, 0)))
    flops += 2 * h * w * c4
    flops *= n

    bytes_accessed = sum(int(np.prod(a.shape)) * 4 for a in operands) + n * 4

    out = pl.pallas_call(
        _disc_kernel,
        grid=(n,),
        in_specs=in_specs,
        out_specs=pl.BlockSpec((1, 1, 1), lambda i: (i, 0, 0)),
        out_shape=jax.ShapeDtypeStruct((n, 1, 1), jnp.float32),
        compiler_params=pltpu.CompilerParams(
            dimension_semantics=("parallel",),
            vmem_limit_bytes=32 * 1024 * 1024,
        ),
        cost_estimate=pl.CostEstimate(
            flops=int(flops),
            transcendentals=0,
            bytes_accessed=int(bytes_accessed),
        ),
    )(*operands)
    return out.reshape(-1)


def init_params(key, img_channels=3, feature_d=8):
    """Deterministic weight init matching the module's conv shapes."""
    shapes = [
        (feature_d, img_channels, 4, 4),
        (feature_d * 2, feature_d, 4, 4),
        (feature_d * 4, feature_d * 2, 4, 4),
        (feature_d * 8, feature_d * 4, 4, 4),
        (1, feature_d * 8, 4, 4),
    ]
    keys = jax.random.split(key, len(shapes))
    return [0.05 * jax.random.normal(k, s, jnp.float32) for k, s in zip(keys, shapes)]


def _reference_forward(x, params):
    """Pure-JAX reference (lax conv) for a correctness check."""
    h = x
    for i, w in enumerate(params):
        stride = 2 if i < 4 else 1
        pad = 1 if i < 4 else 0
        h = jax.lax.conv_general_dilated(
            h, w, window_strides=(stride, stride),
            padding=[(pad, pad), (pad, pad)],
            dimension_numbers=("NCHW", "OIHW", "NCHW"))
        if i < 4:
            h = jnp.where(h >= 0, h, 0.2 * h)
    return h.reshape(-1)


if __name__ == "__main__":
    key = jax.random.PRNGKey(0)
    k_x, k_w = jax.random.split(key)

    batch, img_channels, spatial, feature_d = 2, 3, 64, 8
    x = jax.random.normal(k_x, (batch, img_channels, spatial, spatial), jnp.float32)
    params = init_params(k_w, img_channels=img_channels, feature_d=feature_d)

    fwd = jax.jit(wgan_discriminator_forward)
    out = jax.block_until_ready(fwd(x, params))
    assert out.shape == (batch,), out.shape

    ref = jax.block_until_ready(_reference_forward(x, params))
    assert jnp.allclose(out, ref, rtol=1e-3, atol=1e-3), (out, ref)

    print("KERNEL_OK")
</pallas_src>

<mosaic_0001>
module attributes {stable_mosaic.version = 11 : i64} {
  func.func @_disc_kernel(%arg0: i32, %arg1: memref<1x64x192xf32, #tpu.memory_space<vmem>>, %arg2: memref<4x32x64xf32, #tpu.memory_space<vmem>>, %arg3: memref<4x192x256xf32, #tpu.memory_space<vmem>>, %arg4: memref<4x16x32xf32, #tpu.memory_space<vmem>>, %arg5: memref<4x256x256xf32, #tpu.memory_space<vmem>>, %arg6: memref<4x8x16xf32, #tpu.memory_space<vmem>>, %arg7: memref<4x256x256xf32, #tpu.memory_space<vmem>>, %arg8: memref<4x4x8xf32, #tpu.memory_space<vmem>>, %arg9: memref<4x256x256xf32, #tpu.memory_space<vmem>>, %arg10: memref<4x256xf32, #tpu.memory_space<vmem>>, %arg11: memref<1x1x1xf32, #tpu.memory_space<vmem>>) attributes {dimension_semantics = [#tpu.dimension_semantics<parallel>], iteration_bounds = array<i64: 2>, scalar_prefetch = 0 : i64, scratch_operands = 0 : i64, tpu.core_type = #tpu.core_type<tc>, window_params = [{transform_indices = @transform_0, window_bounds = array<i64: 1, 64, 192>}, {pipeline_mode = #tpu.pipeline_mode<synchronous>, transform_indices = @transform_1, window_bounds = array<i64: 4, 32, 64>}, {pipeline_mode = #tpu.pipeline_mode<synchronous>, transform_indices = @transform_2, window_bounds = array<i64: 4, 192, 256>}, {pipeline_mode = #tpu.pipeline_mode<synchronous>, transform_indices = @transform_3, window_bounds = array<i64: 4, 16, 32>}, {pipeline_mode = #tpu.pipeline_mode<synchronous>, transform_indices = @transform_4, window_bounds = array<i64: 4, 256, 256>}, {pipeline_mode = #tpu.pipeline_mode<synchronous>, transform_indices = @transform_5, window_bounds = array<i64: 4, 8, 16>}, {pipeline_mode = #tpu.pipeline_mode<synchronous>, transform_indices = @transform_6, window_bounds = array<i64: 4, 256, 256>}, {pipeline_mode = #tpu.pipeline_mode<synchronous>, transform_indices = @transform_7, window_bounds = array<i64: 4, 4, 8>}, {pipeline_mode = #tpu.pipeline_mode<synchronous>, transform_indices = @transform_8, window_bounds = array<i64: 4, 256, 256>}, {pipeline_mode = #tpu.pipeline_mode<synchronous>, transform_indices = @transform_9, window_bounds = array<i64: 4, 256>}, {transform_indices = @transform_10, window_bounds = array<i64: 1, 1, 1>}]} {
    %c0 = arith.constant 0 : index
    %c0_0 = arith.constant 0 : index
    %c0_1 = arith.constant 0 : index
    %0 = vector.load %arg1[%c0, %c0_0, %c0_1] : memref<1x64x192xf32, #tpu.memory_space<vmem>>, vector<1x64x192xf32>
    %1 = vector.shape_cast %0 : vector<1x64x192xf32> to vector<64x192xf32>
    %c0_2 = arith.constant 0 : index
    %c0_3 = arith.constant 0 : index
    %c0_4 = arith.constant 0 : index
    %2 = vector.load %arg2[%c0_2, %c0_3, %c0_4] : memref<4x32x64xf32, #tpu.memory_space<vmem>>, vector<1x32x64xf32>
    %3 = vector.shape_cast %2 : vector<1x32x64xf32> to vector<32x64xf32>
    %cst = arith.constant dense<0.000000e+00> : vector<32x192xf32>
    %4 = tpu.matmul %3, %1, %cst {dimension_numbers = #tpu.dot_dimension_numbers<[1], [0], [0], [1], [0, 0, 1, 1], [], []>} : vector<32x64xf32>, vector<64x192xf32>, vector<32x192xf32> -> vector<32x192xf32>
    %c0_5 = arith.constant 0 : index
    %c0_6 = arith.constant 0 : index
    %c0_7 = arith.constant 0 : index
    %5 = vector.load %arg3[%c0_5, %c0_6, %c0_7] : memref<4x192x256xf32, #tpu.memory_space<vmem>>, vector<1x192x256xf32>
    %6 = vector.shape_cast %5 : vector<1x192x256xf32> to vector<192x256xf32>
    %cst_8 = arith.constant dense<0.000000e+00> : vector<32x256xf32>
    %7 = tpu.matmul %4, %6, %cst_8 {dimension_numbers = #tpu.dot_dimension_numbers<[1], [0], [0], [1], [0, 0, 1, 1], [], []>} : vector<32x192xf32>, vector<192x256xf32>, vector<32x256xf32> -> vector<32x256xf32>
    %c1 = arith.constant 1 : index
    %c0_9 = arith.constant 0 : index
    %c0_10 = arith.constant 0 : index
    %8 = vector.load %arg2[%c1, %c0_9, %c0_10] : memref<4x32x64xf32, #tpu.memory_space<vmem>>, vector<1x32x64xf32>
    %9 = vector.shape_cast %8 : vector<1x32x64xf32> to vector<32x64xf32>
    %cst_11 = arith.constant dense<0.000000e+00> : vector<32x192xf32>
    %10 = tpu.matmul %9, %1, %cst_11 {dimension_numbers = #tpu.dot_dimension_numbers<[1], [0], [0], [1], [0, 0, 1, 1], [], []>} : vector<32x64xf32>, vector<64x192xf32>, vector<32x192xf32> -> vector<32x192xf32>
    %c1_12 = arith.constant 1 : index
    %c0_13 = arith.constant 0 : index
    %c0_14 = arith.constant 0 : index
    %11 = vector.load %arg3[%c1_12, %c0_13, %c0_14] : memref<4x192x256xf32, #tpu.memory_space<vmem>>, vector<1x192x256xf32>
    %12 = vector.shape_cast %11 : vector<1x192x256xf32> to vector<192x256xf32>
    %cst_15 = arith.constant dense<0.000000e+00> : vector<32x256xf32>
    %13 = tpu.matmul %10, %12, %cst_15 {dimension_numbers = #tpu.dot_dimension_numbers<[1], [0], [0], [1], [0, 0, 1, 1], [], []>} : vector<32x192xf32>, vector<192x256xf32>, vector<32x256xf32> -> vector<32x256xf32>
    %14 = arith.addf %7, %13 : vector<32x256xf32>
    %c2 = arith.constant 2 : index
    %c0_16 = arith.constant 0 : index
    %c0_17 = arith.constant 0 : index
    %15 = vector.load %arg2[%c2, %c0_16, %c0_17] : memref<4x32x64xf32, #tpu.memory_space<vmem>>, vector<1x32x64xf32>
    %16 = vector.shape_cast %15 : vector<1x32x64xf32> to vector<32x64xf32>
    %cst_18 = arith.constant dense<0.000000e+00> : vector<32x192xf32>
    %17 = tpu.matmul %16, %1, %cst_18 {dimension_numbers = #tpu.dot_dimension_numbers<[1], [0], [0], [1], [0, 0, 1, 1], [], []>} : vector<32x64xf32>, vector<64x192xf32>, vector<32x192xf32> -> vector<32x192xf32>
    %c2_19 = arith.constant 2 : index
    %c0_20 = arith.constant 0 : index
    %c0_21 = arith.constant 0 : index
    %18 = vector.load %arg3[%c2_19, %c0_20, %c0_21] : memref<4x192x256xf32, #tpu.memory_space<vmem>>, vector<1x192x256xf32>
    %19 = vector.shape_cast %18 : vector<1x192x256xf32> to vector<192x256xf32>
    %cst_22 = arith.constant dense<0.000000e+00> : vector<32x256xf32>
    %20 = tpu.matmul %17, %19, %cst_22 {dimension_numbers = #tpu.dot_dimension_numbers<[1], [0], [0], [1], [0, 0, 1, 1], [], []>} : vector<32x192xf32>, vector<192x256xf32>, vector<32x256xf32> -> vector<32x256xf32>
    %21 = arith.addf %14, %20 : vector<32x256xf32>
    %c3 = arith.constant 3 : index
    %c0_23 = arith.constant 0 : index
    %c0_24 = arith.constant 0 : index
    %22 = vector.load %arg2[%c3, %c0_23, %c0_24] : memref<4x32x64xf32, #tpu.memory_space<vmem>>, vector<1x32x64xf32>
    %23 = vector.shape_cast %22 : vector<1x32x64xf32> to vector<32x64xf32>
    %cst_25 = arith.constant dense<0.000000e+00> : vector<32x192xf32>
    %24 = tpu.matmul %23, %1, %cst_25 {dimension_numbers = #tpu.dot_dimension_numbers<[1], [0], [0], [1], [0, 0, 1, 1], [], []>} : vector<32x64xf32>, vector<64x192xf32>, vector<32x192xf32> -> vector<32x192xf32>
    %c3_26 = arith.constant 3 : index
    %c0_27 = arith.constant 0 : index
    %c0_28 = arith.constant 0 : index
    %25 = vector.load %arg3[%c3_26, %c0_27, %c0_28] : memref<4x192x256xf32, #tpu.memory_space<vmem>>, vector<1x192x256xf32>
    %26 = vector.shape_cast %25 : vector<1x192x256xf32> to vector<192x256xf32>
    %cst_29 = arith.constant dense<0.000000e+00> : vector<32x256xf32>
    %27 = tpu.matmul %24, %26, %cst_29 {dimension_numbers = #tpu.dot_dimension_numbers<[1], [0], [0], [1], [0, 0, 1, 1], [], []>} : vector<32x192xf32>, vector<192x256xf32>, vector<32x256xf32> -> vector<32x256xf32>
    %28 = arith.addf %21, %27 : vector<32x256xf32>
    %cst_30 = arith.constant 0.000000e+00 : f32
    %29 = vector.broadcast %cst_30 : f32 to vector<32x256xf32>
    %30 = arith.cmpf oge, %28, %29 : vector<32x256xf32>
    %cst_31 = arith.constant 2.000000e-01 : f32
    %31 = vector.broadcast %cst_31 : f32 to vector<32x256xf32>
    %32 = arith.mulf %31, %28 : vector<32x256xf32>
    %33 = arith.select %30, %28, %32 : vector<32x256xi1>, vector<32x256xf32>
    %c0_32 = arith.constant 0 : index
    %c0_33 = arith.constant 0 : index
    %c0_34 = arith.constant 0 : index
    %34 = vector.load %arg4[%c0_32, %c0_33, %c0_34] : memref<4x16x32xf32, #tpu.memory_space<vmem>>, vector<1x16x32xf32>
    %35 = vector.shape_cast %34 : vector<1x16x32xf32> to vector<16x32xf32>
    %cst_35 = arith.constant dense<0.000000e+00> : vector<16x256xf32>
    %36 = tpu.matmul %35, %33, %cst_35 {dimension_numbers = #tpu.dot_dimension_numbers<[1], [0], [0], [1], [0, 0, 1, 1], [], []>} : vector<16x32xf32>, vector<32x256xf32>, vector<16x256xf32> -> vector<16x256xf32>
    %c0_36 = arith.constant 0 : index
    %c0_37 = arith.constant 0 : index
    %c0_38 = arith.constant 0 : index
    %37 = vector.load %arg5[%c0_36, %c0_37, %c0_38] : memref<4x256x256xf32, #tpu.memory_space<vmem>>, vector<1x256x256xf32>
    %38 = vector.shape_cast %37 : vector<1x256x256xf32> to vector<256x256xf32>
    %cst_39 = arith.constant dense<0.000000e+00> : vector<16x256xf32>
    %39 = tpu.matmul %36, %38, %cst_39 {dimension_numbers = #tpu.dot_dimension_numbers<[1], [0], [0], [1], [0, 0, 1, 1], [], []>} : vector<16x256xf32>, vector<256x256xf32>, vector<16x256xf32> -> vector<16x256xf32>
    %c1_40 = arith.constant 1 : index
    %c0_41 = arith.constant 0 : index
    %c0_42 = arith.constant 0 : index
    %40 = vector.load %arg4[%c1_40, %c0_41, %c0_42] : memref<4x16x32xf32, #tpu.memory_space<vmem>>, vector<1x16x32xf32>
    %41 = vector.shape_cast %40 : vector<1x16x32xf32> to vector<16x32xf32>
    %cst_43 = arith.constant dense<0.000000e+00> : vector<16x256xf32>
    %42 = tpu.matmul %41, %33, %cst_43 {dimension_numbers = #tpu.dot_dimension_numbers<[1], [0], [0], [1], [0, 0, 1, 1], [], []>} : vector<16x32xf32>, vector<32x256xf32>, vector<16x256xf32> -> vector<16x256xf32>
    %c1_44 = arith.constant 1 : index
    %c0_45 = arith.constant 0 : index
    %c0_46 = arith.constant 0 : index
    %43 = vector.load %arg5[%c1_44, %c0_45, %c0_46] : memref<4x256x256xf32, #tpu.memory_space<vmem>>, vector<1x256x256xf32>
    %44 = vector.shape_cast %43 : vector<1x256x256xf32> to vector<256x256xf32>
    %cst_47 = arith.constant dense<0.000000e+00> : vector<16x256xf32>
    %45 = tpu.matmul %42, %44, %cst_47 {dimension_numbers = #tpu.dot_dimension_numbers<[1], [0], [0], [1], [0, 0, 1, 1], [], []>} : vector<16x256xf32>, vector<256x256xf32>, vector<16x256xf32> -> vector<16x256xf32>
    %46 = arith.addf %39, %45 : vector<16x256xf32>
    %c2_48 = arith.constant 2 : index
    %c0_49 = arith.constant 0 : index
    %c0_50 = arith.constant 0 : index
    %47 = vector.load %arg4[%c2_48, %c0_49, %c0_50] : memref<4x16x32xf32, #tpu.memory_space<vmem>>, vector<1x16x32xf32>
    %48 = vector.shape_cast %47 : vector<1x16x32xf32> to vector<16x32xf32>
    %cst_51 = arith.constant dense<0.000000e+00> : vector<16x256xf32>
    %49 = tpu.matmul %48, %33, %cst_51 {dimension_numbers = #tpu.dot_dimension_numbers<[1], [0], [0], [1], [0, 0, 1, 1], [], []>} : vector<16x32xf32>, vector<32x256xf32>, vector<16x256xf32> -> vector<16x256xf32>
    %c2_52 = arith.constant 2 : index
    %c0_53 = arith.constant 0 : index
    %c0_54 = arith.constant 0 : index
    %50 = vector.load %arg5[%c2_52, %c0_53, %c0_54] : memref<4x256x256xf32, #tpu.memory_space<vmem>>, vector<1x256x256xf32>
    %51 = vector.shape_cast %50 : vector<1x256x256xf32> to vector<256x256xf32>
    %cst_55 = arith.constant dense<0.000000e+00> : vector<16x256xf32>
    %52 = tpu.matmul %49, %51, %cst_55 {dimension_numbers = #tpu.dot_dimension_numbers<[1], [0], [0], [1], [0, 0, 1, 1], [], []>} : vector<16x256xf32>, vector<256x256xf32>, vector<16x256xf32> -> vector<16x256xf32>
    %53 = arith.addf %46, %52 : vector<16x256xf32>
    %c3_56 = arith.constant 3 : index
    %c0_57 = arith.constant 0 : index
    %c0_58 = arith.constant 0 : index
    %54 = vector.load %arg4[%c3_56, %c0_57, %c0_58] : memref<4x16x32xf32, #tpu.memory_space<vmem>>, vector<1x16x32xf32>
    %55 = vector.shape_cast %54 : vector<1x16x32xf32> to vector<16x32xf32>
    %cst_59 = arith.constant dense<0.000000e+00> : vector<16x256xf32>
    %56 = tpu.matmul %55, %33, %cst_59 {dimension_numbers = #tpu.dot_dimension_numbers<[1], [0], [0], [1], [0, 0, 1, 1], [], []>} : vector<16x32xf32>, vector<32x256xf32>, vector<16x256xf32> -> vector<16x256xf32>
    %c3_60 = arith.constant 3 : index
    %c0_61 = arith.constant 0 : index
    %c0_62 = arith.constant 0 : index
    %57 = vector.load %arg5[%c3_60, %c0_61, %c0_62] : memref<4x256x256xf32, #tpu.memory_space<vmem>>, vector<1x256x256xf32>
    %58 = vector.shape_cast %57 : vector<1x256x256xf32> to vector<256x256xf32>
    %cst_63 = arith.constant dense<0.000000e+00> : vector<16x256xf32>
    %59 = tpu.matmul %56, %58, %cst_63 {dimension_numbers = #tpu.dot_dimension_numbers<[1], [0], [0], [1], [0, 0, 1, 1], [], []>} : vector<16x256xf32>, vector<256x256xf32>, vector<16x256xf32> -> vector<16x256xf32>
    %60 = arith.addf %53, %59 : vector<16x256xf32>
    %cst_64 = arith.constant 0.000000e+00 : f32
    %61 = vector.broadcast %cst_64 : f32 to vector<16x256xf32>
    %62 = arith.cmpf oge, %60, %61 : vector<16x256xf32>
    %cst_65 = arith.constant 2.000000e-01 : f32
    %63 = vector.broadcast %cst_65 : f32 to vector<16x256xf32>
    %64 = arith.mulf %63, %60 : vector<16x256xf32>
    %65 = arith.select %62, %60, %64 : vector<16x256xi1>, vector<16x256xf32>
    %c0_66 = arith.constant 0 : index
    %c0_67 = arith.constant 0 : index
    %c0_68 = arith.constant 0 : index
    %66 = vector.load %arg6[%c0_66, %c0_67, %c0_68] : memref<4x8x16xf32, #tpu.memory_space<vmem>>, vector<1x8x16xf32>
    %67 = vector.shape_cast %66 : vector<1x8x16xf32> to vector<8x16xf32>
    %cst_69 = arith.constant dense<0.000000e+00> : vector<8x256xf32>
    %68 = tpu.matmul %67, %65, %cst_69 {dimension_numbers = #tpu.dot_dimension_numbers<[1], [0], [0], [1], [0, 0, 1, 1], [], []>} : vector<8x16xf32>, vector<16x256xf32>, vector<8x256xf32> -> vector<8x256xf32>
    %c0_70 = arith.constant 0 : index
    %c0_71 = arith.constant 0 : index
    %c0_72 = arith.constant 0 : index
    %69 = vector.load %arg7[%c0_70, %c0_71, %c0_72] : memref<4x256x256xf32, #tpu.memory_space<vmem>>, vector<1x256x256xf32>
    %70 = vector.shape_cast %69 : vector<1x256x256xf32> to vector<256x256xf32>
    %cst_73 = arith.constant dense<0.000000e+00> : vector<8x256xf32>
    %71 = tpu.matmul %68, %70, %cst_73 {dimension_numbers = #tpu.dot_dimension_numbers<[1], [0], [0], [1], [0, 0, 1, 1], [], []>} : vector<8x256xf32>, vector<256x256xf32>, vector<8x256xf32> -> vector<8x256xf32>
    %c1_74 = arith.constant 1 : index
    %c0_75 = arith.constant 0 : index
    %c0_76 = arith.constant 0 : index
    %72 = vector.load %arg6[%c1_74, %c0_75, %c0_76] : memref<4x8x16xf32, #tpu.memory_space<vmem>>, vector<1x8x16xf32>
    %73 = vector.shape_cast %72 : vector<1x8x16xf32> to vector<8x16xf32>
    %cst_77 = arith.constant dense<0.000000e+00> : vector<8x256xf32>
    %74 = tpu.matmul %73, %65, %cst_77 {dimension_numbers = #tpu.dot_dimension_numbers<[1], [0], [0], [1], [0, 0, 1, 1], [], []>} : vector<8x16xf32>, vector<16x256xf32>, vector<8x256xf32> -> vector<8x256xf32>
    %c1_78 = arith.constant 1 : index
    %c0_79 = arith.constant 0 : index
    %c0_80 = arith.constant 0 : index
    %75 = vector.load %arg7[%c1_78, %c0_79, %c0_80] : memref<4x256x256xf32, #tpu.memory_space<vmem>>, vector<1x256x256xf32>
    %76 = vector.shape_cast %75 : vector<1x256x256xf32> to vector<256x256xf32>
    %cst_81 = arith.constant dense<0.000000e+00> : vector<8x256xf32>
    %77 = tpu.matmul %74, %76, %cst_81 {dimension_numbers = #tpu.dot_dimension_numbers<[1], [0], [0], [1], [0, 0, 1, 1], [], []>} : vector<8x256xf32>, vector<256x256xf32>, vector<8x256xf32> -> vector<8x256xf32>
    %78 = arith.addf %71, %77 : vector<8x256xf32>
    %c2_82 = arith.constant 2 : index
    %c0_83 = arith.constant 0 : index
    %c0_84 = arith.constant 0 : index
    %79 = vector.load %arg6[%c2_82, %c0_83, %c0_84] : memref<4x8x16xf32, #tpu.memory_space<vmem>>, vector<1x8x16xf32>
    %80 = vector.shape_cast %79 : vector<1x8x16xf32> to vector<8x16xf32>
    %cst_85 = arith.constant dense<0.000000e+00> : vector<8x256xf32>
    %81 = tpu.matmul %80, %65, %cst_85 {dimension_numbers = #tpu.dot_dimension_numbers<[1], [0], [0], [1], [0, 0, 1, 1], [], []>} : vector<8x16xf32>, vector<16x256xf32>, vector<8x256xf32> -> vector<8x256xf32>
    %c2_86 = arith.constant 2 : index
    %c0_87 = arith.constant 0 : index
    %c0_88 = arith.constant 0 : index
    %82 = vector.load %arg7[%c2_86, %c0_87, %c0_88] : memref<4x256x256xf32, #tpu.memory_space<vmem>>, vector<1x256x256xf32>
    %83 = vector.shape_cast %82 : vector<1x256x256xf32> to vector<256x256xf32>
    %cst_89 = arith.constant dense<0.000000e+00> : vector<8x256xf32>
    %84 = tpu.matmul %81, %83, %cst_89 {dimension_numbers = #tpu.dot_dimension_numbers<[1], [0], [0], [1], [0, 0, 1, 1], [], []>} : vector<8x256xf32>, vector<256x256xf32>, vector<8x256xf32> -> vector<8x256xf32>
    %85 = arith.addf %78, %84 : vector<8x256xf32>
    %c3_90 = arith.constant 3 : index
    %c0_91 = arith.constant 0 : index
    %c0_92 = arith.constant 0 : index
    %86 = vector.load %arg6[%c3_90, %c0_91, %c0_92] : memref<4x8x16xf32, #tpu.memory_space<vmem>>, vector<1x8x16xf32>
    %87 = vector.shape_cast %86 : vector<1x8x16xf32> to vector<8x16xf32>
    %cst_93 = arith.constant dense<0.000000e+00> : vector<8x256xf32>
    %88 = tpu.matmul %87, %65, %cst_93 {dimension_numbers = #tpu.dot_dimension_numbers<[1], [0], [0], [1], [0, 0, 1, 1], [], []>} : vector<8x16xf32>, vector<16x256xf32>, vector<8x256xf32> -> vector<8x256xf32>
    %c3_94 = arith.constant 3 : index
    %c0_95 = arith.constant 0 : index
    %c0_96 = arith.constant 0 : index
    %89 = vector.load %arg7[%c3_94, %c0_95, %c0_96] : memref<4x256x256xf32, #tpu.memory_space<vmem>>, vector<1x256x256xf32>
    %90 = vector.shape_cast %89 : vector<1x256x256xf32> to vector<256x256xf32>
    %cst_97 = arith.constant dense<0.000000e+00> : vector<8x256xf32>
    %91 = tpu.matmul %88, %90, %cst_97 {dimension_numbers = #tpu.dot_dimension_numbers<[1], [0], [0], [1], [0, 0, 1, 1], [], []>} : vector<8x256xf32>, vector<256x256xf32>, vector<8x256xf32> -> vector<8x256xf32>
    %92 = arith.addf %85, %91 : vector<8x256xf32>
    %cst_98 = arith.constant 0.000000e+00 : f32
    %93 = vector.broadcast %cst_98 : f32 to vector<8x256xf32>
    %94 = arith.cmpf oge, %92, %93 : vector<8x256xf32>
    %cst_99 = arith.constant 2.000000e-01 : f32
    %95 = vector.broadcast %cst_99 : f32 to vector<8x256xf32>
    %96 = arith.mulf %95, %92 : vector<8x256xf32>
    %97 = arith.select %94, %92, %96 : vector<8x256xi1>, vector<8x256xf32>
    %c0_100 = arith.constant 0 : index
    %c0_101 = arith.constant 0 : index
    %c0_102 = arith.constant 0 : index
    %98 = vector.load %arg8[%c0_100, %c0_101, %c0_102] : memref<4x4x8xf32, #tpu.memory_space<vmem>>, vector<1x4x8xf32>
    %99 = vector.shape_cast %98 : vector<1x4x8xf32> to vector<4x8xf32>
    %cst_103 = arith.constant dense<0.000000e+00> : vector<4x256xf32>
    %100 = tpu.matmul %99, %97, %cst_103 {dimension_numbers = #tpu.dot_dimension_numbers<[1], [0], [0], [1], [0, 0, 1, 1], [], []>} : vector<4x8xf32>, vector<8x256xf32>, vector<4x256xf32> -> vector<4x256xf32>
    %c0_104 = arith.constant 0 : index
    %c0_105 = arith.constant 0 : index
    %c0_106 = arith.constant 0 : index
    %101 = vector.load %arg9[%c0_104, %c0_105, %c0_106] : memref<4x256x256xf32, #tpu.memory_space<vmem>>, vector<1x256x256xf32>
    %102 = vector.shape_cast %101 : vector<1x256x256xf32> to vector<256x256xf32>
    %cst_107 = arith.constant dense<0.000000e+00> : vector<4x256xf32>
    %103 = tpu.matmul %100, %102, %cst_107 {dimension_numbers = #tpu.dot_dimension_numbers<[1], [0], [0], [1], [0, 0, 1, 1], [], []>} : vector<4x256xf32>, vector<256x256xf32>, vector<4x256xf32> -> vector<4x256xf32>
    %c1_108 = arith.constant 1 : index
    %c0_109 = arith.constant 0 : index
    %c0_110 = arith.constant 0 : index
    %104 = vector.load %arg8[%c1_108, %c0_109, %c0_110] : memref<4x4x8xf32, #tpu.memory_space<vmem>>, vector<1x4x8xf32>
    %105 = vector.shape_cast %104 : vector<1x4x8xf32> to vector<4x8xf32>
    %cst_111 = arith.constant dense<0.000000e+00> : vector<4x256xf32>
    %106 = tpu.matmul %105, %97, %cst_111 {dimension_numbers = #tpu.dot_dimension_numbers<[1], [0], [0], [1], [0, 0, 1, 1], [], []>} : vector<4x8xf32>, vector<8x256xf32>, vector<4x256xf32> -> vector<4x256xf32>
    %c1_112 = arith.constant 1 : index
    %c0_113 = arith.constant 0 : index
    %c0_114 = arith.constant 0 : index
    %107 = vector.load %arg9[%c1_112, %c0_113, %c0_114] : memref<4x256x256xf32, #tpu.memory_space<vmem>>, vector<1x256x256xf32>
    %108 = vector.shape_cast %107 : vector<1x256x256xf32> to vector<256x256xf32>
    %cst_115 = arith.constant dense<0.000000e+00> : vector<4x256xf32>
    %109 = tpu.matmul %106, %108, %cst_115 {dimension_numbers = #tpu.dot_dimension_numbers<[1], [0], [0], [1], [0, 0, 1, 1], [], []>} : vector<4x256xf32>, vector<256x256xf32>, vector<4x256xf32> -> vector<4x256xf32>
    %110 = arith.addf %103, %109 : vector<4x256xf32>
    %c2_116 = arith.constant 2 : index
    %c0_117 = arith.constant 0 : index
    %c0_118 = arith.constant 0 : index
    %111 = vector.load %arg8[%c2_116, %c0_117, %c0_118] : memref<4x4x8xf32, #tpu.memory_space<vmem>>, vector<1x4x8xf32>
    %112 = vector.shape_cast %111 : vector<1x4x8xf32> to vector<4x8xf32>
    %cst_119 = arith.constant dense<0.000000e+00> : vector<4x256xf32>
    %113 = tpu.matmul %112, %97, %cst_119 {dimension_numbers = #tpu.dot_dimension_numbers<[1], [0], [0], [1], [0, 0, 1, 1], [], []>} : vector<4x8xf32>, vector<8x256xf32>, vector<4x256xf32> -> vector<4x256xf32>
    %c2_120 = arith.constant 2 : index
    %c0_121 = arith.constant 0 : index
    %c0_122 = arith.constant 0 : index
    %114 = vector.load %arg9[%c2_120, %c0_121, %c0_122] : memref<4x256x256xf32, #tpu.memory_space<vmem>>, vector<1x256x256xf32>
    %115 = vector.shape_cast %114 : vector<1x256x256xf32> to vector<256x256xf32>
    %cst_123 = arith.constant dense<0.000000e+00> : vector<4x256xf32>
    %116 = tpu.matmul %113, %115, %cst_123 {dimension_numbers = #tpu.dot_dimension_numbers<[1], [0], [0], [1], [0, 0, 1, 1], [], []>} : vector<4x256xf32>, vector<256x256xf32>, vector<4x256xf32> -> vector<4x256xf32>
    %117 = arith.addf %110, %116 : vector<4x256xf32>
    %c3_124 = arith.constant 3 : index
    %c0_125 = arith.constant 0 : index
    %c0_126 = arith.constant 0 : index
    %118 = vector.load %arg8[%c3_124, %c0_125, %c0_126] : memref<4x4x8xf32, #tpu.memory_space<vmem>>, vector<1x4x8xf32>
    %119 = vector.shape_cast %118 : vector<1x4x8xf32> to vector<4x8xf32>
    %cst_127 = arith.constant dense<0.000000e+00> : vector<4x256xf32>
    %120 = tpu.matmul %119, %97, %cst_127 {dimension_numbers = #tpu.dot_dimension_numbers<[1], [0], [0], [1], [0, 0, 1, 1], [], []>} : vector<4x8xf32>, vector<8x256xf32>, vector<4x256xf32> -> vector<4x256xf32>
    %c3_128 = arith.constant 3 : index
    %c0_129 = arith.constant 0 : index
    %c0_130 = arith.constant 0 : index
    %121 = vector.load %arg9[%c3_128, %c0_129, %c0_130] : memref<4x256x256xf32, #tpu.memory_space<vmem>>, vector<1x256x256xf32>
    %122 = vector.shape_cast %121 : vector<1x256x256xf32> to vector<256x256xf32>
    %cst_131 = arith.constant dense<0.000000e+00> : vector<4x256xf32>
    %123 = tpu.matmul %120, %122, %cst_131 {dimension_numbers = #tpu.dot_dimension_numbers<[1], [0], [0], [1], [0, 0, 1, 1], [], []>} : vector<4x256xf32>, vector<256x256xf32>, vector<4x256xf32> -> vector<4x256xf32>
    %124 = arith.addf %117, %123 : vector<4x256xf32>
    %cst_132 = arith.constant 0.000000e+00 : f32
    %125 = vector.broadcast %cst_132 : f32 to vector<4x256xf32>
    %126 = arith.cmpf oge, %124, %125 : vector<4x256xf32>
    %cst_133 = arith.constant 2.000000e-01 : f32
    %127 = vector.broadcast %cst_133 : f32 to vector<4x256xf32>
    %128 = arith.mulf %127, %124 : vector<4x256xf32>
    %129 = arith.select %126, %124, %128 : vector<4x256xi1>, vector<4x256xf32>
    %c0_134 = arith.constant 0 : index
    %c0_135 = arith.constant 0 : index
    %130 = vector.load %arg10[%c0_134, %c0_135] : memref<4x256xf32, #tpu.memory_space<vmem>>, vector<4x256xf32>
    %131 = arith.mulf %129, %130 : vector<4x256xf32>
    %132 = vector.shape_cast %131 : vector<4x256xf32> to vector<1x4x256xf32>
    %cst_136 = arith.constant dense<0.000000e+00> : vector<1xf32>
    %133 = vector.multi_reduction <add>, %132, %cst_136 [1, 2] : vector<1x4x256xf32> to vector<1xf32>
    %134 = vector.shape_cast %133 : vector<1xf32> to vector<1x1x1xf32>
    %135 = vector.extract %134[0, 0, 0] : f32 from vector<1x1x1xf32>
    %136 = vector.broadcast %135 : f32 to vector<1x1xf32>
    %137 = vector.shape_cast %136 : vector<1x1xf32> to vector<1x1x1xf32>
    %c0_137 = arith.constant 0 : index
    %c0_138 = arith.constant 0 : index
    %c0_139 = arith.constant 0 : index
    %138 = vector.load %arg11[%c0_137, %c0_138, %c0_139] : memref<1x1x1xf32, #tpu.memory_space<vmem>>, vector<1x1x1xf32>
    tpu.vector_store %arg11[%c0_137, %c0_138, %c0_139], %137 {strides = array<i32>} : memref<1x1x1xf32, #tpu.memory_space<vmem>>, vector<1x1x1xf32>,
    return
  }
  func.func @transform_0(%arg0: i32) -> (i32, i32, i32) {
    %c0_i32 = arith.constant 0 : i32
    %c0_i32_0 = arith.constant 0 : i32
    %c0_i32_1 = arith.constant 0 : i32
    return %arg0, %c0_i32, %c0_i32_0 : i32, i32, i32
  }
  func.func @transform_1(%arg0: i32) -> (i32, i32, i32) {
    %c0_i32 = arith.constant 0 : i32
    %c0_i32_0 = arith.constant 0 : i32
    %c0_i32_1 = arith.constant 0 : i32
    %c0_i32_2 = arith.constant 0 : i32
    return %c0_i32, %c0_i32_0, %c0_i32_1 : i32, i32, i32
  }
  func.func @transform_2(%arg0: i32) -> (i32, i32, i32) {
    %c0_i32 = arith.constant 0 : i32
    %c0_i32_0 = arith.constant 0 : i32
    %c0_i32_1 = arith.constant 0 : i32
    %c0_i32_2 = arith.constant 0 : i32
    return %c0_i32, %c0_i32_0, %c0_i32_1 : i32, i32, i32
  }
  func.func @transform_3(%arg0: i32) -> (i32, i32, i32) {
    %c0_i32 = arith.constant 0 : i32
    %c0_i32_0 = arith.constant 0 : i32
    %c0_i32_1 = arith.constant 0 : i32
    %c0_i32_2 = arith.constant 0 : i32
    return %c0_i32, %c0_i32_0, %c0_i32_1 : i32, i32, i32
  }
  func.func @transform_4(%arg0: i32) -> (i32, i32, i32) {
    %c0_i32 = arith.constant 0 : i32
    %c0_i32_0 = arith.constant 0 : i32
    %c0_i32_1 = arith.constant 0 : i32
    %c0_i32_2 = arith.constant 0 : i32
    return %c0_i32, %c0_i32_0, %c0_i32_1 : i32, i32, i32
  }
  func.func @transform_5(%arg0: i32) -> (i32, i32, i32) {
    %c0_i32 = arith.constant 0 : i32
    %c0_i32_0 = arith.constant 0 : i32
    %c0_i32_1 = arith.constant 0 : i32
    %c0_i32_2 = arith.constant 0 : i32
    return %c0_i32, %c0_i32_0, %c0_i32_1 : i32, i32, i32
  }
  func.func @transform_6(%arg0: i32) -> (i32, i32, i32) {
    %c0_i32 = arith.constant 0 : i32
    %c0_i32_0 = arith.constant 0 : i32
    %c0_i32_1 = arith.constant 0 : i32
    %c0_i32_2 = arith.constant 0 : i32
    return %c0_i32, %c0_i32_0, %c0_i32_1 : i32, i32, i32
  }
  func.func @transform_7(%arg0: i32) -> (i32, i32, i32) {
    %c0_i32 = arith.constant 0 : i32
    %c0_i32_0 = arith.constant 0 : i32
    %c0_i32_1 = arith.constant 0 : i32
    %c0_i32_2 = arith.constant 0 : i32
    return %c0_i32, %c0_i32_0, %c0_i32_1 : i32, i32, i32
  }
  func.func @transform_8(%arg0: i32) -> (i32, i32, i32) {
    %c0_i32 = arith.constant 0 : i32
    %c0_i32_0 = arith.constant 0 : i32
    %c0_i32_1 = arith.constant 0 : i32
    %c0_i32_2 = arith.constant 0 : i32
    return %c0_i32, %c0_i32_0, %c0_i32_1 : i32, i32, i32
  }
  func.func @transform_9(%arg0: i32) -> (i32, i32) {
    %c0_i32 = arith.constant 0 : i32
    %c0_i32_0 = arith.constant 0 : i32
    %c0_i32_1 = arith.constant 0 : i32
    return %c0_i32, %c0_i32_0 : i32, i32
  }
  func.func @transform_10(%arg0: i32) -> (i32, i32, i32) {
    %c0_i32 = arith.constant 0 : i32
    %c0_i32_0 = arith.constant 0 : i32
    %c0_i32_1 = arith.constant 0 : i32
    return %arg0, %c0_i32, %c0_i32_0 : i32, i32, i32
  }
}

</mosaic_0001>

<bundles_post_ra>
// kernel: wgan_discriminator_forward.1
= control target key start
LH: loop header
LB: loop body
LE: loop exit
PB: predicated region body
PF: predicated region fallthrough
CT: control target
= control target key end

     0   :  { %s6147_s13 = smov 0   ;;  %s9440_s0 = inlined_call_operand.vmem [shape: f32[2,64,192], index: 0, kind: input, shape index: {}]   ;;  %s9441_s1 = inlined_call_operand.vmem [shape: f32[4,32,64], index: 1, kind: input, shape index: {}]   ;;  %s9442_s2 = inlined_call_operand.vmem [shape: f32[4,192,256], index: 2, kind: input, shape index: {}]   ;;  %s9443_s3 = inlined_call_operand.vmem [shape: f32[4,16,32], index: 3, kind: input, shape index: {}]   ;;  %s9444_s4 = inlined_call_operand.vmem [shape: f32[4,256,256], index: 4, kind: input, shape index: {}]   ;;  %s9445_s5 = inlined_call_operand.vmem [shape: f32[4,8,16], index: 5, kind: input, shape index: {}]   ;;  %s9446_s6 = inlined_call_operand.vmem [shape: f32[4,256,256], index: 6, kind: input, shape index: {}]   ;;  %s9447_s7 = inlined_call_operand.vmem [shape: f32[4,4,8], index: 7, kind: input, shape index: {}]   ;;  %s9448_s8 = inlined_call_operand.vmem [shape: f32[4,256,256], index: 8, kind: input, shape index: {}]   ;;  %s9449_s9 = inlined_call_operand.vmem [shape: f32[4,256], index: 9, kind: input, shape index: {}]   ;;  %s9450_s10 = inlined_call_operand.vmem [shape: f32[2,1,1], index: 10, kind: output, shape index: {}]  }
   0x1 LB: > { %s4149_s14 = sadd.s32 4294967295, %s6089_s13   ;;  %p4153_p0 = scmp.ge.s32.totalorder %s6089_s13, 1  ;;  %s6089_s13 = sphi %s6147_s13, %s20_s13  }
   0x2   : > { %p312_p1 = scmp.lt.s32.totalorder %s6089_s13, 3 }
   0x4   : > { %p313_p2 = pnand %p4153_p0, %p312_p1 }
   0x5   : > { %p348_p3 = scmp.lt.s32.totalorder (!%p313_p2), %s4149_s14, 1  ;;  %v6091_v0 = vmov (!%p313_p2), 0.0   ;;  %v4169_v24 = vld [vmem:[%s9442_s2 + $0x188] sm:$0xff] (!%p313_p2)  ;;  %v4171_v25 = vld [vmem:[%s9442_s2 + $0x198] sm:$0xff] (!%p313_p2)  ;;  %v4168_v28 = vld [vmem:[%s9442_s2 + $0x180] sm:$0xff] (!%p313_p2)  ;;  %vm376_vm0 = vcmask (!%p313_p2), 523264  }
   0x6   : > { %316 = sbr.rel (%p313_p2) target bundleno = 2974 (0xb9e), region = 60  ;;  %607 = vmatprep.mubr.f32.mxu1 (!%p313_p2), %v6091_v0  ;;  %453 = vmatprep.mubr.f32.mxu0 (!%p313_p2), %v6091_v0  ;;  %v4983_v27 = vpack.c.bf16 (!%p313_p2), %v4171_v25, %v4169_v24  ;;  %v4170_v29 = vld [vmem:[%s9442_s2 + $0x190] sm:$0xff] (!%p313_p2)  ;;  %v4160_v30 = vld [vmem:[%s9441_s1 + $0x20] sm:$0xff] (!%p313_p2)  ;;  %v4173_v33 = vld [vmem:[%s9442_s2 + $0x1a8] sm:$0xff] (!%p313_p2)  ;;  %vm1437_vm9 = vcmask (!%p313_p2), 261120   ;;  %vm2367_vm14 = vcmask (!%p313_p2), 130048  }
   0x7   : > { %v372_v31 = vld [vmem:[%s9441_s1] sm:$0xff] (!%p313_p2)  ;;  %v4985_v32 = vpack.c.bf16 (!%p313_p2), %v4170_v29, %v4168_v28  ;;  %v4175_v34 = vld [vmem:[%s9442_s2 + $0x1b8] sm:$0xff] (!%p313_p2)  ;;  %v4161_v35 = vld [vmem:[%s9441_s1 + $0x28] sm:$0xff] (!%p313_p2) }
   0x8   : > { %v373_v36 = vld [vmem:[%s9441_s1 + $0x8] sm:$0xff] (!%p313_p2)  ;;  %v4987_v37 = vpack.c.bf16 (!%p313_p2), %v4175_v34, %v4173_v33  ;;  %v4172_v38 = vld [vmem:[%s9442_s2 + $0x1a0] sm:$0xff] (!%p313_p2)  ;;  %v4174_v39 = vld [vmem:[%s9442_s2 + $0x1b0] sm:$0xff] (!%p313_p2) }
   0x9   : > { %v4162_v40 = vld [vmem:[%s9441_s1 + $0x30] sm:$0xff] (!%p313_p2)  ;;  %v4989_v42 = vpack.c.bf16 (!%p313_p2), %v4174_v39, %v4172_v38  ;;  %v4177_v43 = vld [vmem:[%s9442_s2 + $0x1c8] sm:$0xff] (!%p313_p2)  ;;  %v4179_v44 = vld [vmem:[%s9442_s2 + $0x1d8] sm:$0xff] (!%p313_p2) }
   0xa   : > { %v374_v41 = vld [vmem:[%s9441_s1 + $0x10] sm:$0xff] (!%p313_p2)  ;;  %v4163_v45 = vld [vmem:[%s9441_s1 + $0x38] sm:$0xff] (!%p313_p2)  ;;  %v4176_v46 = vld [vmem:[%s9442_s2 + $0x1c0] sm:$0xff] (!%p313_p2)  ;;  %v4991_v51 = vpack.c.bf16 (!%p313_p2), %v4179_v44, %v4177_v43 }
   0xb   : > { %v4178_v47 = vld [vmem:[%s9442_s2 + $0x1d0] sm:$0xff] (!%p313_p2)  ;;  %v375_v48 = vld [vmem:[%s9441_s1 + $0x18] sm:$0xff] (!%p313_p2)  ;;  %v4181_v49 = vld [vmem:[%s9442_s2 + $0x1e8] sm:$0xff] (!%p313_p2) }
   0xc   : > { %v4183_v50 = vld [vmem:[%s9442_s2 + $0x1f8] sm:$0xff] (!%p313_p2)  ;;  %v4993_v52 = vpack.c.bf16 (!%p313_p2), %v4178_v47, %v4176_v46  ;;  %v4180_v54 = vld [vmem:[%s9442_s2 + $0x1e0] sm:$0xff] (!%p313_p2)  ;;  %v4182_v55 = vld [vmem:[%s9442_s2 + $0x1f0] sm:$0xff] (!%p313_p2) }
   0xd   : > { %s9452_s14 = smov (!%p348_p3, %s4149_s14), 1  ;;  %v4995_v53 = vpack.c.bf16 %v4183_v50, %v4181_v49  ;;  %v4224_v56 = vld [vmem:[%s9441_s1 + $0x40] sm:$0xff]  ;;  %v4185_v57 = vld [vmem:[%s9442_s2 + $0x208] sm:$0xff]  ;;  %v4187_v58 = vld [vmem:[%s9442_s2 + $0x218] sm:$0xff]  ;;  %v4997_v59 = vpack.c.bf16 %v4182_v55, %v4180_v54 }
   0xe   : > { %s4950_s15 = sshll.u32 %s9452_s14, 7  ;;  %v4999_v60 = vpack.c.bf16 %v4187_v58, %v4185_v57  ;;  %v4184_v61 = vld [vmem:[%s9442_s2 + $0x200] sm:$0xff]  ;;  %v4186_v62 = vld [vmem:[%s9442_s2 + $0x210] sm:$0xff]  ;;  %v4225_v63 = vld [vmem:[%s9441_s1 + $0x48] sm:$0xff]  ;;  %s355_s27 = scalar_lea.vmem %s9450_s10, %s9452_s14 }
   0xf   : > { %s6163_s18 = scalar_lea.vmem %s9440_s0, %s4950_s15  ;;  %v4285_v28 = vld [vmem:[%s9441_s1 + $0x68] sm:$0xff]  ;;  %v4204_v33 = vld [vmem:[%s9442_s2 + $0x2a0] sm:$0xff]  ;;  %v4206_v34 = vld [vmem:[%s9442_s2 + $0x2b0] sm:$0xff] }
  0x10   : > { %v357_v1 = vld [vmem:[%s6163_s18 + $0x8] sm:$0xff]  ;;  %v359_v2 = vld [vmem:[%s6163_s18 + $0x18] sm:$0xff]  ;;  %v356_v3 = vld [vmem:[%s6163_s18] sm:$0xff]  ;;  %v5021_v38 = vpack.c.bf16 %v4206_v34, %v4204_v33 }
  0x11   : > { %v6168_v4 = vpack.c.bf16 %v359_v2, %v357_v1  ;;  %v358_v5 = vld [vmem:[%s6163_s18 + $0x10] sm:$0xff]  ;;  %v361_v6 = vld [vmem:[%s6163_s18 + $0x28] sm:$0xff]  ;;  %v363_v7 = vld [vmem:[%s6163_s18 + $0x38] sm:$0xff] }
  0x12   : > { %v6173_v8 = vpack.c.bf16 %v358_v5, %v356_v3  ;;  %v6175_v9 = vpack.c.bf16 %v363_v7, %v361_v6  ;;  %v360_v10 = vld [vmem:[%s6163_s18 + $0x20] sm:$0xff]  ;;  %v362_v11 = vld [vmem:[%s6163_s18 + $0x30] sm:$0xff]  ;;  %v365_v12 = vld [vmem:[%s6163_s18 + $0x48] sm:$0xff]  ;;  %v5001_v3 = vpack.c.bf16 %v4186_v62, %v4184_v61 }
  0x13   : > { %4968 = vmatprep.subr.bf16.mxu1 %v6168_v4  ;;  %v367_v13 = vld [vmem:[%s6163_s18 + $0x58] sm:$0xff]  ;;  %4952 = vmatprep.subr.bf16.mxu0 %v6168_v4  ;;  %v6184_v14 = vpack.c.bf16 %v362_v11, %v360_v10  ;;  %v364_v16 = vld [vmem:[%s6163_s18 + $0x40] sm:$0xff]  ;;  %v366_v17 = vld [vmem:[%s6163_s18 + $0x50] sm:$0xff] }
  0x14   : > { %4970 = vmatpush1.bf16.msra.mxu1 %v6173_v8  ;;  %4954 = vmatpush1.bf16.msra.mxu0 %v6173_v8  ;;  %v6188_v15 = vpack.c.bf16 %v367_v13, %v365_v12  ;;  %v369_v18 = vld [vmem:[%s6163_s18 + $0x68] sm:$0xff]  ;;  %v371_v19 = vld [vmem:[%s6163_s18 + $0x78] sm:$0xff]  ;;  %v6196_v20 = vpack.c.bf16 %v366_v17, %v364_v16  ;;  %v368_v22 = vld [vmem:[%s6163_s18 + $0x60] sm:$0xff] }
  0x15   : > { %4972 = vmatprep.subr.bf16.mxu1 %v6175_v9  ;;  %4956 = vmatprep.subr.bf16.mxu0 %v6175_v9  ;;  %v6200_v21 = vpack.c.bf16 %v371_v19, %v369_v18  ;;  %v370_v23 = vld [vmem:[%s6163_s18 + $0x70] sm:$0xff]  ;;  %v4189_v1 = vld [vmem:[%s9442_s2 + $0x228] sm:$0xff]  ;;  %v4191_v2 = vld [vmem:[%s9442_s2 + $0x238] sm:$0xff] }
  0x16   : > { %v6212_v26 = vpack.c.bf16 %v370_v23, %v368_v22  ;;  %v4188_v5 = vld [vmem:[%s9442_s2 + $0x220] sm:$0xff]  ;;  %v4190_v6 = vld [vmem:[%s9442_s2 + $0x230] sm:$0xff]  ;;  %v4199_v16 = vld [vmem:[%s9442_s2 + $0x278] sm:$0xff] }
  0x17   : > { %v4226_v7 = vld [vmem:[%s9441_s1 + $0x50] sm:$0xff]  ;;  %v5005_v10 = vpack.c.bf16 %v4190_v6, %v4188_v5  ;;  %v4192_v12 = vld [vmem:[%s9442_s2 + $0x240] sm:$0xff]  ;;  %v4201_v22 = vld [vmem:[%s9442_s2 + $0x288] sm:$0xff] }
  0x18   : > { %4974 = vmatpush1.bf16.msra.mxu1 %v6184_v14  ;;  %4958 = vmatpush1.bf16.msra.mxu0 %v6184_v14  ;;  %v4194_v13 = vld [vmem:[%s9442_s2 + $0x250] sm:$0xff]  ;;  %v4196_v19 = vld [vmem:[%s9442_s2 + $0x260] sm:$0xff]  ;;  %v4203_v23 = vld [vmem:[%s9442_s2 + $0x298] sm:$0xff] }
  0x19   : > { %4976 = vmatprep.subr.bf16.mxu1 %v6188_v15  ;;  %4960 = vmatprep.subr.bf16.mxu0 %v6188_v15  ;;  %v5009_v17 = vpack.c.bf16 %v4194_v13, %v4192_v12  ;;  %v5015_v25 = vpack.c.bf16 %v4203_v23, %v4201_v22  ;;  %v4205_v29 = vld [vmem:[%s9442_s2 + $0x2a8] sm:$0xff]  ;;  %v4215_v44 = vld [vmem:[%s9442_s2 + $0x2f8] sm:$0xff]  ;;  %v4212_v47 = vld [vmem:[%s9442_s2 + $0x2e0] sm:$0xff] }
  0x1a   : > { %v4213_v43 = vld [vmem:[%s9442_s2 + $0x2e8] sm:$0xff]  ;;  %v480_v54 = vld [vmem:[%s9442_s2 + $0x10] sm:$0xff]  ;;  %v482_v62 = vld [vmem:[%s9442_s2 + $0x20] sm:$0xff] }
  0x1b   : > { %v5027_v46 = vpack.c.bf16 %v4215_v44, %v4213_v43  ;;  %v479_v50 = vld [vmem:[%s9442_s2 + $0x8] sm:$0xff]  ;;  %v493_v13 = vld [vmem:[%s9442_s2 + $0x78] sm:$0xff] }
  0x1c   : > { %4978 = vmatpush1.bf16.msra.mxu1 %v6196_v20  ;;  %4962 = vmatpush1.bf16.msra.mxu0 %v6196_v20  ;;  %v483_v55 = vld [vmem:[%s9442_s2 + $0x28] sm:$0xff]  ;;  %v497_v23 = vld [vmem:[%s9442_s2 + $0x98] sm:$0xff] }
  0x1d   : > { %4980 = vmatprep.subr.bf16.mxu1 %v6200_v21  ;;  %4964 = vmatprep.subr.bf16.mxu0 %v6200_v21  ;;  %v491_v12 = vld [vmem:[%s9442_s2 + $0x68] sm:$0xff]  ;;  %v501_v33 = vld [vmem:[%s9442_s2 + $0xb8] sm:$0xff] }
  0x1e   : > { %v495_v22 = vld [vmem:[%s9442_s2 + $0x88] sm:$0xff] }
  0x20   : > { %4982 = vmatpush1.bf16.msra.mxu1 %v6212_v26  ;;  %4966 = vmatpush1.bf16.msra.mxu0 %v6212_v26 }
  0x21   : > { %5080 = vmatprep.subr.bf16.mxu1 %v6168_v4  ;;  %4984 = vmatprep.subr.bf16.mxu0 %v4983_v27  ;;  %v4202_v27 = vld [vmem:[%s9442_s2 + $0x290] sm:$0xff] }
  0x23   : > { %4164 = vmatmul.mubr.msk.f32.vlgmr.msra.gmra.mrb[0].mxu1 %vm376_vm0, %v4160_v30  ;;  %4156 = vmatmul.mubr.msk.f32.vlgmr.msra.gmra.mrb[0].mxu0 %vm376_vm0, %v372_v31  ;;  %v4207_v30 = vld [vmem:[%s9442_s2 + $0x2b8] sm:$0xff] }
  0x24   : > { %613 = vmatprep.mubr.f32.mxu1 %v6091_v0  ;;  %5082 = vmatpush1.bf16.msra.mxu1 %v6173_v8 }
  0x25   : > { %459 = vmatprep.mubr.f32.mxu0 %v6091_v0  ;;  %5084 = vmatprep.subr.bf16.mxu1 %v6175_v9 }
  0x26   : > { %4986 = vmatpush1.bf16.msra.mxu0 %v4985_v32  ;;  %v5019_v32 = vpack.c.bf16 %v4207_v30, %v4205_v29  ;;  %v496_v29 = vld [vmem:[%s9442_s2 + $0x90] sm:$0xff] }
  0x27   : > { %4165 = vmatmul.mubr.msk.f32.gmra.mrb[2].mxu1 %vm376_vm0, %v4161_v35  ;;  %4157 = vmatmul.mubr.msk.f32.gmra.mrb[2].mxu0 %vm376_vm0, %v373_v36  ;;  %v4286_v35 = vld [vmem:[%s9441_s1 + $0x70] sm:$0xff]  ;;  %v4209_v36 = vld [vmem:[%s9442_s2 + $0x2c8] sm:$0xff] }
  0x28   : > { %619 = vmatprep.mubr.f32.mxu1 %v6091_v0  ;;  %5086 = vmatpush1.bf16.msra.mxu1 %v6184_v14 }
  0x29   : > { %465 = vmatprep.mubr.f32.mxu0 %v6091_v0  ;;  %5088 = vmatprep.subr.bf16.mxu1 %v6188_v15 }
  0x2a   : > { %4988 = vmatprep.subr.bf16.mxu0 %v4987_v37  ;;  %v4211_v37 = vld [vmem:[%s9442_s2 + $0x2d8] sm:$0xff] }
  0x2b   : > { %4166 = vmatmul.mubr.msk.f32.gmra.mrb[4].mxu1 %vm376_vm0, %v4162_v40  ;;  %4158 = vmatmul.mubr.msk.f32.gmra.mrb[4].mxu0 %vm376_vm0, %v374_v41  ;;  %v5023_v39 = vpack.c.bf16 %v4211_v37, %v4209_v36  ;;  %v4208_v40 = vld [vmem:[%s9442_s2 + $0x2c0] sm:$0xff]  ;;  %v4210_v41 = vld [vmem:[%s9442_s2 + $0x2d0] sm:$0xff] }
  0x2c   : > { %625 = vmatprep.mubr.f32.mxu1 %v6091_v0  ;;  %5090 = vmatpush1.bf16.msra.mxu1 %v6196_v20  ;;  %v498_v37 = vld [vmem:[%s9442_s2 + $0xa0] sm:$0xff] }
  0x2d   : > { %471 = vmatprep.mubr.f32.mxu0 %v6091_v0  ;;  %5092 = vmatprep.subr.bf16.mxu1 %v6200_v21 }
  0x2e   : > { %4990 = vmatpush1.bf16.msra.mxu0 %v4989_v42  ;;  %v4287_v42 = vld [vmem:[%s9441_s1 + $0x78] sm:$0xff] }
  0x2f   : > { %4167 = vmatmul.mubr.msk.f32.gmra.mrb[6].mxu1 %vm376_vm0, %v4163_v45  ;;  %4159 = vmatmul.mubr.msk.f32.gmra.mrb[6].mxu0 %vm376_vm0, %v375_v48  ;;  %v5025_v45 = vpack.c.bf16 %v4210_v41, %v4208_v40  ;;  %v4214_v48 = vld [vmem:[%s9442_s2 + $0x2f0] sm:$0xff]  ;;  %v503_v40 = vld [vmem:[%s9442_s2 + $0xc8] sm:$0xff]  ;;  %v505_v41 = vld [vmem:[%s9442_s2 + $0xd8] sm:$0xff] }
  0x30   : > { %5094 = vmatpush1.bf16.msra.mxu1 %v6212_v26  ;;  %964 = vmatprep.mubr.f32.mxu1 %v6091_v0  ;;  %v5029_v49 = vpack.c.bf16 %v4214_v48, %v4212_v47  ;;  %v5055_v44 = vpack.c.bf16 %v505_v41, %v503_v40  ;;  %v507_v48 = vld [vmem:[%s9442_s2 + $0xe8] sm:$0xff]  ;;  %v4234_v40 = vld [vmem:[%s9442_s2 + $0x310] sm:$0xff] }
  0x31   : > { %5144 = vmatprep.subr.bf16.mxu1 %v6168_v4  ;;  %4992 = vmatprep.subr.bf16.mxu0 %v4991_v51  ;;  %v5003_v4 = vpack.c.bf16 %v4191_v2, %v4189_v1  ;;  %v481_v51 = vld [vmem:[%s9442_s2 + $0x18] sm:$0xff]  ;;  %v487_v2 = vld [vmem:[%s9442_s2 + $0x48] sm:$0xff] }
  0x32   : > { %4994 = vmatpush1.bf16.msra.mxu0 %v4993_v52  ;;  %v5031_v52 = vpack.c.bf16 %v481_v51, %v479_v50 }
  0x33   : > { %4228 = vmatmul.mubr.msk.f32.vlgmr.msra.gmra.mrb[8].mxu1 %vm376_vm0, %v4224_v56  ;;  %4996 = vmatprep.subr.bf16.mxu0 %v4995_v53  ;;  %v478_v53 = vld [vmem:[%s9442_s2] sm:$0xff]  ;;  %v485_v56 = vld [vmem:[%s9442_s2 + $0x38] sm:$0xff] }
  0x34   : > { %5146 = vmatpush1.bf16.msra.mxu1 %v6173_v8  ;;  %970 = vmatprep.mubr.f32.mxu1 %v6091_v0  ;;  %v4193_v8 = vld [vmem:[%s9442_s2 + $0x248] sm:$0xff]  ;;  %v5033_v58 = vpack.c.bf16 %v480_v54, %v478_v53  ;;  %v5035_v61 = vpack.c.bf16 %v485_v56, %v483_v55  ;;  %v506_v53 = vld [vmem:[%s9442_s2 + $0xe0] sm:$0xff]  ;;  %v508_v54 = vld [vmem:[%s9442_s2 + $0xf0] sm:$0xff] }
  0x35   : > { %5148 = vmatprep.subr.bf16.mxu1 %v6175_v9  ;;  %v4195_v9 = vld [vmem:[%s9442_s2 + $0x258] sm:$0xff]  ;;  %v511_v56 = vld [vmem:[%s9442_s2 + $0x108] sm:$0xff] }
  0x36   : > { %4998 = vmatpush1.bf16.msra.mxu0 %v4997_v59  ;;  %v5007_v11 = vpack.c.bf16 %v4195_v9, %v4193_v8  ;;  %v486_v8 = vld [vmem:[%s9442_s2 + $0x40] sm:$0xff]  ;;  %v488_v9 = vld [vmem:[%s9442_s2 + $0x50] sm:$0xff] }
  0x37   : > { %4229 = vmatmul.mubr.msk.f32.gmra.mrb[10].mxu1 %vm376_vm0, %v4225_v63  ;;  %5000 = vmatprep.subr.bf16.mxu0 %v4999_v60  ;;  %v484_v63 = vld [vmem:[%s9442_s2 + $0x30] sm:$0xff] }
  0x38   : > { %5150 = vmatpush1.bf16.msra.mxu1 %v6184_v14  ;;  %976 = vmatprep.mubr.f32.mxu1 %v6091_v0  ;;  %v4227_v14 = vld [vmem:[%s9441_s1 + $0x58] sm:$0xff] }
  0x39   : > { %5152 = vmatprep.subr.bf16.mxu1 %v6188_v15  ;;  %v4197_v15 = vld [vmem:[%s9442_s2 + $0x268] sm:$0xff] }
  0x3a   : > { %5002 = vmatpush1.bf16.msra.mxu0 %v5001_v3  ;;  %v5011_v18 = vpack.c.bf16 %v4199_v16, %v4197_v15  ;;  %v489_v3 = vld [vmem:[%s9442_s2 + $0x58] sm:$0xff] }
  0x3b   : > { %4230 = vmatmul.mubr.msk.f32.gmra.mrb[12].mxu1 %vm376_vm0, %v4226_v7  ;;  %5004 = vmatprep.subr.bf16.mxu0 %v5003_v4  ;;  %v5037_v4 = vpack.c.bf16 %v484_v63, %v482_v62  ;;  %v5039_v7 = vpack.c.bf16 %v489_v3, %v487_v2  ;;  %v510_v62 = vld [vmem:[%s9442_s2 + $0x100] sm:$0xff]  ;;  %v512_v63 = vld [vmem:[%s9442_s2 + $0x110] sm:$0xff]  ;;  %v515_v2 = vld [vmem:[%s9442_s2 + $0x128] sm:$0xff] }
  0x3c   : > { %5154 = vmatpush1.bf16.msra.mxu1 %v6196_v20  ;;  %982 = vmatprep.mubr.f32.mxu1 %v6091_v0  ;;  %v4198_v20 = vld [vmem:[%s9442_s2 + $0x270] sm:$0xff]  ;;  %v517_v3 = vld [vmem:[%s9442_s2 + $0x138] sm:$0xff] }
  0x3d   : > { %5156 = vmatprep.subr.bf16.mxu1 %v6200_v21  ;;  %v4284_v21 = vld [vmem:[%s9441_s1 + $0x60] sm:$0xff]  ;;  %v5013_v24 = vpack.c.bf16 %v4198_v20, %v4196_v19  ;;  %v492_v19 = vld [vmem:[%s9442_s2 + $0x70] sm:$0xff] }
  0x3e   : > { %5006 = vmatpush1.bf16.msra.mxu0 %v5005_v10 }
  0x3f   : > { %4231 = vmatmul.mubr.msk.f32.gmra.mrb[14].mxu1 %vm376_vm0, %v4227_v14  ;;  %5008 = vmatprep.subr.bf16.mxu0 %v5007_v11  ;;  %v5041_v14 = vpack.c.bf16 %v488_v9, %v486_v8  ;;  %v514_v8 = vld [vmem:[%s9442_s2 + $0x120] sm:$0xff]  ;;  %v516_v9 = vld [vmem:[%s9442_s2 + $0x130] sm:$0xff] }
  0x40   : > { %5158 = vmatpush1.bf16.msra.mxu1 %v6212_v26  ;;  %1228 = vmatprep.mubr.f32.mxu1 %v6091_v0  ;;  %v4200_v26 = vld [vmem:[%s9442_s2 + $0x280] sm:$0xff] }
  0x41   : > { %v5017_v31 = vpack.c.bf16 %v4202_v27, %v4200_v26  ;;  %v5047_v27 = vpack.c.bf16 %v497_v23, %v495_v22  ;;  %v523_v22 = vld [vmem:[%s9442_s2 + $0x168] sm:$0xff]  ;;  %v525_v23 = vld [vmem:[%s9442_s2 + $0x178] sm:$0xff] }
  0x42   : > { %5010 = vmatpush1.bf16.msra.mxu0 %v5009_v17  ;;  %v5043_v17 = vpack.c.bf16 %v493_v13, %v491_v12  ;;  %v519_v12 = vld [vmem:[%s9442_s2 + $0x148] sm:$0xff]  ;;  %v521_v13 = vld [vmem:[%s9442_s2 + $0x158] sm:$0xff] }
  0x43   : > { %4288 = vmatmul.mubr.msk.f32.vlgmr.msra.gmra.mrb[16].mxu1 %vm376_vm0, %v4284_v21  ;;  %5012 = vmatprep.subr.bf16.mxu0 %v5011_v18  ;;  %v490_v18 = vld [vmem:[%s9442_s2 + $0x60] sm:$0xff] }
  0x44   : > { %1234 = vmatprep.mubr.f32.mxu1 %v6091_v0 }
  0x46   : > { %5014 = vmatpush1.bf16.msra.mxu0 %v5013_v24  ;;  %v5045_v24 = vpack.c.bf16 %v492_v19, %v490_v18  ;;  %v518_v18 = vld [vmem:[%s9442_s2 + $0x140] sm:$0xff]  ;;  %v520_v19 = vld [vmem:[%s9442_s2 + $0x150] sm:$0xff] }
  0x47   : > { %4289 = vmatmul.mubr.msk.f32.gmra.mrb[18].mxu1 %vm376_vm0, %v4285_v28  ;;  %5016 = vmatprep.subr.bf16.mxu0 %v5015_v25  ;;  %v494_v28 = vld [vmem:[%s9442_s2 + $0x80] sm:$0xff] }
  0x48   : > { %1240 = vmatprep.mubr.f32.mxu1 %v6091_v0  ;;  %v5049_v34 = vpack.c.bf16 %v496_v29, %v494_v28  ;;  %v522_v28 = vld [vmem:[%s9442_s2 + $0x160] sm:$0xff]  ;;  %v524_v29 = vld [vmem:[%s9442_s2 + $0x170] sm:$0xff] }
  0x4a   : > { %5018 = vmatpush1.bf16.msra.mxu0 %v5017_v31 }
  0x4b   : > { %4290 = vmatmul.mubr.msk.f32.gmra.mrb[20].mxu1 %vm376_vm0, %v4286_v35  ;;  %5020 = vmatprep.subr.bf16.mxu0 %v5019_v32  ;;  %v499_v32 = vld [vmem:[%s9442_s2 + $0xa8] sm:$0xff] }
  0x4c   : > { %1246 = vmatprep.mubr.f32.mxu1 %v6091_v0  ;;  %v5051_v36 = vpack.c.bf16 %v501_v33, %v499_v32  ;;  %v4233_v32 = vld [vmem:[%s9442_s2 + $0x308] sm:$0xff]  ;;  %v4235_v33 = vld [vmem:[%s9442_s2 + $0x318] sm:$0xff] }
  0x4e   : > { %5022 = vmatpush1.bf16.msra.mxu0 %v5021_v38  ;;  %v500_v38 = vld [vmem:[%s9442_s2 + $0xb0] sm:$0xff] }
  0x4f   : > { %4291 = vmatmul.mubr.msk.f32.gmra.mrb[22].mxu1 %vm376_vm0, %v4287_v42  ;;  %5024 = vmatprep.subr.bf16.mxu0 %v5023_v39  ;;  %v5053_v42 = vpack.c.bf16 %v500_v38, %v498_v37  ;;  %v5095_v37 = vpack.c.bf16 %v4235_v33, %v4233_v32  ;;  %v4232_v38 = vld [vmem:[%s9442_s2 + $0x300] sm:$0xff]  ;;  %v4265_v32 = vld [vmem:[%s9442_s2 + $0x408] sm:$0xff]  ;;  %v4267_v33 = vld [vmem:[%s9442_s2 + $0x418] sm:$0xff] }
  0x50   : > { %1508 = vmatprep.mubr.f32.mxu1 %v6091_v0 }
  0x52   : > { %5026 = vmatpush1.bf16.msra.mxu0 %v5025_v45  ;;  %v502_v45 = vld [vmem:[%s9442_s2 + $0xc0] sm:$0xff] }
  0x53   : > { %5028 = vmatprep.subr.bf16.mxu0 %v5027_v46  ;;  %v504_v46 = vld [vmem:[%s9442_s2 + $0xd0] sm:$0xff] }
  0x54   : > { %v5057_v50 = vpack.c.bf16 %v504_v46, %v502_v45  ;;  %v5097_v45 = vpack.c.bf16 %v4234_v40, %v4232_v38  ;;  %v4264_v38 = vld [vmem:[%s9442_s2 + $0x400] sm:$0xff]  ;;  %v4266_v40 = vld [vmem:[%s9442_s2 + $0x410] sm:$0xff] }
  0x56   : > { %5030 = vmatpush1.bf16.msra.mxu0 %v5029_v49  ;;  %v509_v49 = vld [vmem:[%s9442_s2 + $0xf8] sm:$0xff] }
  0x57   : > { %5032 = vmatprep.subr.bf16.mxu0 %v5031_v52  ;;  %v5059_v52 = vpack.c.bf16 %v509_v49, %v507_v48  ;;  %v4236_v48 = vld [vmem:[%s9442_s2 + $0x320] sm:$0xff]  ;;  %v4238_v49 = vld [vmem:[%s9442_s2 + $0x330] sm:$0xff] }
  0xf6   : > { %v609_v57 = vpop.f32.mrb[0].mxu1  ;;  %v6470_v59 = vpop.f32.mrb[0].mxu0 }
  0xf7   : > { %v611_v60 = vpop.f32.mrb[1].mxu1  ;;  %v457_v1 = vpop.f32.mrb[1].mxu0 }
  0xf8   : > { %4216 = vmatprep.mubr.msk.f32.mxu0 %vm376_vm0, %v611_v60 }
  0xf9   : > { %758 = vmatmul.mubr.f32.vlgmr.msra.gmra.mrb[8].mxu0 %v609_v57  ;;  %v513_v57 = vld [vmem:[%s9442_s2 + $0x118] sm:$0xff] }
  0xfa   : > { %5034 = vmatpush1.bf16.msra.mxu0 %v5033_v58  ;;  %v615_v5 = vpop.f32.mrb[2].mxu1  ;;  %v6485_v6 = vpop.f32.mrb[2].mxu0  ;;  %v5061_v58 = vpack.c.bf16 %v508_v54, %v506_v53  ;;  %v5101_v53 = vpack.c.bf16 %v4238_v49, %v4236_v48  ;;  %v4268_v48 = vld [vmem:[%s9442_s2 + $0x420] sm:$0xff]  ;;  %v4270_v49 = vld [vmem:[%s9442_s2 + $0x430] sm:$0xff] }
  0xfb   : > { %5036 = vmatprep.subr.bf16.mxu0 %v5035_v61  ;;  %v617_v10 = vpop.f32.mrb[3].mxu1  ;;  %v6493_v11 = vpop.f32.mrb[3].mxu0  ;;  %v5063_v61 = vpack.c.bf16 %v513_v57, %v511_v56  ;;  %v4240_v56 = vld [vmem:[%s9442_s2 + $0x340] sm:$0xff]  ;;  %v4242_v57 = vld [vmem:[%s9442_s2 + $0x350] sm:$0xff] }
  0xfc   : > { %4217 = vmatprep.mubr.msk.f32.mxu0 %vm376_vm0, %v617_v10 }
  0xfd   : > { %764 = vmatmul.mubr.f32.gmra.mrb[10].mxu0 %v615_v5 }
  0xfe   : > { %5038 = vmatpush1.bf16.msra.mxu0 %v5037_v4  ;;  %v621_v15 = vpop.f32.mrb[4].mxu1  ;;  %v6502_v16 = vpop.f32.mrb[4].mxu0  ;;  %v5065_v4 = vpack.c.bf16 %v512_v63, %v510_v62  ;;  %v4244_v62 = vld [vmem:[%s9442_s2 + $0x360] sm:$0xff]  ;;  %v4246_v63 = vld [vmem:[%s9442_s2 + $0x370] sm:$0xff] }
  0xff   : > { %5040 = vmatprep.subr.bf16.mxu0 %v5039_v7  ;;  %v623_v20 = vpop.f32.mrb[5].mxu1  ;;  %v6510_v21 = vpop.f32.mrb[5].mxu0  ;;  %v5067_v7 = vpack.c.bf16 %v517_v3, %v515_v2  ;;  %v4249_v2 = vld [vmem:[%s9442_s2 + $0x388] sm:$0xff] }
 0x100   : > { %4218 = vmatprep.mubr.msk.f32.mxu0 %vm376_vm0, %v623_v20 }
 0x101   : > { %770 = vmatmul.mubr.f32.gmra.mrb[12].mxu0 %v621_v15 }
 0x102   : > { %5042 = vmatpush1.bf16.msra.mxu0 %v5041_v14  ;;  %v627_v25 = vpop.f32.mrb[6].mxu1  ;;  %v6519_v26 = vpop.f32.mrb[6].mxu0  ;;  %v5069_v14 = vpack.c.bf16 %v516_v9, %v514_v8  ;;  %v4253_v8 = vld [vmem:[%s9442_s2 + $0x3a8] sm:$0xff] }
 0x103   : > { %5044 = vmatprep.subr.bf16.mxu0 %v5043_v17  ;;  %v629_v30 = vpop.f32.mrb[7].mxu1  ;;  %v6527_v31 = vpop.f32.mrb[7].mxu0  ;;  %v5071_v17 = vpack.c.bf16 %v521_v13, %v519_v12  ;;  %v4252_v12 = vld [vmem:[%s9442_s2 + $0x3a0] sm:$0xff]  ;;  %v4254_v13 = vld [vmem:[%s9442_s2 + $0x3b0] sm:$0xff] }
 0x104   : > { %4219 = vmatprep.mubr.msk.f32.mxu0 %vm376_vm0, %v629_v30 }
 0x105   : > { %776 = vmatmul.mubr.f32.gmra.mrb[14].mxu0 %v627_v25 }
 0x106   : > { %5046 = vmatpush1.bf16.msra.mxu0 %v5045_v24  ;;  %4220 = vmatprep.mubr.msk.f32.mxu0 %vm376_vm0, %v457_v1  ;;  %v6537_v35 = vpop.f32.mrb[8].mxu1  ;;  %v5073_v24 = vpack.c.bf16 %v520_v19, %v518_v18  ;;  %v4256_v18 = vld [vmem:[%s9442_s2 + $0x3c0] sm:$0xff]  ;;  %v4258_v19 = vld [vmem:[%s9442_s2 + $0x3d0] sm:$0xff] }
 0x107   : > { %5048 = vmatprep.subr.bf16.mxu0 %v5047_v27  ;;  %v6545_v39 = vpop.f32.mrb[9].mxu1  ;;  %v5075_v27 = vpack.c.bf16 %v525_v23, %v523_v22  ;;  %v4261_v22 = vld [vmem:[%s9442_s2 + $0x3e8] sm:$0xff]  ;;  %v4263_v23 = vld [vmem:[%s9442_s2 + $0x3f8] sm:$0xff] }
 0x10a   : > { %5050 = vmatpush1.bf16.msra.mxu0 %v5049_v34  ;;  %v6553_v43 = vpop.f32.mrb[10].mxu1  ;;  %v5077_v34 = vpack.c.bf16 %v524_v29, %v522_v28  ;;  %v4260_v28 = vld [vmem:[%s9442_s2 + $0x3e0] sm:$0xff]  ;;  %v4262_v29 = vld [vmem:[%s9442_s2 + $0x3f0] sm:$0xff] }
 0x10b   : > { %5052 = vmatprep.subr.bf16.mxu0 %v5051_v36  ;;  %v6561_v47 = vpop.f32.mrb[11].mxu1 }
 0x10e   : > { %5054 = vmatpush1.bf16.msra.mxu0 %v5053_v42  ;;  %v6569_v51 = vpop.f32.mrb[12].mxu1  ;;  %v4237_v42 = vld [vmem:[%s9442_s2 + $0x328] sm:$0xff] }
 0x10f   : > { %5056 = vmatprep.subr.bf16.mxu0 %v5055_v44  ;;  %v6577_v55 = vpop.f32.mrb[13].mxu1  ;;  %v4239_v44 = vld [vmem:[%s9442_s2 + $0x338] sm:$0xff] }
 0x110   : > { %v5099_v46 = vpack.c.bf16 %v4239_v44, %v4237_v42  ;;  %v4269_v42 = vld [vmem:[%s9442_s2 + $0x428] sm:$0xff]  ;;  %v4271_v44 = vld [vmem:[%s9442_s2 + $0x438] sm:$0xff] }
 0x112   : > { %5058 = vmatpush1.bf16.msra.mxu0 %v5057_v50  ;;  %v6585_v60 = vpop.f32.mrb[14].mxu1  ;;  %v4241_v50 = vld [vmem:[%s9442_s2 + $0x348] sm:$0xff] }
 0x113   : > { %5060 = vmatprep.subr.bf16.mxu0 %v5059_v52  ;;  %v6593_v1 = vpop.f32.mrb[15].mxu1  ;;  %v4243_v52 = vld [vmem:[%s9442_s2 + $0x358] sm:$0xff] }
 0x114   : > { %v5103_v54 = vpack.c.bf16 %v4243_v52, %v4241_v50  ;;  %v4273_v50 = vld [vmem:[%s9442_s2 + $0x448] sm:$0xff]  ;;  %v4275_v52 = vld [vmem:[%s9442_s2 + $0x458] sm:$0xff] }
 0x116   : > { %5062 = vmatpush1.bf16.msra.mxu0 %v5061_v58  ;;  %v6601_v5 = vpop.f32.mrb[16].mxu1  ;;  %v4245_v58 = vld [vmem:[%s9442_s2 + $0x368] sm:$0xff] }
 0x117   : > { %5064 = vmatprep.subr.bf16.mxu0 %v5063_v61  ;;  %v6609_v10 = vpop.f32.mrb[17].mxu1 }
 0x11a   : > { %5066 = vmatpush1.bf16.msra.mxu0 %v5065_v4  ;;  %v6617_v15 = vpop.f32.mrb[18].mxu1  ;;  %v4248_v4 = vld [vmem:[%s9442_s2 + $0x380] sm:$0xff] }
 0x11b   : > { %5068 = vmatprep.subr.bf16.mxu0 %v5067_v7  ;;  %v6625_v20 = vpop.f32.mrb[19].mxu1  ;;  %v4250_v7 = vld [vmem:[%s9442_s2 + $0x390] sm:$0xff] }
 0x11e   : > { %5070 = vmatpush1.bf16.msra.mxu0 %v5069_v14  ;;  %v6633_v25 = vpop.f32.mrb[20].mxu1  ;;  %v4257_v14 = vld [vmem:[%s9442_s2 + $0x3c8] sm:$0xff] }
 0x11f   : > { %5072 = vmatprep.subr.bf16.mxu0 %v5071_v17  ;;  %v6641_v30 = vpop.f32.mrb[21].mxu1 }
 0x122   : > { %5074 = vmatpush1.bf16.msra.mxu0 %v5073_v24  ;;  %v6649_v36 = vpop.f32.mrb[22].mxu1  ;;  %v5121_v24 = vpack.c.bf16 %v4258_v19, %v4256_v18  ;;  %v4300_v18 = vld [vmem:[%s9442_s2 + $0x4c0] sm:$0xff]  ;;  %v4302_v19 = vld [vmem:[%s9442_s2 + $0x4d0] sm:$0xff] }
 0x123   : > { %5076 = vmatprep.subr.bf16.mxu0 %v5075_v27  ;;  %v6657_v41 = vpop.f32.mrb[23].mxu1  ;;  %v5123_v27 = vpack.c.bf16 %v4263_v23, %v4261_v22  ;;  %v4305_v22 = vld [vmem:[%s9442_s2 + $0x4e8] sm:$0xff] }
 0x126   : > { %5078 = vmatpush1.bf16.msra.mxu0 %v5077_v34  ;;  %v5125_v34 = vpack.c.bf16 %v4262_v29, %v4260_v28  ;;  %v4309_v28 = vld [vmem:[%s9442_s2 + $0x508] sm:$0xff] }
 0x127   : > { %5096 = vmatprep.subr.bf16.mxu0 %v5095_v37  ;;  %v5127_v37 = vpack.c.bf16 %v4267_v33, %v4265_v32  ;;  %v4308_v32 = vld [vmem:[%s9442_s2 + $0x500] sm:$0xff]  ;;  %v4310_v33 = vld [vmem:[%s9442_s2 + $0x510] sm:$0xff] }
 0x129   : > { %859 = vmatmul.mubr.f32.vlgmr.msra.gmra.mrb[8].mxu0 %v6470_v59  ;;  %v4247_v59 = vld [vmem:[%s9442_s2 + $0x378] sm:$0xff] }
 0x12a   : > { %5098 = vmatpush1.bf16.msra.mxu0 %v5097_v45  ;;  %4221 = vmatprep.mubr.msk.f32.mxu0 %vm376_vm0, %v6493_v11  ;;  %v5105_v11 = vpack.c.bf16 %v4242_v57, %v4240_v56  ;;  %v5107_v61 = vpack.c.bf16 %v4247_v59, %v4245_v58  ;;  %v5129_v45 = vpack.c.bf16 %v4266_v40, %v4264_v38  ;;  %v4272_v56 = vld [vmem:[%s9442_s2 + $0x440] sm:$0xff]  ;;  %v4274_v57 = vld [vmem:[%s9442_s2 + $0x450] sm:$0xff]  ;;  %v4277_v58 = vld [vmem:[%s9442_s2 + $0x468] sm:$0xff] }
 0x12b   : > { %5100 = vmatprep.subr.bf16.mxu0 %v5099_v46  ;;  %v5131_v46 = vpack.c.bf16 %v4271_v44, %v4269_v42  ;;  %v4279_v59 = vld [vmem:[%s9442_s2 + $0x478] sm:$0xff]  ;;  %v4312_v38 = vld [vmem:[%s9442_s2 + $0x520] sm:$0xff]  ;;  %v4314_v40 = vld [vmem:[%s9442_s2 + $0x530] sm:$0xff] }
 0x12c   : > { %v4317_v42 = vld [vmem:[%s9442_s2 + $0x548] sm:$0xff] }
 0x12d   : > { %865 = vmatmul.mubr.f32.gmra.mrb[10].mxu0 %v6485_v6  ;;  %v4251_v6 = vld [vmem:[%s9442_s2 + $0x398] sm:$0xff] }
 0x12e   : > { %5102 = vmatpush1.bf16.msra.mxu0 %v5101_v53  ;;  %4222 = vmatprep.mubr.msk.f32.mxu0 %vm376_vm0, %v6510_v21  ;;  %v5109_v21 = vpack.c.bf16 %v4246_v63, %v4244_v62  ;;  %v5111_v3 = vpack.c.bf16 %v4251_v6, %v4249_v2  ;;  %v5133_v53 = vpack.c.bf16 %v4270_v49, %v4268_v48  ;;  %v4276_v62 = vld [vmem:[%s9442_s2 + $0x460] sm:$0xff]  ;;  %v4278_v63 = vld [vmem:[%s9442_s2 + $0x470] sm:$0xff]  ;;  %v4293_v2 = vld [vmem:[%s9442_s2 + $0x488] sm:$0xff] }
 0x12f   : > { %5104 = vmatprep.subr.bf16.mxu0 %v5103_v54  ;;  %v5135_v54 = vpack.c.bf16 %v4275_v52, %v4273_v50  ;;  %v4295_v6 = vld [vmem:[%s9442_s2 + $0x498] sm:$0xff]  ;;  %v4321_v48 = vld [vmem:[%s9442_s2 + $0x568] sm:$0xff] }
 0x130   : > { %v4323_v49 = vld [vmem:[%s9442_s2 + $0x578] sm:$0xff] }
 0x131   : > { %871 = vmatmul.mubr.f32.gmra.mrb[12].mxu0 %v6502_v16  ;;  %v4255_v16 = vld [vmem:[%s9442_s2 + $0x3b8] sm:$0xff]  ;;  %v5187_v52 = vpack.c.bf16 %v4323_v49, %v4321_v48  ;;  %v4371_v48 = vld [vmem:[%s9444_s4 + $0x2a8] sm:$0xff] }
 0x132   : > { %5106 = vmatpush1.bf16.msra.mxu0 %v5105_v11  ;;  %4223 = vmatprep.mubr.msk.f32.mxu0 %vm376_vm0, %v6527_v31  ;;  %v5113_v31 = vpack.c.bf16 %v4250_v7, %v4248_v4  ;;  %v5115_v9 = vpack.c.bf16 %v4255_v16, %v4253_v8  ;;  %v5137_v11 = vpack.c.bf16 %v4274_v57, %v4272_v56  ;;  %v4292_v4 = vld [vmem:[%s9442_s2 + $0x480] sm:$0xff]  ;;  %v4294_v7 = vld [vmem:[%s9442_s2 + $0x490] sm:$0xff]  ;;  %v4297_v8 = vld [vmem:[%s9442_s2 + $0x4a8] sm:$0xff] }
 0x133   : > { %5108 = vmatprep.subr.bf16.mxu0 %v5107_v61  ;;  %v5139_v61 = vpack.c.bf16 %v4279_v59, %v4277_v58  ;;  %v4299_v16 = vld [vmem:[%s9442_s2 + $0x4b8] sm:$0xff]  ;;  %v4325_v56 = vld [vmem:[%s9442_s2 + $0x588] sm:$0xff] }
 0x134   : > { %v4327_v57 = vld [vmem:[%s9442_s2 + $0x598] sm:$0xff] }
 0x135   : > { %877 = vmatmul.mubr.f32.gmra.mrb[14].mxu0 %v6519_v26  ;;  %v4259_v26 = vld [vmem:[%s9442_s2 + $0x3d8] sm:$0xff]  ;;  %v5191_v59 = vpack.c.bf16 %v4327_v57, %v4325_v56  ;;  %v4374_v57 = vld [vmem:[%s9444_s4 + $0x2c0] sm:$0xff] }
 0x136   : > { %5110 = vmatpush1.bf16.msra.mxu0 %v5109_v21  ;;  %4280 = vmatprep.mubr.msk.f32.mxu0 %vm376_vm0, %v6545_v39  ;;  %v5117_v39 = vpack.c.bf16 %v4254_v13, %v4252_v12  ;;  %v5119_v17 = vpack.c.bf16 %v4259_v26, %v4257_v14  ;;  %v5141_v21 = vpack.c.bf16 %v4278_v63, %v4276_v62  ;;  %v4296_v12 = vld [vmem:[%s9442_s2 + $0x4a0] sm:$0xff]  ;;  %v4298_v13 = vld [vmem:[%s9442_s2 + $0x4b0] sm:$0xff]  ;;  %v4301_v14 = vld [vmem:[%s9442_s2 + $0x4c8] sm:$0xff] }
 0x137   : > { %5112 = vmatprep.subr.bf16.mxu0 %v5111_v3  ;;  %v5159_v3 = vpack.c.bf16 %v4295_v6, %v4293_v2  ;;  %v4303_v26 = vld [vmem:[%s9442_s2 + $0x4d8] sm:$0xff]  ;;  %v4329_v62 = vld [vmem:[%s9442_s2 + $0x5a8] sm:$0xff] }
 0x138   : > { %v4331_v63 = vld [vmem:[%s9442_s2 + $0x5b8] sm:$0xff] }
 0x139   : > { %v5195_v6 = vpack.c.bf16 %v4331_v63, %v4329_v62  ;;  %v4378_v63 = vld [vmem:[%s9444_s4 + $0x2e0] sm:$0xff] }
 0x13a   : > { %5114 = vmatpush1.bf16.msra.mxu0 %v5113_v31  ;;  %v5161_v31 = vpack.c.bf16 %v4294_v7, %v4292_v4  ;;  %v4333_v4 = vld [vmem:[%s9442_s2 + $0x5c8] sm:$0xff]  ;;  %v4335_v7 = vld [vmem:[%s9442_s2 + $0x5d8] sm:$0xff] }
 0x13b   : > { %5116 = vmatprep.subr.bf16.mxu0 %v5115_v9  ;;  %v5163_v9 = vpack.c.bf16 %v4299_v16, %v4297_v8  ;;  %v5199_v16 = vpack.c.bf16 %v4335_v7, %v4333_v4  ;;  %v4382_v7 = vld [vmem:[%s9444_s4 + $0x300] sm:$0xff] }
 0x13e   : > { %5118 = vmatpush1.bf16.msra.mxu0 %v5117_v39  ;;  %v5165_v39 = vpack.c.bf16 %v4298_v13, %v4296_v12  ;;  %v4337_v12 = vld [vmem:[%s9442_s2 + $0x5e8] sm:$0xff]  ;;  %v4339_v13 = vld [vmem:[%s9442_s2 + $0x5f8] sm:$0xff] }
 0x13f   : > { %5120 = vmatprep.subr.bf16.mxu0 %v5119_v17  ;;  %v5167_v17 = vpack.c.bf16 %v4303_v26, %v4301_v14  ;;  %v5203_v26 = vpack.c.bf16 %v4339_v13, %v4337_v12  ;;  %v4386_v13 = vld [vmem:[%s9444_s4 + $0x320] sm:$0xff] }
 0x142   : > { %5122 = vmatpush1.bf16.msra.mxu0 %v5121_v24  ;;  %v4304_v24 = vld [vmem:[%s9442_s2 + $0x4e0] sm:$0xff] }
 0x143   : > { %5124 = vmatprep.subr.bf16.mxu0 %v5123_v27  ;;  %v4306_v27 = vld [vmem:[%s9442_s2 + $0x4f0] sm:$0xff] }
 0x146   : > { %5126 = vmatpush1.bf16.msra.mxu0 %v5125_v34  ;;  %v4313_v34 = vld [vmem:[%s9442_s2 + $0x528] sm:$0xff] }
 0x147   : > { %5128 = vmatprep.subr.bf16.mxu0 %v5127_v37 }
 0x14a   : > { %5130 = vmatpush1.bf16.msra.mxu0 %v5129_v45  ;;  %v4316_v45 = vld [vmem:[%s9442_s2 + $0x540] sm:$0xff] }
 0x14b   : > { %5132 = vmatprep.subr.bf16.mxu0 %v5131_v46  ;;  %v4318_v46 = vld [vmem:[%s9442_s2 + $0x550] sm:$0xff] }
 0x14c   : > { %v5185_v50 = vpack.c.bf16 %v4318_v46, %v4316_v45  ;;  %v4366_v45 = vld [vmem:[%s9444_s4 + $0x280] sm:$0xff]  ;;  %v4368_v46 = vld [vmem:[%s9444_s4 + $0x290] sm:$0xff] }
 0x14e   : > { %5134 = vmatpush1.bf16.msra.mxu0 %v5133_v53  ;;  %v4320_v53 = vld [vmem:[%s9442_s2 + $0x560] sm:$0xff] }
 0x14f   : > { %5136 = vmatprep.subr.bf16.mxu0 %v5135_v54  ;;  %v4322_v54 = vld [vmem:[%s9442_s2 + $0x570] sm:$0xff] }
 0x150   : > { %v5189_v58 = vpack.c.bf16 %v4322_v54, %v4320_v53  ;;  %v4375_v53 = vld [vmem:[%s9444_s4 + $0x2c8] sm:$0xff] }
 0x152   : > { %5138 = vmatpush1.bf16.msra.mxu0 %v5137_v11  ;;  %v4324_v11 = vld [vmem:[%s9442_s2 + $0x580] sm:$0xff] }
 0x153   : > { %5140 = vmatprep.subr.bf16.mxu0 %v5139_v61  ;;  %v4326_v61 = vld [vmem:[%s9442_s2 + $0x590] sm:$0xff] }
 0x154   : > { %v5193_v2 = vpack.c.bf16 %v4326_v61, %v4324_v11  ;;  %v4381_v11 = vld [vmem:[%s9444_s4 + $0x2f8] sm:$0xff] }
 0x156   : > { %5142 = vmatpush1.bf16.msra.mxu0 %v5141_v21  ;;  %v4328_v21 = vld [vmem:[%s9442_s2 + $0x5a0] sm:$0xff] }
 0x157   : > { %5160 = vmatprep.subr.bf16.mxu0 %v5159_v3  ;;  %v4330_v3 = vld [vmem:[%s9442_s2 + $0x5b0] sm:$0xff] }
 0x158   : > { %v5197_v8 = vpack.c.bf16 %v4330_v3, %v4328_v21  ;;  %v4385_v21 = vld [vmem:[%s9444_s4 + $0x318] sm:$0xff] }
 0x159   : > { %1115 = vmatmul.mubr.f32.vlgmr.msra.gmra.mrb[8].mxu0 %v6537_v35  ;;  %v4307_v35 = vld [vmem:[%s9442_s2 + $0x4f8] sm:$0xff] }
 0x15a   : > { %5162 = vmatpush1.bf16.msra.mxu0 %v5161_v31  ;;  %4281 = vmatprep.mubr.msk.f32.mxu0 %vm376_vm0, %v6561_v47  ;;  %v5169_v47 = vpack.c.bf16 %v4302_v19, %v4300_v18  ;;  %v5171_v23 = vpack.c.bf16 %v4307_v35, %v4305_v22  ;;  %v4332_v31 = vld [vmem:[%s9442_s2 + $0x5c0] sm:$0xff]  ;;  %v4351_v18 = vld [vmem:[%s9444_s4 + $0x208] sm:$0xff]  ;;  %v4353_v19 = vld [vmem:[%s9444_s4 + $0x218] sm:$0xff] }
 0x15b   : > { %5164 = vmatprep.subr.bf16.mxu0 %v5163_v9  ;;  %v4334_v9 = vld [vmem:[%s9442_s2 + $0x5d0] sm:$0xff]  ;;  %v5223_v35 = vpack.c.bf16 %v4353_v19, %v4351_v18  ;;  %v4390_v19 = vld [vmem:[%s9444_s4 + $0x340] sm:$0xff] }
 0x15c   : > { %v5201_v14 = vpack.c.bf16 %v4334_v9, %v4332_v31  ;;  %v4389_v31 = vld [vmem:[%s9444_s4 + $0x338] sm:$0xff] }
 0x15d   : > { %1121 = vmatmul.mubr.f32.gmra.mrb[10].mxu0 %v6553_v43  ;;  %v4311_v43 = vld [vmem:[%s9442_s2 + $0x518] sm:$0xff] }
 0x15e   : > { %5166 = vmatpush1.bf16.msra.mxu0 %v5165_v39  ;;  %4282 = vmatprep.mubr.msk.f32.mxu0 %vm376_vm0, %v6577_v55  ;;  %v5173_v55 = vpack.c.bf16 %v4306_v27, %v4304_v24  ;;  %v5175_v29 = vpack.c.bf16 %v4311_v43, %v4309_v28  ;;  %v4336_v39 = vld [vmem:[%s9442_s2 + $0x5e0] sm:$0xff]  ;;  %v4355_v24 = vld [vmem:[%s9444_s4 + $0x228] sm:$0xff]  ;;  %v4357_v27 = vld [vmem:[%s9444_s4 + $0x238] sm:$0xff] }
 0x15f   : > { %5168 = vmatprep.subr.bf16.mxu0 %v5167_v17  ;;  %v4338_v17 = vld [vmem:[%s9442_s2 + $0x5f0] sm:$0xff]  ;;  %v5227_v43 = vpack.c.bf16 %v4357_v27, %v4355_v24  ;;  %v4394_v27 = vld [vmem:[%s9444_s4 + $0x360] sm:$0xff] }
 0x160   : > { %v5205_v22 = vpack.c.bf16 %v4338_v17, %v4336_v39  ;;  %v4393_v39 = vld [vmem:[%s9444_s4 + $0x358] sm:$0xff] }
 0x161   : > { %1127 = vmatmul.mubr.f32.gmra.mrb[12].mxu0 %v6569_v51  ;;  %v4315_v51 = vld [vmem:[%s9442_s2 + $0x538] sm:$0xff] }
 0x162   : > { %5170 = vmatpush1.bf16.msra.mxu0 %v5169_v47  ;;  %4283 = vmatprep.mubr.msk.f32.mxu0 %vm376_vm0, %v6593_v1  ;;  %v5177_v1 = vpack.c.bf16 %v4310_v33, %v4308_v32  ;;  %v5179_v37 = vpack.c.bf16 %v4315_v51, %v4313_v34  ;;  %v4350_v47 = vld [vmem:[%s9444_s4 + $0x200] sm:$0xff]  ;;  %v4359_v32 = vld [vmem:[%s9444_s4 + $0x248] sm:$0xff]  ;;  %v4361_v33 = vld [vmem:[%s9444_s4 + $0x258] sm:$0xff] }
 0x163   : > { %5172 = vmatprep.subr.bf16.mxu0 %v5171_v23  ;;  %v4352_v23 = vld [vmem:[%s9444_s4 + $0x210] sm:$0xff]  ;;  %v5231_v51 = vpack.c.bf16 %v4361_v33, %v4359_v32  ;;  %v4398_v33 = vld [vmem:[%s9444_s4 + $0x380] sm:$0xff] }
 0x164   : > { %v5225_v28 = vpack.c.bf16 %v4352_v23, %v4350_v47  ;;  %v4397_v47 = vld [vmem:[%s9444_s4 + $0x378] sm:$0xff] }
 0x165   : > { %1133 = vmatmul.mubr.f32.gmra.mrb[14].mxu0 %v6585_v60  ;;  %v4319_v60 = vld [vmem:[%s9442_s2 + $0x558] sm:$0xff] }
 0x166   : > { %5174 = vmatpush1.bf16.msra.mxu0 %v5173_v55  ;;  %4340 = vmatprep.mubr.msk.f32.mxu0 %vm376_vm0, %v6609_v10  ;;  %v5181_v10 = vpack.c.bf16 %v4314_v40, %v4312_v38  ;;  %v5183_v44 = vpack.c.bf16 %v4319_v60, %v4317_v42  ;;  %v4354_v55 = vld [vmem:[%s9444_s4 + $0x220] sm:$0xff]  ;;  %v4363_v38 = vld [vmem:[%s9444_s4 + $0x268] sm:$0xff]  ;;  %v4364_v60 = vld [vmem:[%s9444_s4 + $0x270] sm:$0xff] }
 0x167   : > { %5176 = vmatprep.subr.bf16.mxu0 %v5175_v29  ;;  %v4356_v29 = vld [vmem:[%s9444_s4 + $0x230] sm:$0xff]  ;;  %v4362_v42 = vld [vmem:[%s9444_s4 + $0x260] sm:$0xff] }
 0x168   : > { %v5229_v34 = vpack.c.bf16 %v4356_v29, %v4354_v55  ;;  %v4401_v55 = vld [vmem:[%s9444_s4 + $0x398] sm:$0xff] }
 0x16a   : > { %5178 = vmatpush1.bf16.msra.mxu0 %v5177_v1  ;;  %v4358_v1 = vld [vmem:[%s9444_s4 + $0x240] sm:$0xff] }
 0x16b   : > { %5180 = vmatprep.subr.bf16.mxu0 %v5179_v37  ;;  %v4360_v37 = vld [vmem:[%s9444_s4 + $0x250] sm:$0xff] }
 0x16e   : > { %5182 = vmatpush1.bf16.msra.mxu0 %v5181_v10  ;;  %v4367_v10 = vld [vmem:[%s9444_s4 + $0x288] sm:$0xff] }
 0x16f   : > { %5184 = vmatprep.subr.bf16.mxu0 %v5183_v44 }
 0x172   : > { %5186 = vmatpush1.bf16.msra.mxu0 %v5185_v50  ;;  %v4370_v50 = vld [vmem:[%s9444_s4 + $0x2a0] sm:$0xff] }
 0x173   : > { %5188 = vmatprep.subr.bf16.mxu0 %v5187_v52  ;;  %v4372_v52 = vld [vmem:[%s9444_s4 + $0x2b0] sm:$0xff] }
 0x174   : > { %v5245_v54 = vpack.c.bf16 %v4372_v52, %v4370_v50 }
 0x176   : > { %5190 = vmatpush1.bf16.msra.mxu0 %v5189_v58  ;;  %v4376_v58 = vld [vmem:[%s9444_s4 + $0x2d0] sm:$0xff] }
 0x177   : > { %5192 = vmatprep.subr.bf16.mxu0 %v5191_v59  ;;  %v4379_v59 = vld [vmem:[%s9444_s4 + $0x2e8] sm:$0xff]  ;;  %v5249_v61 = vpack.c.bf16 %v4376_v58, %v4374_v57 }
 0x178   : > { %v5251_v62 = vpack.c.bf16 %v4381_v11, %v4379_v59 }
 0x17a   : > { %5194 = vmatpush1.bf16.msra.mxu0 %v5193_v2  ;;  %v4380_v2 = vld [vmem:[%s9444_s4 + $0x2f0] sm:$0xff] }
 0x17b   : > { %5196 = vmatprep.subr.bf16.mxu0 %v5195_v6  ;;  %v4383_v6 = vld [vmem:[%s9444_s4 + $0x308] sm:$0xff]  ;;  %v5253_v3 = vpack.c.bf16 %v4380_v2, %v4378_v63 }
 0x17c   : > { %v5255_v4 = vpack.c.bf16 %v4385_v21, %v4383_v6 }
 0x17e   : > { %5198 = vmatpush1.bf16.msra.mxu0 %v5197_v8  ;;  %v4384_v8 = vld [vmem:[%s9444_s4 + $0x310] sm:$0xff] }
 0x17f   : > { %5200 = vmatprep.subr.bf16.mxu0 %v5199_v16  ;;  %v4387_v16 = vld [vmem:[%s9444_s4 + $0x328] sm:$0xff]  ;;  %v5257_v9 = vpack.c.bf16 %v4384_v8, %v4382_v7 }
 0x180   : > { %v5259_v12 = vpack.c.bf16 %v4389_v31, %v4387_v16 }
 0x182   : > { %5202 = vmatpush1.bf16.msra.mxu0 %v5201_v14  ;;  %v4388_v14 = vld [vmem:[%s9444_s4 + $0x330] sm:$0xff] }
 0x183   : > { %5204 = vmatprep.subr.bf16.mxu0 %v5203_v26  ;;  %v4391_v26 = vld [vmem:[%s9444_s4 + $0x348] sm:$0xff]  ;;  %v5261_v17 = vpack.c.bf16 %v4388_v14, %v4386_v13 }
 0x184   : > { %v5263_v18 = vpack.c.bf16 %v4393_v39, %v4391_v26 }
 0x186   : > { %5206 = vmatpush1.bf16.msra.mxu0 %v5205_v22  ;;  %v4392_v22 = vld [vmem:[%s9444_s4 + $0x350] sm:$0xff] }
 0x187   : > { %5224 = vmatprep.subr.bf16.mxu0 %v5223_v35  ;;  %v4395_v35 = vld [vmem:[%s9444_s4 + $0x368] sm:$0xff]  ;;  %v5265_v23 = vpack.c.bf16 %v4392_v22, %v4390_v19  ;;  %v1524_v19 = vld [vmem:[%s9444_s4 + $0x18] sm:$0xff] }
 0x188   : > { %v5267_v24 = vpack.c.bf16 %v4397_v47, %v4395_v35  ;;  %v1436_v22 = vld [vmem:[%s9443_s3 + $0x8] sm:$0xff]  ;;  %v1521_v47 = vld [vmem:[%s9444_s4] sm:$0xff] }
 0x189   : > { %1379 = vmatmul.mubr.f32.vlgmr.msra.gmra.mrb[8].mxu0 %v6601_v5  ;;  %v4365_v5 = vld [vmem:[%s9444_s4 + $0x278] sm:$0xff] }
 0x18a   : > { %4341 = vmatprep.mubr.msk.f32.mxu0 %vm376_vm0, %v6625_v20  ;;  %5226 = vmatpush1.bf16.msra.mxu0 %v5225_v28  ;;  %v5233_v20 = vpack.c.bf16 %v4360_v37, %v4358_v1  ;;  %v5235_v40 = vpack.c.bf16 %v4365_v5, %v4363_v38  ;;  %v4396_v28 = vld [vmem:[%s9444_s4 + $0x370] sm:$0xff]  ;;  %v4403_v1 = vld [vmem:[%s9444_s4 + $0x3a8] sm:$0xff]  ;;  %v4405_v37 = vld [vmem:[%s9444_s4 + $0x3b8] sm:$0xff] }
 0x18b   : > { %5228 = vmatprep.subr.bf16.mxu0 %v5227_v43  ;;  %v4399_v43 = vld [vmem:[%s9444_s4 + $0x388] sm:$0xff]  ;;  %v5269_v29 = vpack.c.bf16 %v4396_v28, %v4394_v27  ;;  %v5275_v38 = vpack.c.bf16 %v4405_v37, %v4403_v1  ;;  %v4402_v5 = vld [vmem:[%s9444_s4 + $0x3a0] sm:$0xff]  ;;  %v1528_v27 = vld [vmem:[%s9444_s4 + $0x38] sm:$0xff] }
 0x18c   : > { %v5271_v32 = vpack.c.bf16 %v4401_v55, %v4399_v43  ;;  %v4346_v28 = vld [vmem:[%s9443_s3 + $0x10] sm:$0xff]  ;;  %v4347_v1 = vld [vmem:[%s9443_s3 + $0x18] sm:$0xff] }
 0x18d   : > { %1385 = vmatmul.mubr.f32.gmra.mrb[10].mxu0 %v6617_v15  ;;  %v4369_v15 = vld [vmem:[%s9444_s4 + $0x298] sm:$0xff] }
 0x18e   : > { %4342 = vmatprep.mubr.msk.f32.mxu0 %vm376_vm0, %v6641_v30  ;;  %5230 = vmatpush1.bf16.msra.mxu0 %v5229_v34  ;;  %v5237_v30 = vpack.c.bf16 %v4364_v60, %v4362_v42  ;;  %v5239_v44 = vpack.c.bf16 %v4369_v15, %v4367_v10  ;;  %v4400_v34 = vld [vmem:[%s9444_s4 + $0x390] sm:$0xff]  ;;  %v4407_v42 = vld [vmem:[%s9444_s4 + $0x3c8] sm:$0xff]  ;;  %v4409_v60 = vld [vmem:[%s9444_s4 + $0x3d8] sm:$0xff] }
 0x18f   : > { %5232 = vmatprep.subr.bf16.mxu0 %v5231_v51  ;;  %v5273_v51 = vpack.c.bf16 %v4400_v34, %v4398_v33  ;;  %v5279_v10 = vpack.c.bf16 %v4409_v60, %v4407_v42  ;;  %v4406_v15 = vld [vmem:[%s9444_s4 + $0x3c0] sm:$0xff]  ;;  %v1530_v33 = vld [vmem:[%s9444_s4 + $0x48] sm:$0xff]  ;;  %v1532_v34 = vld [vmem:[%s9444_s4 + $0x58] sm:$0xff] }
 0x190   : > { %v5295_v37 = vpack.c.bf16 %v1532_v34, %v1530_v33  ;;  %v1565_v33 = vld [vmem:[%s9444_s4 + $0x160] sm:$0xff]  ;;  %v1567_v34 = vld [vmem:[%s9444_s4 + $0x170] sm:$0xff] }
 0x191   : > { %1391 = vmatmul.mubr.f32.gmra.mrb[12].mxu0 %v6633_v25  ;;  %v4373_v25 = vld [vmem:[%s9444_s4 + $0x2b8] sm:$0xff] }
 0x192   : > { %4343 = vmatprep.mubr.msk.f32.mxu0 %vm376_vm0, %v6657_v41  ;;  %5234 = vmatpush1.bf16.msra.mxu0 %v5233_v20  ;;  %v5241_v41 = vpack.c.bf16 %v4368_v46, %v4366_v45  ;;  %v5243_v49 = vpack.c.bf16 %v4373_v25, %v4371_v48  ;;  %v4404_v20 = vld [vmem:[%s9444_s4 + $0x3b0] sm:$0xff]  ;;  %v4411_v45 = vld [vmem:[%s9444_s4 + $0x3e8] sm:$0xff]  ;;  %v4413_v46 = vld [vmem:[%s9444_s4 + $0x3f8] sm:$0xff] }
 0x193   : > { %5236 = vmatprep.subr.bf16.mxu0 %v5235_v40  ;;  %v5277_v40 = vpack.c.bf16 %v4404_v20, %v4402_v5  ;;  %v5283_v48 = vpack.c.bf16 %v4413_v46, %v4411_v45  ;;  %v4410_v25 = vld [vmem:[%s9444_s4 + $0x3e0] sm:$0xff]  ;;  %v1531_v5 = vld [vmem:[%s9444_s4 + $0x50] sm:$0xff]  ;;  %v1534_v20 = vld [vmem:[%s9444_s4 + $0x68] sm:$0xff] }
 0x195   : > { %1397 = vmatmul.mubr.f32.gmra.mrb[14].mxu0 %v6649_v36  ;;  %v4377_v36 = vld [vmem:[%s9444_s4 + $0x2d8] sm:$0xff] }
 0x196   : > { %5238 = vmatpush1.bf16.msra.mxu0 %v5237_v30  ;;  %v5247_v56 = vpack.c.bf16 %v4377_v36, %v4375_v53  ;;  %v4408_v30 = vld [vmem:[%s9444_s4 + $0x3d0] sm:$0xff] }
 0x197   : > { %5240 = vmatprep.subr.bf16.mxu0 %v5239_v44  ;;  %v5281_v44 = vpack.c.bf16 %v4408_v30, %v4406_v15  ;;  %v1535_v15 = vld [vmem:[%s9444_s4 + $0x70] sm:$0xff]  ;;  %v1538_v30 = vld [vmem:[%s9444_s4 + $0x88] sm:$0xff] }
 0x19a   : > { %5242 = vmatpush1.bf16.msra.mxu0 %v5241_v41  ;;  %v4412_v41 = vld [vmem:[%s9444_s4 + $0x3f0] sm:$0xff] }
 0x19b   : > { %5244 = vmatprep.subr.bf16.mxu0 %v5243_v49  ;;  %v5285_v49 = vpack.c.bf16 %v4412_v41, %v4410_v25  ;;  %v1539_v25 = vld [vmem:[%s9444_s4 + $0x90] sm:$0xff]  ;;  %v1542_v41 = vld [vmem:[%s9444_s4 + $0xa8] sm:$0xff] }
 0x19e   : > { %5246 = vmatpush1.bf16.msra.mxu0 %v5245_v54 }
 0x19f   : > { %5248 = vmatprep.subr.bf16.mxu0 %v5247_v56 }
 0x1a2   : > { %5250 = vmatpush1.bf16.msra.mxu0 %v5249_v61 }
 0x1a3   : > { %5252 = vmatprep.subr.bf16.mxu0 %v5251_v62 }
 0x1a6   : > { %5254 = vmatpush1.bf16.msra.mxu0 %v5253_v3 }
 0x1a7   : > { %5256 = vmatprep.subr.bf16.mxu0 %v5255_v4 }
 0x1aa   : > { %5258 = vmatpush1.bf16.msra.mxu0 %v5257_v9 }
 0x1ab   : > { %5260 = vmatprep.subr.bf16.mxu0 %v5259_v12 }
 0x1ae   : > { %5262 = vmatpush1.bf16.msra.mxu0 %v5261_v17  ;;  %v1435_v17 = vld [vmem:[%s9443_s3] sm:$0xff] }
 0x1af   : > { %5264 = vmatprep.subr.bf16.mxu0 %v5263_v18  ;;  %v1522_v18 = vld [vmem:[%s9444_s4 + $0x8] sm:$0xff] }
 0x1b0   : > { %v5287_v35 = vpack.c.bf16 %v1524_v19, %v1522_v18  ;;  %v1557_v19 = vld [vmem:[%s9444_s4 + $0x120] sm:$0xff] }
 0x1b2   : > { %5266 = vmatpush1.bf16.msra.mxu0 %v5265_v23  ;;  %v1523_v23 = vld [vmem:[%s9444_s4 + $0x10] sm:$0xff] }
 0x1b3   : > { %5268 = vmatprep.subr.bf16.mxu0 %v5267_v24  ;;  %v1526_v24 = vld [vmem:[%s9444_s4 + $0x28] sm:$0xff]  ;;  %v5289_v43 = vpack.c.bf16 %v1523_v23, %v1521_v47  ;;  %v1564_v47 = vld [vmem:[%s9444_s4 + $0x158] sm:$0xff] }
 0x1b4   : > { %v5291_v55 = vpack.c.bf16 %v1528_v27, %v1526_v24  ;;  %v1561_v27 = vld [vmem:[%s9444_s4 + $0x140] sm:$0xff] }
 0x1b6   : > { %5270 = vmatpush1.bf16.msra.mxu0 %v5269_v29  ;;  %v1525_v29 = vld [vmem:[%s9444_s4 + $0x20] sm:$0xff] }
 0x1b7   : > { %5272 = vmatprep.subr.bf16.mxu0 %v5271_v32  ;;  %v1527_v32 = vld [vmem:[%s9444_s4 + $0x30] sm:$0xff] }
 0x1ba   : > { %5274 = vmatpush1.bf16.msra.mxu0 %v5273_v51  ;;  %v5293_v51 = vpack.c.bf16 %v1527_v32, %v1525_v29 }
 0x1bb   : > { %5276 = vmatprep.subr.bf16.mxu0 %v5275_v38  ;;  %v1529_v38 = vld [vmem:[%s9444_s4 + $0x40] sm:$0xff] }
 0x1bc   : > { %v5297_v42 = vpack.c.bf16 %v1531_v5, %v1529_v38  ;;  %v1569_v5 = vld [vmem:[%s9444_s4 + $0x180] sm:$0xff] }
 0x1be   : > { %5278 = vmatpush1.bf16.msra.mxu0 %v5277_v40  ;;  %v1536_v40 = vld [vmem:[%s9444_s4 + $0x78] sm:$0xff] }
 0x1bf   : > { %5280 = vmatprep.subr.bf16.mxu0 %v5279_v10  ;;  %v5299_v60 = vpack.c.bf16 %v1536_v40, %v1534_v20  ;;  %v1533_v10 = vld [vmem:[%s9444_s4 + $0x60] sm:$0xff]  ;;  %v1571_v20 = vld [vmem:[%s9444_s4 + $0x190] sm:$0xff]  ;;  %v1574_v40 = vld [vmem:[%s9444_s4 + $0x1a8] sm:$0xff] }
 0x1c0   : > { %v5301_v45 = vpack.c.bf16 %v1535_v15, %v1533_v10  ;;  %v1573_v15 = vld [vmem:[%s9444_s4 + $0x1a0] sm:$0xff] }
 0x1c2   : > { %5282 = vmatpush1.bf16.msra.mxu0 %v5281_v44  ;;  %v1540_v44 = vld [vmem:[%s9444_s4 + $0x98] sm:$0xff] }
 0x1c3   : > { %5284 = vmatprep.subr.bf16.mxu0 %v5283_v48  ;;  %v5303_v46 = vpack.c.bf16 %v1540_v44, %v1538_v30  ;;  %v1537_v48 = vld [vmem:[%s9444_s4 + $0x80] sm:$0xff]  ;;  %v1575_v30 = vld [vmem:[%s9444_s4 + $0x1b0] sm:$0xff]  ;;  %v1578_v44 = vld [vmem:[%s9444_s4 + $0x1c8] sm:$0xff] }
 0x1c6   : > { %5286 = vmatpush1.bf16.msra.mxu0 %v5285_v49  ;;  %v1544_v49 = vld [vmem:[%s9444_s4 + $0xb8] sm:$0xff] }
 0x25c   : > { %v1380_v50 = vpop.f32.mrb[8].mxu0 }
 0x25d   : > { %v1382_v52 = vpop.f32.mrb[9].mxu0  ;;  %v1419_v53 = vmul.f32 0.2, %v1380_v50  ;;  %vm1411_vm1 = vcmp.ge.f32.partialorder %v1380_v50, 0.0 }
 0x25e   : > { %v1420_v36 = vmul.f32 0.2, %v1382_v52  ;;  %vm1412_vm2 = vcmp.ge.f32.partialorder %v1382_v52, 0.0 }
 0x25f   : > { %v1427_v59 = vsel %vm1411_vm1, %v1380_v50, %v1419_v53  ;;  %v5305_v50 = vpack.c.bf16 %v1539_v25, %v1537_v48  ;;  %v1541_v53 = vld [vmem:[%s9444_s4 + $0xa0] sm:$0xff]  ;;  %vm3224_vm1 = vcmask 64512  }
 0x260   : > { %v1386_v54 = vpop.f32.mrb[10].mxu0  ;;  %v1428_v61 = vsel %vm1412_vm2, %v1382_v52, %v1420_v36  ;;  %v5307_v52 = vpack.c.bf16 %v1544_v49, %v1542_v41  ;;  %v1543_v36 = vld [vmem:[%s9444_s4 + $0xb0] sm:$0xff]  ;;  %v1577_v25 = vld [vmem:[%s9444_s4 + $0x1c0] sm:$0xff]  ;;  %v1582_v49 = vld [vmem:[%s9444_s4 + $0x1e8] sm:$0xff] }
 0x261   : > { %vm1413_vm3 = vcmp.ge.f32.partialorder %v1386_v54, 0.0  ;;  %v1421_v56 = vmul.f32 0.2, %v1386_v54  ;;  %v1388_v57 = vpop.f32.mrb[11].mxu0  ;;  %v1579_v41 = vld [vmem:[%s9444_s4 + $0x1d0] sm:$0xff] }
 0x262   : > { %vm1414_vm4 = vcmp.ge.f32.partialorder %v1388_v57, 0.0  ;;  %v1422_v58 = vmul.f32 0.2, %v1388_v57 }
 0x263   : > { %v1429_v11 = vsel %vm1413_vm3, %v1386_v54, %v1421_v56  ;;  %v1546_v54 = vld [vmem:[%s9444_s4 + $0xc8] sm:$0xff]  ;;  %v1548_v56 = vld [vmem:[%s9444_s4 + $0xd8] sm:$0xff] }
 0x264   : > { %v7161_v62 = vpack.c.bf16 %v1429_v11, %v1427_v59  ;;  %v1430_v63 = vsel %vm1414_vm4, %v1388_v57, %v1422_v58  ;;  %v1392_v2 = vpop.f32.mrb[12].mxu0  ;;  %v5309_v57 = vpack.c.bf16 %v1543_v36, %v1541_v53  ;;  %v5311_v58 = vpack.c.bf16 %v1548_v56, %v1546_v54  ;;  %v1545_v59 = vld [vmem:[%s9444_s4 + $0xc0] sm:$0xff]  ;;  %v1547_v11 = vld [vmem:[%s9444_s4 + $0xd0] sm:$0xff] }
 0x265   : > { %v7163_v6 = vpack.c.bf16 %v1430_v63, %v1428_v61  ;;  %v1394_v21 = vpop.f32.mrb[13].mxu0  ;;  %v1423_v3 = vmul.f32 0.2, %v1392_v2  ;;  %vm1415_vm5 = vcmp.ge.f32.partialorder %v1392_v2, 0.0  ;;  %v1550_v61 = vld [vmem:[%s9444_s4 + $0xe8] sm:$0xff]  ;;  %v1552_v63 = vld [vmem:[%s9444_s4 + $0xf8] sm:$0xff] }
 0x266   : > { %v1424_v4 = vmul.f32 0.2, %v1394_v21  ;;  %vm1416_vm6 = vcmp.ge.f32.partialorder %v1394_v21, 0.0  ;;  %v1581_v36 = vld [vmem:[%s9444_s4 + $0x1e0] sm:$0xff]  ;;  %v1583_v54 = vld [vmem:[%s9444_s4 + $0x1f0] sm:$0xff]  ;;  %vm4086_vm4 = vcmask 1043456  }
 0x267   : > { %5208 = vmatprep.subr.bf16.mxu1 %v7163_v6  ;;  %5424 = vmatprep.subr.bf16.mxu0 %v7163_v6  ;;  %v1431_v9 = vsel %vm1415_vm5, %v1392_v2, %v1423_v3  ;;  %v5313_v2 = vpack.c.bf16 %v1547_v11, %v1545_v59  ;;  %v1549_v3 = vld [vmem:[%s9444_s4 + $0xe0] sm:$0xff]  ;;  %v5349_v56 = vpack.c.bf16 %v1583_v54, %v1581_v36  ;;  %v4419_v59 = vld [vmem:[%s9444_s4 + $0x408] sm:$0xff]  ;;  %v4421_v11 = vld [vmem:[%s9444_s4 + $0x418] sm:$0xff]  ;;  %vm4100_vm5 = vcmask 0  }
 0x268   : > { %v1398_v7 = vpop.f32.mrb[14].mxu0  ;;  %5210 = vmatpush1.bf16.msra.mxu1 %v7161_v62  ;;  %v1432_v13 = vsel %vm1416_vm6, %v1394_v21, %v1424_v4  ;;  %v5315_v21 = vpack.c.bf16 %v1552_v63, %v1550_v61  ;;  %v1551_v4 = vld [vmem:[%s9444_s4 + $0xf0] sm:$0xff]  ;;  %v4453_v36 = vld [vmem:[%s9444_s4 + $0x518] sm:$0xff] }
 0x269   : > { %vm1417_vm7 = vcmp.ge.f32.partialorder %v1398_v7, 0.0  ;;  %v1425_v8 = vmul.f32 0.2, %v1398_v7  ;;  %v1400_v16 = vpop.f32.mrb[15].mxu0 }
 0x26a   : > { %vm1418_vm8 = vcmp.ge.f32.partialorder %v1400_v16, 0.0  ;;  %v1426_v31 = vmul.f32 0.2, %v1400_v16 }
 0x26b   : > { %v1433_v12 = vsel %vm1417_vm7, %v1398_v7, %v1425_v8  ;;  %v1554_v7 = vld [vmem:[%s9444_s4 + $0x108] sm:$0xff]  ;;  %v1556_v8 = vld [vmem:[%s9444_s4 + $0x118] sm:$0xff] }
 0x26c   : > { %v7168_v14 = vpack.c.bf16 %v1433_v12, %v1431_v9  ;;  %v1434_v26 = vsel %vm1418_vm8, %v1400_v16, %v1426_v31  ;;  %v5317_v16 = vpack.c.bf16 %v1551_v4, %v1549_v3  ;;  %v5319_v31 = vpack.c.bf16 %v1556_v8, %v1554_v7  ;;  %v1553_v9 = vld [vmem:[%s9444_s4 + $0x100] sm:$0xff]  ;;  %v1555_v12 = vld [vmem:[%s9444_s4 + $0x110] sm:$0xff]  ;;  %v4423_v3 = vld [vmem:[%s9444_s4 + $0x428] sm:$0xff] }
 0x26d   : > { %v7170_v39 = vpack.c.bf16 %v1434_v26, %v1432_v13  ;;  %v1558_v13 = vld [vmem:[%s9444_s4 + $0x128] sm:$0xff]  ;;  %v1560_v26 = vld [vmem:[%s9444_s4 + $0x138] sm:$0xff]  ;;  %v4414_v8 = vld [vmem:[%s9443_s3 + $0x20] sm:$0xff] }
 0x26e   : > { %v5323_v18 = vpack.c.bf16 %v1560_v26, %v1558_v13  ;;  %v4425_v4 = vld [vmem:[%s9444_s4 + $0x438] sm:$0xff]  ;;  %v4424_v13 = vld [vmem:[%s9444_s4 + $0x430] sm:$0xff]  ;;  %v4427_v26 = vld [vmem:[%s9444_s4 + $0x448] sm:$0xff] }
 0x26f   : > { %5212 = vmatprep.subr.bf16.mxu1 %v7170_v39 }
 0x270   : > { %5214 = vmatpush1.bf16.msra.mxu1 %v7168_v14 }
 0x271   : > { %5216 = vmatprep.subr.bf16.mxu1 %v7163_v6 }
 0x273   : > { %4344 = vmatmul.mubr.msk.f32.vlgmr.msra.gmra.mrb[24].mxu1 %vm1437_vm9, %v1435_v17  ;;  %v5321_v17 = vpack.c.bf16 %v1555_v12, %v1553_v9  ;;  %v5363_v9 = vpack.c.bf16 %v4425_v4, %v4423_v3  ;;  %v4422_v12 = vld [vmem:[%s9444_s4 + $0x420] sm:$0xff]  ;;  %v4461_v3 = vld [vmem:[%s9444_s4 + $0x558] sm:$0xff] }
 0x274   : > { %5218 = vmatpush1.bf16.msra.mxu1 %v7161_v62  ;;  %1514 = vmatprep.mubr.f32.mxu1 %v6091_v0 }
 0x275   : > { %5220 = vmatprep.subr.bf16.mxu1 %v7170_v39 }
 0x277   : > { %4345 = vmatmul.mubr.msk.f32.gmra.mrb[26].mxu1 %vm1437_vm9, %v1436_v22  ;;  %v1559_v22 = vld [vmem:[%s9444_s4 + $0x130] sm:$0xff] }
 0x278   : > { %5222 = vmatpush1.bf16.msra.mxu1 %v7168_v14  ;;  %1658 = vmatprep.mubr.f32.mxu1 %v6091_v0  ;;  %v5325_v23 = vpack.c.bf16 %v1559_v22, %v1557_v19  ;;  %v4415_v19 = vld [vmem:[%s9443_s3 + $0x28] sm:$0xff] }
 0x279   : > { %5288 = vmatprep.subr.bf16.mxu1 %v5287_v35  ;;  %v1562_v35 = vld [vmem:[%s9444_s4 + $0x148] sm:$0xff] }
 0x27a   : > { %v5327_v24 = vpack.c.bf16 %v1564_v47, %v1562_v35  ;;  %v5365_v35 = vpack.c.bf16 %v4424_v13, %v4422_v12 }
 0x27b   : > { %4348 = vmatmul.mubr.msk.f32.vlgmr.msra.gmra.mrb[28].mxu1 %vm1437_vm9, %v4346_v28  ;;  %v1563_v28 = vld [vmem:[%s9444_s4 + $0x150] sm:$0xff] }
 0x27c   : > { %5290 = vmatpush1.bf16.msra.mxu1 %v5289_v43  ;;  %1664 = vmatprep.mubr.f32.mxu1 %v6091_v0  ;;  %v1566_v43 = vld [vmem:[%s9444_s4 + $0x168] sm:$0xff]  ;;  %v5329_v29 = vpack.c.bf16 %v1563_v28, %v1561_v27  ;;  %v4482_v27 = vld [vmem:[%s9443_s3 + $0x30] sm:$0xff] }
 0x27d   : > { %5292 = vmatprep.subr.bf16.mxu1 %v5291_v55  ;;  %v1568_v55 = vld [vmem:[%s9444_s4 + $0x178] sm:$0xff] }
 0x27e   : > { %v5331_v32 = vpack.c.bf16 %v1568_v55, %v1566_v43  ;;  %v4430_v55 = vld [vmem:[%s9444_s4 + $0x460] sm:$0xff] }
 0x27f   : > { %4349 = vmatmul.mubr.msk.f32.gmra.mrb[30].mxu1 %vm1437_vm9, %v4347_v1  ;;  %v1572_v1 = vld [vmem:[%s9444_s4 + $0x198] sm:$0xff] }
 0x280   : > { %5294 = vmatpush1.bf16.msra.mxu1 %v5293_v51  ;;  %v1570_v51 = vld [vmem:[%s9444_s4 + $0x188] sm:$0xff] }
 0x281   : > { %5296 = vmatprep.subr.bf16.mxu1 %v5295_v37  ;;  %v5333_v37 = vpack.c.bf16 %v1567_v34, %v1565_v33  ;;  %v5335_v38 = vpack.c.bf16 %v1572_v1, %v1570_v51  ;;  %v4483_v33 = vld [vmem:[%s9443_s3 + $0x38] sm:$0xff]  ;;  %v4434_v1 = vld [vmem:[%s9444_s4 + $0x480] sm:$0xff] }
 0x284   : > { %5298 = vmatpush1.bf16.msra.mxu1 %v5297_v42  ;;  %v1576_v42 = vld [vmem:[%s9444_s4 + $0x1b8] sm:$0xff] }
 0x285   : > { %5300 = vmatprep.subr.bf16.mxu1 %v5299_v60  ;;  %v5337_v60 = vpack.c.bf16 %v1571_v20, %v1569_v5  ;;  %v5339_v10 = vpack.c.bf16 %v1576_v42, %v1574_v40  ;;  %v4441_v5 = vld [vmem:[%s9444_s4 + $0x4b8] sm:$0xff]  ;;  %v4438_v42 = vld [vmem:[%s9444_s4 + $0x4a0] sm:$0xff] }
 0x288   : > { %5302 = vmatpush1.bf16.msra.mxu1 %v5301_v45  ;;  %v1580_v45 = vld [vmem:[%s9444_s4 + $0x1d8] sm:$0xff] }
 0x289   : > { %5304 = vmatprep.subr.bf16.mxu1 %v5303_v46  ;;  %v5341_v46 = vpack.c.bf16 %v1575_v30, %v1573_v15  ;;  %v5343_v48 = vpack.c.bf16 %v1580_v45, %v1578_v44  ;;  %v4445_v15 = vld [vmem:[%s9444_s4 + $0x4d8] sm:$0xff]  ;;  %v4442_v45 = vld [vmem:[%s9444_s4 + $0x4c0] sm:$0xff] }
 0x28c   : > { %5306 = vmatpush1.bf16.msra.mxu1 %v5305_v50  ;;  %v1584_v50 = vld [vmem:[%s9444_s4 + $0x1f8] sm:$0xff] }
 0x28d   : > { %5308 = vmatprep.subr.bf16.mxu1 %v5307_v52  ;;  %v5345_v52 = vpack.c.bf16 %v1579_v41, %v1577_v25  ;;  %v5347_v53 = vpack.c.bf16 %v1584_v50, %v1582_v49  ;;  %v4449_v25 = vld [vmem:[%s9444_s4 + $0x4f8] sm:$0xff]  ;;  %v4446_v50 = vld [vmem:[%s9444_s4 + $0x4e0] sm:$0xff] }
 0x290   : > { %5310 = vmatpush1.bf16.msra.mxu1 %v5309_v57 }
 0x291   : > { %5312 = vmatprep.subr.bf16.mxu1 %v5311_v58 }
 0x294   : > { %5314 = vmatpush1.bf16.msra.mxu1 %v5313_v2  ;;  %v5359_v2 = vpack.c.bf16 %v4421_v11, %v4419_v59  ;;  %v4455_v59 = vld [vmem:[%s9444_s4 + $0x528] sm:$0xff]  ;;  %v4457_v11 = vld [vmem:[%s9444_s4 + $0x538] sm:$0xff] }
 0x295   : > { %5316 = vmatprep.subr.bf16.mxu1 %v5315_v21  ;;  %v4420_v21 = vld [vmem:[%s9444_s4 + $0x410] sm:$0xff] }
 0x298   : > { %5318 = vmatpush1.bf16.msra.mxu1 %v5317_v16 }
 0x299   : > { %5320 = vmatprep.subr.bf16.mxu1 %v5319_v31 }
 0x29c   : > { %5322 = vmatpush1.bf16.msra.mxu1 %v5321_v17  ;;  %v4429_v17 = vld [vmem:[%s9444_s4 + $0x458] sm:$0xff] }
 0x29d   : > { %5324 = vmatprep.subr.bf16.mxu1 %v5323_v18  ;;  %v5367_v47 = vpack.c.bf16 %v4429_v17, %v4427_v26  ;;  %v4462_v26 = vld [vmem:[%s9444_s4 + $0x560] sm:$0xff]  ;;  %v4464_v17 = vld [vmem:[%s9444_s4 + $0x570] sm:$0xff] }
 0x2a0   : > { %5326 = vmatpush1.bf16.msra.mxu1 %v5325_v23  ;;  %v4426_v23 = vld [vmem:[%s9444_s4 + $0x440] sm:$0xff] }
 0x2a1   : > { %5328 = vmatprep.subr.bf16.mxu1 %v5327_v24  ;;  %v4433_v24 = vld [vmem:[%s9444_s4 + $0x478] sm:$0xff] }
 0x2a4   : > { %5330 = vmatpush1.bf16.msra.mxu1 %v5329_v29  ;;  %v4432_v29 = vld [vmem:[%s9444_s4 + $0x470] sm:$0xff] }
 0x2a5   : > { %5332 = vmatprep.subr.bf16.mxu1 %v5331_v32  ;;  %v4437_v32 = vld [vmem:[%s9444_s4 + $0x498] sm:$0xff]  ;;  %v5373_v34 = vpack.c.bf16 %v4432_v29, %v4430_v55  ;;  %v4475_v55 = vld [vmem:[%s9444_s4 + $0x5c8] sm:$0xff] }
 0x2a6   : > { %v4477_v29 = vld [vmem:[%s9444_s4 + $0x5d8] sm:$0xff] }
 0x2a8   : > { %5334 = vmatpush1.bf16.msra.mxu1 %v5333_v37  ;;  %v4436_v37 = vld [vmem:[%s9444_s4 + $0x490] sm:$0xff] }
 0x2a9   : > { %5336 = vmatprep.subr.bf16.mxu1 %v5335_v38  ;;  %v4439_v38 = vld [vmem:[%s9444_s4 + $0x4a8] sm:$0xff]  ;;  %v5377_v20 = vpack.c.bf16 %v4436_v37, %v4434_v1  ;;  %v4481_v1 = vld [vmem:[%s9444_s4 + $0x5f8] sm:$0xff] }
 0x2aa   : > { %v5379_v40 = vpack.c.bf16 %v4441_v5, %v4439_v38  ;;  %v4478_v5 = vld [vmem:[%s9444_s4 + $0x5e0] sm:$0xff] }
 0x2ac   : > { %5338 = vmatpush1.bf16.msra.mxu1 %v5337_v60  ;;  %v4440_v60 = vld [vmem:[%s9444_s4 + $0x4b0] sm:$0xff] }
 0x2ad   : > { %5340 = vmatprep.subr.bf16.mxu1 %v5339_v10  ;;  %v4443_v10 = vld [vmem:[%s9444_s4 + $0x4c8] sm:$0xff]  ;;  %v5381_v30 = vpack.c.bf16 %v4440_v60, %v4438_v42  ;;  %v4489_v60 = vld [vmem:[%s9444_s4 + $0x618] sm:$0xff] }
 0x2ae   : > { %v5383_v44 = vpack.c.bf16 %v4445_v15, %v4443_v10  ;;  %v4487_v42 = vld [vmem:[%s9444_s4 + $0x608] sm:$0xff]  ;;  %v4486_v15 = vld [vmem:[%s9444_s4 + $0x600] sm:$0xff] }
 0x2af   : > { %v5431_v10 = vpack.c.bf16 %v4489_v60, %v4487_v42  ;;  %v4518_v42 = vld [vmem:[%s9444_s4 + $0x700] sm:$0xff]  ;;  %v4520_v60 = vld [vmem:[%s9444_s4 + $0x710] sm:$0xff] }
 0x2b0   : > { %5342 = vmatpush1.bf16.msra.mxu1 %v5341_v46  ;;  %v4444_v46 = vld [vmem:[%s9444_s4 + $0x4d0] sm:$0xff] }
 0x2b1   : > { %5344 = vmatprep.subr.bf16.mxu1 %v5343_v48  ;;  %v4447_v48 = vld [vmem:[%s9444_s4 + $0x4e8] sm:$0xff]  ;;  %v5385_v41 = vpack.c.bf16 %v4444_v46, %v4442_v45  ;;  %v4493_v45 = vld [vmem:[%s9444_s4 + $0x638] sm:$0xff] }
 0x2b2   : > { %v5387_v49 = vpack.c.bf16 %v4449_v25, %v4447_v48 }
 0x2b4   : > { %5346 = vmatpush1.bf16.msra.mxu1 %v5345_v52  ;;  %v4448_v52 = vld [vmem:[%s9444_s4 + $0x4f0] sm:$0xff] }
 0x2b5   : > { %5348 = vmatprep.subr.bf16.mxu1 %v5347_v53  ;;  %v4451_v53 = vld [vmem:[%s9444_s4 + $0x508] sm:$0xff]  ;;  %v5389_v54 = vpack.c.bf16 %v4448_v52, %v4446_v50  ;;  %v4490_v50 = vld [vmem:[%s9444_s4 + $0x620] sm:$0xff]  ;;  %v4492_v52 = vld [vmem:[%s9444_s4 + $0x630] sm:$0xff] }
 0x2b8   : > { %5350 = vmatpush1.bf16.msra.mxu1 %v5349_v56  ;;  %v5391_v56 = vpack.c.bf16 %v4453_v36, %v4451_v53  ;;  %v4495_v36 = vld [vmem:[%s9444_s4 + $0x648] sm:$0xff] }
 0x2b9   : > { %5352 = vmatprep.subr.bf16.mxu1 %v7163_v6  ;;  %v4418_v6 = vld [vmem:[%s9444_s4 + $0x400] sm:$0xff] }
 0x2ba   : > { %v5361_v31 = vpack.c.bf16 %v4420_v21, %v4418_v6  ;;  %v4456_v6 = vld [vmem:[%s9444_s4 + $0x530] sm:$0xff]  ;;  %v4459_v21 = vld [vmem:[%s9444_s4 + $0x548] sm:$0xff] }
 0x346   : > { %v1510_v57 = vpop.f32.mrb[24].mxu1 }
 0x347   : > { %v1512_v58 = vpop.f32.mrb[25].mxu1 }
 0x348   : > { %1877 = vmatprep.mubr.f32.mxu1 %v1512_v58  ;;  %v4452_v58 = vld [vmem:[%s9444_s4 + $0x510] sm:$0xff] }
 0x349   : > { %1878 = vmatmul.mubr.f32.vlgmr.msra.gmra.mrb[32].mxu1 %v1510_v57  ;;  %v4450_v57 = vld [vmem:[%s9444_s4 + $0x500] sm:$0xff] }
 0x34a   : > { %5354 = vmatpush1.bf16.msra.mxu1 %v7161_v62  ;;  %v1516_v61 = vpop.f32.mrb[26].mxu1 }
 0x34b   : > { %5356 = vmatprep.subr.bf16.mxu1 %v7170_v39  ;;  %v1518_v63 = vpop.f32.mrb[27].mxu1 }
 0x34c   : > { %1883 = vmatprep.mubr.f32.mxu1 %v1518_v63  ;;  %v5395_v63 = vpack.c.bf16 %v4457_v11, %v4455_v59  ;;  %v4494_v11 = vld [vmem:[%s9444_s4 + $0x640] sm:$0xff] }
 0x34d   : > { %1884 = vmatmul.mubr.f32.gmra.mrb[34].mxu1 %v1516_v61  ;;  %v5393_v61 = vpack.c.bf16 %v4452_v58, %v4450_v57 }
 0x34e   : > { %5358 = vmatpush1.bf16.msra.mxu1 %v7168_v14  ;;  %v1660_v7 = vpop.f32.mrb[28].mxu1  ;;  %1963 = vmatprep.mubr.f32.mxu1 %v6091_v0 }
 0x34f   : > { %v1662_v16 = vpop.f32.mrb[29].mxu1  ;;  %5360 = vmatprep.subr.bf16.mxu1 %v5359_v2  ;;  %v4454_v2 = vld [vmem:[%s9444_s4 + $0x520] sm:$0xff] }
 0x350   : > { %1800 = vmatprep.mubr.f32.mxu0 %v1662_v16  ;;  %v5397_v4 = vpack.c.bf16 %v4456_v6, %v4454_v2  ;;  %v4460_v16 = vld [vmem:[%s9444_s4 + $0x550] sm:$0xff]  ;;  %v4499_v6 = vld [vmem:[%s9444_s4 + $0x668] sm:$0xff] }
 0x351   : > { %1801 = vmatmul.mubr.f32.vlgmr.msra.gmra.mrb[16].mxu0 %v1660_v7  ;;  %4416 = vmatmul.mubr.msk.f32.vlgmr.msra.gmra.mrb[36].mxu1 %vm1437_vm9, %v4414_v8  ;;  %v5399_v7 = vpack.c.bf16 %v4461_v3, %v4459_v21  ;;  %v4458_v8 = vld [vmem:[%s9444_s4 + $0x540] sm:$0xff]  ;;  %v4501_v21 = vld [vmem:[%s9444_s4 + $0x678] sm:$0xff] }
 0x352   : > { %5426 = vmatpush1.bf16.msra.mxu0 %v7161_v62  ;;  %v1666_v18 = vpop.f32.mrb[30].mxu1  ;;  %1969 = vmatprep.mubr.f32.mxu1 %v6091_v0  ;;  %v4428_v62 = vld [vmem:[%s9444_s4 + $0x450] sm:$0xff]  ;;  %v5401_v12 = vpack.c.bf16 %v4460_v16, %v4458_v8  ;;  %v4498_v8 = vld [vmem:[%s9444_s4 + $0x660] sm:$0xff] }
 0x353   : > { %5428 = vmatprep.subr.bf16.mxu0 %v7170_v39  ;;  %v1668_v22 = vpop.f32.mrb[31].mxu1  ;;  %5362 = vmatpush1.bf16.msra.mxu1 %v5361_v31  ;;  %v4431_v39 = vld [vmem:[%s9444_s4 + $0x468] sm:$0xff]  ;;  %v5369_v28 = vpack.c.bf16 %v4428_v62, %v4426_v23  ;;  %v4468_v23 = vld [vmem:[%s9444_s4 + $0x590] sm:$0xff] }
 0x354   : > { %1806 = vmatprep.mubr.f32.mxu0 %v1668_v22  ;;  %5364 = vmatprep.subr.bf16.mxu1 %v5363_v9  ;;  %v5371_v43 = vpack.c.bf16 %v4433_v24, %v4431_v39  ;;  %v4463_v31 = vld [vmem:[%s9444_s4 + $0x568] sm:$0xff]  ;;  %v4465_v9 = vld [vmem:[%s9444_s4 + $0x578] sm:$0xff]  ;;  %v5405_v22 = vpack.c.bf16 %v4464_v17, %v4462_v26  ;;  %v4500_v16 = vld [vmem:[%s9444_s4 + $0x670] sm:$0xff] }
 0x355   : > { %1807 = vmatmul.mubr.f32.gmra.mrb[18].mxu0 %v1666_v18  ;;  %4417 = vmatmul.mubr.msk.f32.gmra.mrb[38].mxu1 %vm1437_vm9, %v4415_v19  ;;  %v5403_v13 = vpack.c.bf16 %v4465_v9, %v4463_v31  ;;  %v4467_v18 = vld [vmem:[%s9444_s4 + $0x588] sm:$0xff]  ;;  %v4469_v19 = vld [vmem:[%s9444_s4 + $0x598] sm:$0xff] }
 0x356   : > { %5430 = vmatpush1.bf16.msra.mxu0 %v7168_v14  ;;  %2195 = vmatprep.mubr.f32.mxu0 %v6091_v0  ;;  %v4435_v14 = vld [vmem:[%s9444_s4 + $0x488] sm:$0xff]  ;;  %v4473_v39 = vld [vmem:[%s9444_s4 + $0x5b8] sm:$0xff] }
 0x357   : > { %5366 = vmatpush1.bf16.msra.mxu1 %v5365_v35  ;;  %v5375_v51 = vpack.c.bf16 %v4437_v32, %v4435_v14  ;;  %v5407_v35 = vpack.c.bf16 %v4469_v19, %v4467_v18  ;;  %v4471_v62 = vld [vmem:[%s9444_s4 + $0x5a8] sm:$0xff]  ;;  %v5415_v32 = vpack.c.bf16 %v4477_v29, %v4475_v55  ;;  %v4502_v18 = vld [vmem:[%s9444_s4 + $0x680] sm:$0xff]  ;;  %v4504_v19 = vld [vmem:[%s9444_s4 + $0x690] sm:$0xff] }
 0x358   : > { %5368 = vmatprep.subr.bf16.mxu1 %v5367_v47  ;;  %v4466_v47 = vld [vmem:[%s9444_s4 + $0x580] sm:$0xff]  ;;  %v4503_v9 = vld [vmem:[%s9444_s4 + $0x688] sm:$0xff] }
 0x359   : > { %4484 = vmatmul.mubr.msk.f32.vlgmr.msra.gmra.mrb[20].mxu0 %vm1437_vm9, %v4482_v27  ;;  %v5409_v24 = vpack.c.bf16 %v4468_v23, %v4466_v47  ;;  %v5411_v27 = vpack.c.bf16 %v4473_v39, %v4471_v62  ;;  %v4509_v47 = vld [vmem:[%s9444_s4 + $0x6b8] sm:$0xff]  ;;  %v5449_v23 = vpack.c.bf16 %v4504_v19, %v4502_v18  ;;  %v4506_v39 = vld [vmem:[%s9444_s4 + $0x6a0] sm:$0xff]  ;;  %v4543_v18 = vld [vmem:[%s9444_s4 + $0x7c8] sm:$0xff] }
 0x35a   : > { %2201 = vmatprep.mubr.f32.mxu0 %v6091_v0  ;;  %v4510_v29 = vld [vmem:[%s9444_s4 + $0x6c0] sm:$0xff]  ;;  %v4545_v19 = vld [vmem:[%s9444_s4 + $0x7d8] sm:$0xff] }
 0x35b   : > { %5370 = vmatpush1.bf16.msra.mxu1 %v5369_v28  ;;  %v4470_v28 = vld [vmem:[%s9444_s4 + $0x5a0] sm:$0xff] }
 0x35c   : > { %5372 = vmatprep.subr.bf16.mxu1 %v5371_v43  ;;  %v4472_v43 = vld [vmem:[%s9444_s4 + $0x5b0] sm:$0xff] }
 0x35d   : > { %4485 = vmatmul.mubr.msk.f32.gmra.mrb[22].mxu0 %vm1437_vm9, %v4483_v33  ;;  %v5413_v14 = vpack.c.bf16 %v4472_v43, %v4470_v28  ;;  %v4474_v33 = vld [vmem:[%s9444_s4 + $0x5c0] sm:$0xff]  ;;  %v4513_v28 = vld [vmem:[%s9444_s4 + $0x6d8] sm:$0xff] }
 0x35e   : > { %2435 = vmatprep.mubr.f32.mxu0 %v6091_v0 }
 0x35f   : > { %5374 = vmatpush1.bf16.msra.mxu1 %v5373_v34  ;;  %v4476_v34 = vld [vmem:[%s9444_s4 + $0x5d0] sm:$0xff] }
 0x360   : > { %5376 = vmatprep.subr.bf16.mxu1 %v5375_v51  ;;  %v4479_v51 = vld [vmem:[%s9444_s4 + $0x5e8] sm:$0xff]  ;;  %v5417_v37 = vpack.c.bf16 %v4476_v34, %v4474_v33  ;;  %v4517_v33 = vld [vmem:[%s9444_s4 + $0x6f8] sm:$0xff] }
 0x361   : > { %v5419_v38 = vpack.c.bf16 %v4481_v1, %v4479_v51  ;;  %v4514_v1 = vld [vmem:[%s9444_s4 + $0x6e0] sm:$0xff] }
 0x363   : > { %5378 = vmatpush1.bf16.msra.mxu1 %v5377_v20  ;;  %v4480_v20 = vld [vmem:[%s9444_s4 + $0x5f0] sm:$0xff] }
 0x364   : > { %5380 = vmatprep.subr.bf16.mxu1 %v5379_v40  ;;  %v5421_v40 = vpack.c.bf16 %v4480_v20, %v4478_v5  ;;  %v4521_v5 = vld [vmem:[%s9444_s4 + $0x718] sm:$0xff] }
 0x367   : > { %5382 = vmatpush1.bf16.msra.mxu1 %v5381_v30  ;;  %v4488_v30 = vld [vmem:[%s9444_s4 + $0x610] sm:$0xff] }
 0x368   : > { %5384 = vmatprep.subr.bf16.mxu1 %v5383_v44  ;;  %v4491_v44 = vld [vmem:[%s9444_s4 + $0x628] sm:$0xff]  ;;  %v5433_v48 = vpack.c.bf16 %v4488_v30, %v4486_v15  ;;  %v4525_v15 = vld [vmem:[%s9444_s4 + $0x738] sm:$0xff]  ;;  %v5465_v30 = vpack.c.bf16 %v4520_v60, %v4518_v42 }
 0x36b   : > { %5386 = vmatpush1.bf16.msra.mxu1 %v5385_v41 }
 0x36c   : > { %5388 = vmatprep.subr.bf16.mxu1 %v5387_v49  ;;  %v5435_v49 = vpack.c.bf16 %v4493_v45, %v4491_v44  ;;  %v4522_v45 = vld [vmem:[%s9444_s4 + $0x720] sm:$0xff] }
 0x36f   : > { %5390 = vmatpush1.bf16.msra.mxu1 %v5389_v54  ;;  %v4497_v54 = vld [vmem:[%s9444_s4 + $0x658] sm:$0xff] }
 0x370   : > { %5392 = vmatprep.subr.bf16.mxu1 %v5391_v56  ;;  %v5437_v56 = vpack.c.bf16 %v4492_v52, %v4490_v50  ;;  %v5439_v59 = vpack.c.bf16 %v4497_v54, %v4495_v36  ;;  %v4526_v52 = vld [vmem:[%s9444_s4 + $0x740] sm:$0xff]  ;;  %v4528_v36 = vld [vmem:[%s9444_s4 + $0x750] sm:$0xff]  ;;  %v4531_v54 = vld [vmem:[%s9444_s4 + $0x768] sm:$0xff] }
 0x373   : > { %5394 = vmatpush1.bf16.msra.mxu1 %v5393_v61  ;;  %v4496_v61 = vld [vmem:[%s9444_s4 + $0x650] sm:$0xff] }
 0x374   : > { %5396 = vmatprep.subr.bf16.mxu1 %v5395_v63  ;;  %v5441_v3 = vpack.c.bf16 %v4496_v61, %v4494_v11  ;;  %v4530_v11 = vld [vmem:[%s9444_s4 + $0x760] sm:$0xff]  ;;  %v4532_v61 = vld [vmem:[%s9444_s4 + $0x770] sm:$0xff] }
 0x377   : > { %5398 = vmatpush1.bf16.msra.mxu1 %v5397_v4 }
 0x378   : > { %5400 = vmatprep.subr.bf16.mxu1 %v5399_v7  ;;  %v5443_v7 = vpack.c.bf16 %v4501_v21, %v4499_v6  ;;  %v4537_v6 = vld [vmem:[%s9444_s4 + $0x798] sm:$0xff]  ;;  %v5477_v21 = vpack.c.bf16 %v4532_v61, %v4530_v11  ;;  %v4561_v61 = vld [vmem:[%s9446_s6 + $0x240] sm:$0xff] }
 0x37b   : > { %5402 = vmatpush1.bf16.msra.mxu1 %v5401_v12  ;;  %v4505_v12 = vld [vmem:[%s9444_s4 + $0x698] sm:$0xff] }
 0x37c   : > { %5404 = vmatprep.subr.bf16.mxu1 %v5403_v13  ;;  %v5445_v13 = vpack.c.bf16 %v4500_v16, %v4498_v8  ;;  %v5447_v17 = vpack.c.bf16 %v4505_v12, %v4503_v9  ;;  %v4536_v8 = vld [vmem:[%s9444_s4 + $0x790] sm:$0xff]  ;;  %v4539_v16 = vld [vmem:[%s9444_s4 + $0x7a8] sm:$0xff] }
 0x37f   : > { %5406 = vmatpush1.bf16.msra.mxu1 %v5405_v22 }
 0x380   : > { %5408 = vmatprep.subr.bf16.mxu1 %v5407_v35  ;;  %v4507_v35 = vld [vmem:[%s9444_s4 + $0x6a8] sm:$0xff] }
 0x381   : > { %v5451_v62 = vpack.c.bf16 %v4509_v47, %v4507_v35  ;;  %v5487_v47 = vpack.c.bf16 %v4545_v19, %v4543_v18  ;;  %v4571_v18 = vld [vmem:[%s9446_s6 + $0x290] sm:$0xff]  ;;  %v4574_v19 = vld [vmem:[%s9446_s6 + $0x2a8] sm:$0xff] }
 0x383   : > { %5410 = vmatpush1.bf16.msra.mxu1 %v5409_v24  ;;  %v4508_v24 = vld [vmem:[%s9444_s4 + $0x6b0] sm:$0xff] }
 0x384   : > { %5412 = vmatprep.subr.bf16.mxu1 %v5411_v27  ;;  %v4511_v27 = vld [vmem:[%s9444_s4 + $0x6c8] sm:$0xff]  ;;  %v5453_v43 = vpack.c.bf16 %v4508_v24, %v4506_v39  ;;  %v4549_v24 = vld [vmem:[%s9444_s4 + $0x7f8] sm:$0xff] }
 0x385   : > { %v5455_v55 = vpack.c.bf16 %v4513_v28, %v4511_v27  ;;  %v4547_v39 = vld [vmem:[%s9444_s4 + $0x7e8] sm:$0xff] }
 0x386   : > { %v5491_v28 = vpack.c.bf16 %v4549_v24, %v4547_v39  ;;  %v4575_v39 = vld [vmem:[%s9446_s6 + $0x2b0] sm:$0xff]  ;;  %v4578_v24 = vld [vmem:[%s9446_s6 + $0x2c8] sm:$0xff] }
 0x387   : > { %5414 = vmatpush1.bf16.msra.mxu1 %v5413_v14  ;;  %v4512_v14 = vld [vmem:[%s9444_s4 + $0x6d0] sm:$0xff] }
 0x388   : > { %5416 = vmatprep.subr.bf16.mxu1 %v5415_v32  ;;  %v4515_v32 = vld [vmem:[%s9444_s4 + $0x6e8] sm:$0xff]  ;;  %v5457_v34 = vpack.c.bf16 %v4512_v14, %v4510_v29 }
 0x389   : > { %v5459_v51 = vpack.c.bf16 %v4517_v33, %v4515_v32 }
 0x38b   : > { %5418 = vmatpush1.bf16.msra.mxu1 %v5417_v37  ;;  %v4516_v37 = vld [vmem:[%s9444_s4 + $0x6f0] sm:$0xff] }
 0x38c   : > { %5420 = vmatprep.subr.bf16.mxu1 %v5419_v38  ;;  %v4519_v38 = vld [vmem:[%s9444_s4 + $0x708] sm:$0xff]  ;;  %v5461_v20 = vpack.c.bf16 %v4516_v37, %v4514_v1 }
 0x38f   : > { %5422 = vmatpush1.bf16.msra.mxu1 %v5421_v40  ;;  %v5463_v40 = vpack.c.bf16 %v4521_v5, %v4519_v38 }
 0x390   : > { %5432 = vmatprep.subr.bf16.mxu1 %v5431_v10  ;;  %v4523_v10 = vld [vmem:[%s9444_s4 + $0x728] sm:$0xff] }
 0x391   : > { %v5467_v44 = vpack.c.bf16 %v4525_v15, %v4523_v10  ;;  %v4556_v10 = vld [vmem:[%s9446_s6 + $0x218] sm:$0xff]  ;;  %v4617_v15 = vld [vmem:[%s9445_s5 + $0x10] sm:$0xff] }
 0x424   : > { %v1965_v46 = vpop.f32.mrb[36].mxu1  ;;  %v7627_v25 = vpop.f32.mrb[16].mxu0 }
 0x425   : > { %v1967_v41 = vpop.f32.mrb[37].mxu1  ;;  %v7635_v53 = vpop.f32.mrb[17].mxu0 }
 0x426   : > { %2105 = vmatprep.mubr.f32.mxu1 %v1967_v41  ;;  %v4529_v41 = vld [vmem:[%s9444_s4 + $0x758] sm:$0xff] }
 0x427   : > { %2106 = vmatmul.mubr.f32.vlgmr.msra.gmra.mrb[32].mxu1 %v1965_v46  ;;  %v4524_v46 = vld [vmem:[%s9444_s4 + $0x730] sm:$0xff] }
 0x428   : > { %5434 = vmatpush1.bf16.msra.mxu1 %v5433_v48  ;;  %v7643_v57 = vpop.f32.mrb[18].mxu0  ;;  %v1971_v58 = vpop.f32.mrb[38].mxu1  ;;  %v4527_v48 = vld [vmem:[%s9444_s4 + $0x748] sm:$0xff] }
 0x429   : > { %5436 = vmatprep.subr.bf16.mxu1 %v5435_v49  ;;  %v7651_v63 = vpop.f32.mrb[19].mxu0  ;;  %v1973_v2 = vpop.f32.mrb[39].mxu1  ;;  %v5469_v49 = vpack.c.bf16 %v4524_v46, %v4522_v45  ;;  %v5471_v50 = vpack.c.bf16 %v4529_v41, %v4527_v48  ;;  %v4555_v45 = vld [vmem:[%s9446_s6 + $0x210] sm:$0xff]  ;;  %v4558_v46 = vld [vmem:[%s9446_s6 + $0x228] sm:$0xff]  ;;  %v4560_v48 = vld [vmem:[%s9446_s6 + $0x238] sm:$0xff] }
 0x42a   : > { %2111 = vmatprep.mubr.f32.mxu1 %v1973_v2  ;;  %v4535_v2 = vld [vmem:[%s9444_s4 + $0x788] sm:$0xff] }
 0x42b   : > { %2112 = vmatmul.mubr.f32.gmra.mrb[34].mxu1 %v1971_v58  ;;  %v5473_v58 = vpack.c.bf16 %v4528_v36, %v4526_v52  ;;  %v4551_v41 = vld [vmem:[%s9445_s5 + $0x8] sm:$0xff]  ;;  %v5507_v52 = vpack.c.bf16 %v4560_v48, %v4558_v46  ;;  %v4557_v36 = vld [vmem:[%s9446_s6 + $0x220] sm:$0xff]  ;;  %v4600_v46 = vld [vmem:[%s9446_s6 + $0x378] sm:$0xff] }
 0x42c   : > { %5438 = vmatpush1.bf16.msra.mxu1 %v5437_v56  ;;  %v7659_v4 = vpop.f32.mrb[20].mxu0  ;;  %v4533_v56 = vld [vmem:[%s9444_s4 + $0x778] sm:$0xff] }
 0x42d   : > { %5440 = vmatprep.subr.bf16.mxu1 %v5439_v59  ;;  %v2199_v31 = vpop.f32.mrb[21].mxu0  ;;  %v5475_v59 = vpack.c.bf16 %v4533_v56, %v4531_v54  ;;  %v4559_v54 = vld [vmem:[%s9446_s6 + $0x230] sm:$0xff]  ;;  %v4562_v56 = vld [vmem:[%s9446_s6 + $0x248] sm:$0xff] }
 0x42e   : > { %2337 = vmatprep.mubr.f32.mxu1 %v2199_v31  ;;  %v4541_v31 = vld [vmem:[%s9444_s4 + $0x7b8] sm:$0xff] }
 0x42f   : > { %v5483_v12 = vpack.c.bf16 %v4541_v31, %v4539_v16  ;;  %v4567_v16 = vld [vmem:[%s9446_s6 + $0x270] sm:$0xff]  ;;  %v4570_v31 = vld [vmem:[%s9446_s6 + $0x288] sm:$0xff] }
 0x430   : > { %5442 = vmatpush1.bf16.msra.mxu1 %v5441_v3  ;;  %v7673_v26 = vpop.f32.mrb[22].mxu0  ;;  %v5479_v3 = vpack.c.bf16 %v4537_v6, %v4535_v2  ;;  %v4563_v2 = vld [vmem:[%s9446_s6 + $0x250] sm:$0xff]  ;;  %v4566_v6 = vld [vmem:[%s9446_s6 + $0x268] sm:$0xff] }
 0x431   : > { %5444 = vmatprep.subr.bf16.mxu1 %v5443_v7  ;;  %v7681_v22 = vpop.f32.mrb[23].mxu0  ;;  %v4534_v7 = vld [vmem:[%s9444_s4 + $0x780] sm:$0xff] }
 0x432   : > { %v5481_v9 = vpack.c.bf16 %v4536_v8, %v4534_v7  ;;  %v4565_v8 = vld [vmem:[%s9446_s6 + $0x260] sm:$0xff] }
 0x434   : > { %5446 = vmatpush1.bf16.msra.mxu1 %v5445_v13  ;;  %v4538_v13 = vld [vmem:[%s9444_s4 + $0x7a0] sm:$0xff] }
 0x435   : > { %5448 = vmatprep.subr.bf16.mxu1 %v5447_v17  ;;  %v4540_v17 = vld [vmem:[%s9444_s4 + $0x7b0] sm:$0xff] }
 0x436   : > { %v5485_v35 = vpack.c.bf16 %v4540_v17, %v4538_v13  ;;  %v4569_v17 = vld [vmem:[%s9446_s6 + $0x280] sm:$0xff] }
 0x438   : > { %5450 = vmatpush1.bf16.msra.mxu1 %v5449_v23  ;;  %v4542_v23 = vld [vmem:[%s9444_s4 + $0x7c0] sm:$0xff] }
 0x439   : > { %5452 = vmatprep.subr.bf16.mxu1 %v5451_v62  ;;  %v4544_v62 = vld [vmem:[%s9444_s4 + $0x7d0] sm:$0xff] }
 0x43a   : > { %v5489_v27 = vpack.c.bf16 %v4544_v62, %v4542_v23  ;;  %v4573_v62 = vld [vmem:[%s9446_s6 + $0x2a0] sm:$0xff] }
 0x43c   : > { %5454 = vmatpush1.bf16.msra.mxu1 %v5453_v43  ;;  %v4546_v43 = vld [vmem:[%s9444_s4 + $0x7e0] sm:$0xff] }
 0x43d   : > { %5456 = vmatprep.subr.bf16.mxu1 %v5455_v55  ;;  %v4548_v55 = vld [vmem:[%s9444_s4 + $0x7f0] sm:$0xff] }
 0x43e   : > { %v5493_v29 = vpack.c.bf16 %v4548_v55, %v4546_v43  ;;  %v4577_v55 = vld [vmem:[%s9446_s6 + $0x2c0] sm:$0xff] }
 0x440   : > { %5458 = vmatpush1.bf16.msra.mxu1 %v5457_v34 }
 0x441   : > { %5460 = vmatprep.subr.bf16.mxu1 %v5459_v51 }
 0x444   : > { %5462 = vmatpush1.bf16.msra.mxu1 %v5461_v20 }
 0x445   : > { %5464 = vmatprep.subr.bf16.mxu1 %v5463_v40 }
 0x448   : > { %5466 = vmatpush1.bf16.msra.mxu1 %v5465_v30 }
 0x449   : > { %5468 = vmatprep.subr.bf16.mxu1 %v5467_v44  ;;  %v4553_v44 = vld [vmem:[%s9446_s6 + $0x200] sm:$0xff] }
 0x44c   : > { %5470 = vmatpush1.bf16.msra.mxu1 %v5469_v49  ;;  %v5505_v49 = vpack.c.bf16 %v4555_v45, %v4553_v44  ;;  %v4595_v44 = vld [vmem:[%s9446_s6 + $0x350] sm:$0xff]  ;;  %v4598_v45 = vld [vmem:[%s9446_s6 + $0x368] sm:$0xff] }
 0x44d   : > { %5472 = vmatprep.subr.bf16.mxu1 %v5471_v50  ;;  %v4683_v50 = vld [vmem:[%s9445_s5 + $0x18] sm:$0xff] }
 0x450   : > { %5474 = vmatpush1.bf16.msra.mxu1 %v5473_v58  ;;  %v4564_v58 = vld [vmem:[%s9446_s6 + $0x258] sm:$0xff] }
 0x451   : > { %5476 = vmatprep.subr.bf16.mxu1 %v5475_v59  ;;  %v5509_v59 = vpack.c.bf16 %v4559_v54, %v4557_v36  ;;  %v5511_v11 = vpack.c.bf16 %v4564_v58, %v4562_v56  ;;  %v4604_v36 = vld [vmem:[%s9446_s6 + $0x398] sm:$0xff]  ;;  %v4601_v58 = vld [vmem:[%s9446_s6 + $0x380] sm:$0xff] }
 0x454   : > { %5478 = vmatpush1.bf16.msra.mxu1 %v5477_v21  ;;  %v4568_v21 = vld [vmem:[%s9446_s6 + $0x278] sm:$0xff] }
 0x455   : > { %5480 = vmatprep.subr.bf16.mxu1 %v5479_v3  ;;  %v5513_v3 = vpack.c.bf16 %v4563_v2, %v4561_v61  ;;  %v5515_v7 = vpack.c.bf16 %v4568_v21, %v4566_v6  ;;  %v4608_v61 = vld [vmem:[%s9446_s6 + $0x3b8] sm:$0xff]  ;;  %v4605_v21 = vld [vmem:[%s9446_s6 + $0x3a0] sm:$0xff] }
 0x458   : > { %5482 = vmatpush1.bf16.msra.mxu1 %v5481_v9  ;;  %v4572_v9 = vld [vmem:[%s9446_s6 + $0x298] sm:$0xff] }
 0x459   : > { %5484 = vmatprep.subr.bf16.mxu1 %v5483_v12  ;;  %v5517_v12 = vpack.c.bf16 %v4567_v16, %v4565_v8  ;;  %v5519_v13 = vpack.c.bf16 %v4572_v9, %v4570_v31  ;;  %v4612_v8 = vld [vmem:[%s9446_s6 + $0x3d8] sm:$0xff]  ;;  %v4609_v9 = vld [vmem:[%s9446_s6 + $0x3c0] sm:$0xff] }
 0x45c   : > { %5486 = vmatpush1.bf16.msra.mxu1 %v5485_v35  ;;  %v4576_v35 = vld [vmem:[%s9446_s6 + $0x2b8] sm:$0xff] }
 0x45d   : > { %5488 = vmatprep.subr.bf16.mxu1 %v5487_v47  ;;  %v5521_v47 = vpack.c.bf16 %v4571_v18, %v4569_v17  ;;  %v5523_v23 = vpack.c.bf16 %v4576_v35, %v4574_v19  ;;  %v4614_v17 = vld [vmem:[%s9446_s6 + $0x3e8] sm:$0xff]  ;;  %v4616_v18 = vld [vmem:[%s9446_s6 + $0x3f8] sm:$0xff]  ;;  %v4613_v35 = vld [vmem:[%s9446_s6 + $0x3e0] sm:$0xff] }
 0x45e   : > { %v5563_v19 = vpack.c.bf16 %v4616_v18, %v4614_v17  ;;  %v2474_v17 = vld [vmem:[%s9446_s6 + $0x100] sm:$0xff]  ;;  %v2476_v18 = vld [vmem:[%s9446_s6 + $0x110] sm:$0xff] }
 0x460   : > { %5490 = vmatpush1.bf16.msra.mxu1 %v5489_v27  ;;  %v4580_v27 = vld [vmem:[%s9446_s6 + $0x2d8] sm:$0xff] }
 0x461   : > { %5492 = vmatprep.subr.bf16.mxu1 %v5491_v28  ;;  %v5525_v28 = vpack.c.bf16 %v4575_v39, %v4573_v62  ;;  %v5527_v43 = vpack.c.bf16 %v4580_v27, %v4578_v24  ;;  %v2443_v62 = vld [vmem:[%s9446_s6 + $0x8] sm:$0xff]  ;;  %v2445_v39 = vld [vmem:[%s9446_s6 + $0x18] sm:$0xff] }
 0x462   : > { %v5567_v24 = vpack.c.bf16 %v2445_v39, %v2443_v62  ;;  %v2478_v62 = vld [vmem:[%s9446_s6 + $0x120] sm:$0xff]  ;;  %v2480_v39 = vld [vmem:[%s9446_s6 + $0x130] sm:$0xff] }
 0x464   : > { %5494 = vmatpush1.bf16.msra.mxu1 %v5493_v29  ;;  %v4579_v29 = vld [vmem:[%s9446_s6 + $0x2d0] sm:$0xff] }
 0x467   : > { %2338 = vmatmul.mubr.f32.vlgmr.msra.gmra.mrb[32].mxu1 %v7659_v4 }
 0x468   : > { %2343 = vmatprep.mubr.f32.mxu1 %v7681_v22 }
 0x46b   : > { %2344 = vmatmul.mubr.f32.gmra.mrb[34].mxu1 %v7673_v26 }
 0x46c   : > { %2858 = vmatprep.mubr.f32.mxu1 %v6091_v0 }
 0x53a   : > { %v2339_v14 = vpop.f32.mrb[32].mxu1 }
 0x53b   : > { %v6023_v32 = vadd.f32 %v2339_v14, %v7627_v25  ;;  %v2341_v33 = vpop.f32.mrb[33].mxu1  ;;  %v4582_v14 = vld [vmem:[%s9446_s6 + $0x2e8] sm:$0xff] }
 0x53c   : > { %v6024_v34 = vadd.f32 %v2341_v33, %v7635_v53  ;;  %v5529_v33 = vpack.c.bf16 %v4579_v29, %v4577_v55  ;;  %v2444_v55 = vld [vmem:[%s9446_s6 + $0x10] sm:$0xff]  ;;  %v2447_v29 = vld [vmem:[%s9446_s6 + $0x28] sm:$0xff] }
 0x53d   : > { %v2358_v1 = vmul.f32 0.2, %v6023_v32  ;;  %vm2354_vm10 = vcmp.ge.f32.partialorder %v6023_v32, 0.0 }
 0x53e   : > { %v2345_v51 = vpop.f32.mrb[34].mxu1  ;;  %v2359_v5 = vmul.f32 0.2, %v6024_v34  ;;  %vm2355_vm11 = vcmp.ge.f32.partialorder %v6024_v34, 0.0 }
 0x53f   : > { %v6025_v37 = vadd.f32 %v2345_v51, %v7643_v57  ;;  %v2347_v38 = vpop.f32.mrb[35].mxu1  ;;  %v2362_v20 = vsel %vm2354_vm10, %v6023_v32, %v2358_v1  ;;  %v4554_v57 = vld [vmem:[%s9446_s6 + $0x208] sm:$0xff]  ;;  %v4584_v32 = vld [vmem:[%s9446_s6 + $0x2f8] sm:$0xff]  ;;  %v4581_v51 = vld [vmem:[%s9446_s6 + $0x2e0] sm:$0xff] }
 0x540   : > { %v6026_v4 = vadd.f32 %v2347_v38, %v7651_v63  ;;  %v2363_v25 = vsel %vm2355_vm11, %v6024_v34, %v2359_v5  ;;  %v2366_v63 = vld [vmem:[%s9445_s5] sm:$0xff]  ;;  %v5503_v30 = vpack.c.bf16 %v4556_v10, %v4554_v57  ;;  %v5531_v34 = vpack.c.bf16 %v4584_v32, %v4582_v14  ;;  %v4583_v1 = vld [vmem:[%s9446_s6 + $0x2f0] sm:$0xff]  ;;  %v4588_v38 = vld [vmem:[%s9446_s6 + $0x318] sm:$0xff] }
 0x541   : > { %vm2356_vm12 = vcmp.ge.f32.partialorder %v6025_v37, 0.0  ;;  %v2360_v26 = vmul.f32 0.2, %v6025_v37  ;;  %v5533_v5 = vpack.c.bf16 %v4583_v1, %v4581_v51  ;;  %v4594_v57 = vld [vmem:[%s9446_s6 + $0x348] sm:$0xff]  ;;  %v4596_v10 = vld [vmem:[%s9446_s6 + $0x358] sm:$0xff] }
 0x542   : > { %vm2357_vm13 = vcmp.ge.f32.partialorder %v6026_v4, 0.0  ;;  %v2361_v22 = vmul.f32 0.2, %v6026_v4  ;;  %v2449_v14 = vld [vmem:[%s9446_s6 + $0x38] sm:$0xff] }
 0x543   : > { %v2364_v40 = vsel %vm2356_vm12, %v6025_v37, %v2360_v26  ;;  %v4586_v37 = vld [vmem:[%s9446_s6 + $0x308] sm:$0xff]  ;;  %v4585_v26 = vld [vmem:[%s9446_s6 + $0x300] sm:$0xff]  ;;  %v5571_v1 = vpack.c.bf16 %v2449_v14, %v2447_v29  ;;  %v2484_v14 = vld [vmem:[%s9446_s6 + $0x150] sm:$0xff] }
 0x544   : > { %v5497_v42 = vpack.c.bf16 %v2364_v40, %v2362_v20  ;;  %v2365_v60 = vsel %vm2357_vm13, %v6026_v4, %v2361_v22  ;;  %v5535_v4 = vpack.c.bf16 %v4588_v38, %v4586_v37  ;;  %v4587_v22 = vld [vmem:[%s9446_s6 + $0x310] sm:$0xff]  ;;  %v4590_v20 = vld [vmem:[%s9446_s6 + $0x328] sm:$0xff]  ;;  %v4592_v40 = vld [vmem:[%s9446_s6 + $0x338] sm:$0xff] }
 0x545   : > { %v5495_v53 = vpack.c.bf16 %v2365_v60, %v2363_v25  ;;  %v5537_v25 = vpack.c.bf16 %v4587_v22, %v4585_v26  ;;  %v4589_v60 = vld [vmem:[%s9446_s6 + $0x320] sm:$0xff]  ;;  %v2448_v38 = vld [vmem:[%s9446_s6 + $0x30] sm:$0xff]  ;;  %v2453_v26 = vld [vmem:[%s9446_s6 + $0x58] sm:$0xff] }
 0x546   : > { %v2446_v37 = vld [vmem:[%s9446_s6 + $0x20] sm:$0xff] }
 0x547   : > { %5496 = vmatprep.subr.bf16.mxu0 %v5495_v53  ;;  %5632 = vmatprep.subr.bf16.mxu1 %v5495_v53  ;;  %v5573_v22 = vpack.c.bf16 %v2448_v38, %v2446_v37  ;;  %v2482_v29 = vld [vmem:[%s9446_s6 + $0x140] sm:$0xff]  ;;  %v2488_v38 = vld [vmem:[%s9446_s6 + $0x170] sm:$0xff] }
 0x548   : > { %5498 = vmatpush1.bf16.msra.mxu0 %v5497_v42  ;;  %5634 = vmatpush1.bf16.msra.mxu1 %v5497_v42  ;;  %v2486_v37 = vld [vmem:[%s9446_s6 + $0x160] sm:$0xff] }
 0x549   : > { %5500 = vmatprep.subr.bf16.mxu0 %v5495_v53  ;;  %5700 = vmatprep.subr.bf16.mxu1 %v5495_v53  ;;  %v4591_v53 = vld [vmem:[%s9446_s6 + $0x330] sm:$0xff] }
 0x54b   : > { %4550 = vmatmul.mubr.msk.f32.vlgmr.msra.gmra.mrb[24].mxu0 %vm2367_vm14, %v2366_v63  ;;  %4618 = vmatmul.mubr.msk.f32.vlgmr.msra.gmra.mrb[40].mxu1 %vm2367_vm14, %v4617_v15  ;;  %v5541_v63 = vpack.c.bf16 %v4591_v53, %v4589_v60  ;;  %v5543_v15 = vpack.c.bf16 %v4596_v10, %v4594_v57  ;;  %v2457_v60 = vld [vmem:[%s9446_s6 + $0x78] sm:$0xff]  ;;  %v2454_v10 = vld [vmem:[%s9446_s6 + $0x60] sm:$0xff] }
 0x54c   : > { %5502 = vmatpush1.bf16.msra.mxu0 %v5497_v42  ;;  %5702 = vmatpush1.bf16.msra.mxu1 %v5497_v42  ;;  %v5539_v42 = vpack.c.bf16 %v4592_v40, %v4590_v20  ;;  %v2450_v40 = vld [vmem:[%s9446_s6 + $0x40] sm:$0xff] }
 0x54d   : > { %2575 = vmatprep.mubr.f32.mxu0 %v6091_v0  ;;  %5504 = vmatprep.subr.bf16.mxu0 %v5503_v30  ;;  %v4593_v30 = vld [vmem:[%s9446_s6 + $0x340] sm:$0xff] }
 0x54e   : > { %3072 = vmatprep.mubr.f32.mxu1 %v6091_v0  ;;  %v5545_v48 = vpack.c.bf16 %v4595_v44, %v4593_v30  ;;  %v2461_v30 = vld [vmem:[%s9446_s6 + $0x98] sm:$0xff] }
 0x54f   : > { %4552 = vmatmul.mubr.msk.f32.vlgmr.msra.gmra.mrb[26].mxu0 %vm2367_vm14, %v4551_v41  ;;  %4684 = vmatmul.mubr.msk.f32.vlgmr.msra.gmra.mrb[42].mxu1 %vm2367_vm14, %v4683_v50  ;;  %v5547_v41 = vpack.c.bf16 %v4600_v46, %v4598_v45  ;;  %v4599_v50 = vld [vmem:[%s9446_s6 + $0x370] sm:$0xff]  ;;  %v2458_v46 = vld [vmem:[%s9446_s6 + $0x80] sm:$0xff] }
 0x550   : > { %5506 = vmatpush1.bf16.msra.mxu0 %v5505_v49  ;;  %3292 = vmatprep.mubr.f32.mxu1 %v6091_v0  ;;  %v4597_v49 = vld [vmem:[%s9446_s6 + $0x360] sm:$0xff] }
 0x551   : > { %5508 = vmatprep.subr.bf16.mxu0 %v5507_v52  ;;  %v4602_v52 = vld [vmem:[%s9446_s6 + $0x388] sm:$0xff]  ;;  %v5549_v54 = vpack.c.bf16 %v4599_v50, %v4597_v49  ;;  %v2465_v49 = vld [vmem:[%s9446_s6 + $0xb8] sm:$0xff] }
 0x552   : > { %v5551_v56 = vpack.c.bf16 %v4604_v36, %v4602_v52  ;;  %v2462_v36 = vld [vmem:[%s9446_s6 + $0xa0] sm:$0xff] }
 0x554   : > { %5510 = vmatpush1.bf16.msra.mxu0 %v5509_v59  ;;  %v4603_v59 = vld [vmem:[%s9446_s6 + $0x390] sm:$0xff] }
 0x555   : > { %5512 = vmatprep.subr.bf16.mxu0 %v5511_v11  ;;  %v4606_v11 = vld [vmem:[%s9446_s6 + $0x3a8] sm:$0xff]  ;;  %v5553_v2 = vpack.c.bf16 %v4603_v59, %v4601_v58  ;;  %v2469_v58 = vld [vmem:[%s9446_s6 + $0xd8] sm:$0xff] }
 0x556   : > { %v5555_v6 = vpack.c.bf16 %v4608_v61, %v4606_v11  ;;  %v2466_v61 = vld [vmem:[%s9446_s6 + $0xc0] sm:$0xff] }
 0x558   : > { %5514 = vmatpush1.bf16.msra.mxu0 %v5513_v3  ;;  %v4607_v3 = vld [vmem:[%s9446_s6 + $0x3b0] sm:$0xff] }
 0x559   : > { %5516 = vmatprep.subr.bf16.mxu0 %v5515_v7  ;;  %v4610_v7 = vld [vmem:[%s9446_s6 + $0x3c8] sm:$0xff]  ;;  %v5557_v16 = vpack.c.bf16 %v4607_v3, %v4605_v21  ;;  %v2473_v21 = vld [vmem:[%s9446_s6 + $0xf8] sm:$0xff] }
 0x55a   : > { %v5559_v31 = vpack.c.bf16 %v4612_v8, %v4610_v7  ;;  %v2470_v8 = vld [vmem:[%s9446_s6 + $0xe0] sm:$0xff] }
 0x55c   : > { %5518 = vmatpush1.bf16.msra.mxu0 %v5517_v12  ;;  %v4611_v12 = vld [vmem:[%s9446_s6 + $0x3d0] sm:$0xff] }
 0x55d   : > { %5520 = vmatprep.subr.bf16.mxu0 %v5519_v13  ;;  %v5561_v13 = vpack.c.bf16 %v4611_v12, %v4609_v9  ;;  %v2477_v9 = vld [vmem:[%s9446_s6 + $0x118] sm:$0xff] }
 0x560   : > { %5522 = vmatpush1.bf16.msra.mxu0 %v5521_v47  ;;  %v4615_v47 = vld [vmem:[%s9446_s6 + $0x3f0] sm:$0xff] }
 0x561   : > { %5524 = vmatprep.subr.bf16.mxu0 %v5523_v23  ;;  %v5565_v23 = vpack.c.bf16 %v4615_v47, %v4613_v35  ;;  %v2481_v35 = vld [vmem:[%s9446_s6 + $0x138] sm:$0xff]  ;;  %v5601_v47 = vpack.c.bf16 %v2476_v18, %v2474_v17 }
 0x564   : > { %5526 = vmatpush1.bf16.msra.mxu0 %v5525_v28 }
 0x565   : > { %5528 = vmatprep.subr.bf16.mxu0 %v5527_v43  ;;  %v2442_v43 = vld [vmem:[%s9446_s6] sm:$0xff] }
 0x568   : > { %5530 = vmatpush1.bf16.msra.mxu0 %v5529_v33  ;;  %v5569_v33 = vpack.c.bf16 %v2444_v55, %v2442_v43  ;;  %v5605_v43 = vpack.c.bf16 %v2480_v39, %v2478_v62  ;;  %v4631_v62 = vld [vmem:[%s9446_s6 + $0x460] sm:$0xff]  ;;  %v4633_v39 = vld [vmem:[%s9446_s6 + $0x470] sm:$0xff] }
 0x569   : > { %5532 = vmatprep.subr.bf16.mxu0 %v5531_v34 }
 0x56c   : > { %5534 = vmatpush1.bf16.msra.mxu0 %v5533_v5 }
 0x56d   : > { %5536 = vmatprep.subr.bf16.mxu0 %v5535_v4  ;;  %v2451_v4 = vld [vmem:[%s9446_s6 + $0x48] sm:$0xff] }
 0x56e   : > { %v5575_v20 = vpack.c.bf16 %v2453_v26, %v2451_v4  ;;  %v2491_v4 = vld [vmem:[%s9446_s6 + $0x188] sm:$0xff]  ;;  %v2493_v26 = vld [vmem:[%s9446_s6 + $0x198] sm:$0xff] }
 0x570   : > { %5538 = vmatpush1.bf16.msra.mxu0 %v5537_v25  ;;  %v2452_v25 = vld [vmem:[%s9446_s6 + $0x50] sm:$0xff] }
 0x571   : > { %5540 = vmatprep.subr.bf16.mxu0 %v5539_v42  ;;  %v2455_v42 = vld [vmem:[%s9446_s6 + $0x68] sm:$0xff]  ;;  %v5577_v53 = vpack.c.bf16 %v2452_v25, %v2450_v40  ;;  %v2490_v40 = vld [vmem:[%s9446_s6 + $0x180] sm:$0xff]  ;;  %v2492_v25 = vld [vmem:[%s9446_s6 + $0x190] sm:$0xff] }
 0x572   : > { %v5579_v57 = vpack.c.bf16 %v2457_v60, %v2455_v42  ;;  %v2495_v42 = vld [vmem:[%s9446_s6 + $0x1a8] sm:$0xff]  ;;  %v2497_v60 = vld [vmem:[%s9446_s6 + $0x1b8] sm:$0xff] }
 0x574   : > { %5542 = vmatpush1.bf16.msra.mxu0 %v5541_v63  ;;  %v2456_v63 = vld [vmem:[%s9446_s6 + $0x70] sm:$0xff] }
 0x575   : > { %5544 = vmatprep.subr.bf16.mxu0 %v5543_v15  ;;  %v2459_v15 = vld [vmem:[%s9446_s6 + $0x88] sm:$0xff]  ;;  %v5581_v44 = vpack.c.bf16 %v2456_v63, %v2454_v10  ;;  %v2494_v10 = vld [vmem:[%s9446_s6 + $0x1a0] sm:$0xff]  ;;  %v2496_v63 = vld [vmem:[%s9446_s6 + $0x1b0] sm:$0xff] }
 0x576   : > { %v5583_v45 = vpack.c.bf16 %v2461_v30, %v2459_v15  ;;  %v2499_v15 = vld [vmem:[%s9446_s6 + $0x1c8] sm:$0xff]  ;;  %v2501_v30 = vld [vmem:[%s9446_s6 + $0x1d8] sm:$0xff] }
 0x578   : > { %5546 = vmatpush1.bf16.msra.mxu0 %v5545_v48  ;;  %v2460_v48 = vld [vmem:[%s9446_s6 + $0x90] sm:$0xff] }
 0x579   : > { %5548 = vmatprep.subr.bf16.mxu0 %v5547_v41  ;;  %v2463_v41 = vld [vmem:[%s9446_s6 + $0xa8] sm:$0xff]  ;;  %v5585_v50 = vpack.c.bf16 %v2460_v48, %v2458_v46  ;;  %v2498_v46 = vld [vmem:[%s9446_s6 + $0x1c0] sm:$0xff]  ;;  %v2500_v48 = vld [vmem:[%s9446_s6 + $0x1d0] sm:$0xff] }
 0x57a   : > { %v5587_v52 = vpack.c.bf16 %v2465_v49, %v2463_v41  ;;  %v2503_v41 = vld [vmem:[%s9446_s6 + $0x1e8] sm:$0xff]  ;;  %v2505_v49 = vld [vmem:[%s9446_s6 + $0x1f8] sm:$0xff] }
 0x57c   : > { %5550 = vmatpush1.bf16.msra.mxu0 %v5549_v54  ;;  %v2464_v54 = vld [vmem:[%s9446_s6 + $0xb0] sm:$0xff] }
 0x57d   : > { %5552 = vmatprep.subr.bf16.mxu0 %v5551_v56  ;;  %v2467_v56 = vld [vmem:[%s9446_s6 + $0xc8] sm:$0xff]  ;;  %v5589_v59 = vpack.c.bf16 %v2464_v54, %v2462_v36  ;;  %v2502_v36 = vld [vmem:[%s9446_s6 + $0x1e0] sm:$0xff]  ;;  %v2504_v54 = vld [vmem:[%s9446_s6 + $0x1f0] sm:$0xff] }
 0x57e   : > { %v5591_v11 = vpack.c.bf16 %v2469_v58, %v2467_v56  ;;  %v4620_v56 = vld [vmem:[%s9446_s6 + $0x408] sm:$0xff]  ;;  %v4622_v58 = vld [vmem:[%s9446_s6 + $0x418] sm:$0xff] }
 0x580   : > { %5554 = vmatpush1.bf16.msra.mxu0 %v5553_v2  ;;  %v2468_v2 = vld [vmem:[%s9446_s6 + $0xd0] sm:$0xff] }
 0x581   : > { %5556 = vmatprep.subr.bf16.mxu0 %v5555_v6  ;;  %v2471_v6 = vld [vmem:[%s9446_s6 + $0xe8] sm:$0xff]  ;;  %v5593_v3 = vpack.c.bf16 %v2468_v2, %v2466_v61  ;;  %v4619_v61 = vld [vmem:[%s9446_s6 + $0x400] sm:$0xff]  ;;  %v4621_v2 = vld [vmem:[%s9446_s6 + $0x410] sm:$0xff] }
 0x582   : > { %v5595_v7 = vpack.c.bf16 %v2473_v21, %v2471_v6  ;;  %v4624_v21 = vld [vmem:[%s9446_s6 + $0x428] sm:$0xff] }
 0x584   : > { %5558 = vmatpush1.bf16.msra.mxu0 %v5557_v16  ;;  %v2472_v16 = vld [vmem:[%s9446_s6 + $0xf0] sm:$0xff] }
 0x585   : > { %5560 = vmatprep.subr.bf16.mxu0 %v5559_v31  ;;  %v2475_v31 = vld [vmem:[%s9446_s6 + $0x108] sm:$0xff]  ;;  %v5597_v12 = vpack.c.bf16 %v2472_v16, %v2470_v8 }
 0x588   : > { %5562 = vmatpush1.bf16.msra.mxu0 %v5561_v13  ;;  %v5599_v13 = vpack.c.bf16 %v2477_v9, %v2475_v31  ;;  %v4623_v31 = vld [vmem:[%s9446_s6 + $0x420] sm:$0xff]  ;;  %v4625_v9 = vld [vmem:[%s9446_s6 + $0x430] sm:$0xff] }
 0x589   : > { %5564 = vmatprep.subr.bf16.mxu0 %v5563_v19  ;;  %v2479_v19 = vld [vmem:[%s9446_s6 + $0x128] sm:$0xff]  ;;  %v5641_v17 = vpack.c.bf16 %v4625_v9, %v4623_v31  ;;  %v4663_v31 = vld [vmem:[%s9446_s6 + $0x560] sm:$0xff]  ;;  %v4665_v9 = vld [vmem:[%s9446_s6 + $0x570] sm:$0xff] }
 0x58c   : > { %5566 = vmatpush1.bf16.msra.mxu0 %v5565_v23  ;;  %v5603_v23 = vpack.c.bf16 %v2481_v35, %v2479_v19  ;;  %v4627_v19 = vld [vmem:[%s9446_s6 + $0x440] sm:$0xff]  ;;  %v4629_v35 = vld [vmem:[%s9446_s6 + $0x450] sm:$0xff] }
 0x58d   : > { %5568 = vmatprep.subr.bf16.mxu0 %v5567_v24  ;;  %v2483_v24 = vld [vmem:[%s9446_s6 + $0x148] sm:$0xff] }
 0x61e   : > { %v8040_v27 = vpop.f32.mrb[24].mxu0  ;;  %v8054_v34 = vpop.f32.mrb[40].mxu1 }
 0x61f   : > { %v2439_v28 = vpop.f32.mrb[25].mxu0  ;;  %v8062_v5 = vpop.f32.mrb[41].mxu1 }
 0x622   : > { %v2577_v32 = vpop.f32.mrb[26].mxu0  ;;  %v8244_v6 = vpop.f32.mrb[42].mxu1 }
 0x623   : > { %v2579_v51 = vpop.f32.mrb[27].mxu0  ;;  %v8252_v8 = vpop.f32.mrb[43].mxu1 }
 0x624   : > { %2711 = vmatprep.mubr.f32.mxu0 %v2579_v51  ;;  %v5609_v51 = vpack.c.bf16 %v2484_v14, %v2482_v29  ;;  %v4635_v29 = vld [vmem:[%s9446_s6 + $0x480] sm:$0xff]  ;;  %v4637_v14 = vld [vmem:[%s9446_s6 + $0x490] sm:$0xff] }
 0x625   : > { %2712 = vmatmul.mubr.f32.vlgmr.msra.gmra.mrb[28].mxu0 %v2577_v32  ;;  %v2487_v32 = vld [vmem:[%s9446_s6 + $0x168] sm:$0xff] }
 0x626   : > { %5570 = vmatpush1.bf16.msra.mxu0 %v5569_v33  ;;  %2782 = vmatprep.mubr.f32.mxu0 %v2439_v28  ;;  %v2485_v28 = vld [vmem:[%s9446_s6 + $0x158] sm:$0xff] }
 0x627   : > { %5572 = vmatprep.subr.bf16.mxu0 %v5571_v1  ;;  %v5607_v55 = vpack.c.bf16 %v2485_v28, %v2483_v24  ;;  %v2489_v33 = vld [vmem:[%s9446_s6 + $0x178] sm:$0xff]  ;;  %v4636_v24 = vld [vmem:[%s9446_s6 + $0x488] sm:$0xff] }
 0x628   : > { %v5611_v1 = vpack.c.bf16 %v2489_v33, %v2487_v32  ;;  %v4638_v28 = vld [vmem:[%s9446_s6 + $0x498] sm:$0xff]  ;;  %v4640_v32 = vld [vmem:[%s9446_s6 + $0x4a8] sm:$0xff] }
 0x629   : > { %v4642_v33 = vld [vmem:[%s9446_s6 + $0x4b8] sm:$0xff] }
 0x62a   : > { %5574 = vmatpush1.bf16.msra.mxu0 %v5573_v22  ;;  %v5613_v22 = vpack.c.bf16 %v2488_v38, %v2486_v37  ;;  %v4639_v37 = vld [vmem:[%s9446_s6 + $0x4a0] sm:$0xff]  ;;  %v4641_v38 = vld [vmem:[%s9446_s6 + $0x4b0] sm:$0xff] }
 0x62b   : > { %5576 = vmatprep.subr.bf16.mxu0 %v5575_v20  ;;  %v5615_v20 = vpack.c.bf16 %v2493_v26, %v2491_v4  ;;  %v4644_v4 = vld [vmem:[%s9446_s6 + $0x4c8] sm:$0xff]  ;;  %v4646_v26 = vld [vmem:[%s9446_s6 + $0x4d8] sm:$0xff] }
 0x62e   : > { %5578 = vmatpush1.bf16.msra.mxu0 %v5577_v53  ;;  %v5617_v53 = vpack.c.bf16 %v2492_v25, %v2490_v40  ;;  %v4643_v40 = vld [vmem:[%s9446_s6 + $0x4c0] sm:$0xff]  ;;  %v4645_v25 = vld [vmem:[%s9446_s6 + $0x4d0] sm:$0xff] }
 0x62f   : > { %5580 = vmatprep.subr.bf16.mxu0 %v5579_v57  ;;  %v5619_v57 = vpack.c.bf16 %v2497_v60, %v2495_v42  ;;  %v4648_v42 = vld [vmem:[%s9446_s6 + $0x4e8] sm:$0xff]  ;;  %v4650_v60 = vld [vmem:[%s9446_s6 + $0x4f8] sm:$0xff] }
 0x632   : > { %5582 = vmatpush1.bf16.msra.mxu0 %v5581_v44  ;;  %v5621_v44 = vpack.c.bf16 %v2496_v63, %v2494_v10  ;;  %v4647_v10 = vld [vmem:[%s9446_s6 + $0x4e0] sm:$0xff]  ;;  %v4649_v63 = vld [vmem:[%s9446_s6 + $0x4f0] sm:$0xff] }
 0x633   : > { %5584 = vmatprep.subr.bf16.mxu0 %v5583_v45  ;;  %v5623_v45 = vpack.c.bf16 %v2501_v30, %v2499_v15  ;;  %v4652_v15 = vld [vmem:[%s9446_s6 + $0x508] sm:$0xff]  ;;  %v4654_v30 = vld [vmem:[%s9446_s6 + $0x518] sm:$0xff] }
 0x636   : > { %5586 = vmatpush1.bf16.msra.mxu0 %v5585_v50  ;;  %v5625_v50 = vpack.c.bf16 %v2500_v48, %v2498_v46  ;;  %v4651_v46 = vld [vmem:[%s9446_s6 + $0x500] sm:$0xff]  ;;  %v4653_v48 = vld [vmem:[%s9446_s6 + $0x510] sm:$0xff] }
 0x637   : > { %5588 = vmatprep.subr.bf16.mxu0 %v5587_v52  ;;  %v5627_v52 = vpack.c.bf16 %v2505_v49, %v2503_v41  ;;  %v4656_v41 = vld [vmem:[%s9446_s6 + $0x528] sm:$0xff]  ;;  %v4658_v49 = vld [vmem:[%s9446_s6 + $0x538] sm:$0xff] }
 0x63a   : > { %5590 = vmatpush1.bf16.msra.mxu0 %v5589_v59  ;;  %v5629_v59 = vpack.c.bf16 %v2504_v54, %v2502_v36  ;;  %v4655_v36 = vld [vmem:[%s9446_s6 + $0x520] sm:$0xff]  ;;  %v4657_v54 = vld [vmem:[%s9446_s6 + $0x530] sm:$0xff] }
 0x63b   : > { %5592 = vmatprep.subr.bf16.mxu0 %v5591_v11  ;;  %v5635_v11 = vpack.c.bf16 %v4622_v58, %v4620_v56  ;;  %v4660_v56 = vld [vmem:[%s9446_s6 + $0x548] sm:$0xff]  ;;  %v4662_v58 = vld [vmem:[%s9446_s6 + $0x558] sm:$0xff] }
 0x63e   : > { %5594 = vmatpush1.bf16.msra.mxu0 %v5593_v3  ;;  %v4626_v3 = vld [vmem:[%s9446_s6 + $0x438] sm:$0xff] }
 0x63f   : > { %5596 = vmatprep.subr.bf16.mxu0 %v5595_v7  ;;  %v5637_v7 = vpack.c.bf16 %v4621_v2, %v4619_v61  ;;  %v5639_v16 = vpack.c.bf16 %v4626_v3, %v4624_v21  ;;  %v4659_v61 = vld [vmem:[%s9446_s6 + $0x540] sm:$0xff]  ;;  %v4661_v2 = vld [vmem:[%s9446_s6 + $0x550] sm:$0xff]  ;;  %v4664_v21 = vld [vmem:[%s9446_s6 + $0x568] sm:$0xff] }
 0x640   : > { %v4666_v3 = vld [vmem:[%s9446_s6 + $0x578] sm:$0xff] }
 0x642   : > { %5598 = vmatpush1.bf16.msra.mxu0 %v5597_v12  ;;  %v4628_v12 = vld [vmem:[%s9446_s6 + $0x448] sm:$0xff] }
 0x643   : > { %5600 = vmatprep.subr.bf16.mxu0 %v5599_v13  ;;  %v4630_v13 = vld [vmem:[%s9446_s6 + $0x458] sm:$0xff] }
 0x644   : > { %v5643_v18 = vpack.c.bf16 %v4630_v13, %v4628_v12  ;;  %v4668_v12 = vld [vmem:[%s9446_s6 + $0x588] sm:$0xff]  ;;  %v4670_v13 = vld [vmem:[%s9446_s6 + $0x598] sm:$0xff] }
 0x646   : > { %5602 = vmatpush1.bf16.msra.mxu0 %v5601_v47  ;;  %v4632_v47 = vld [vmem:[%s9446_s6 + $0x468] sm:$0xff] }
 0x647   : > { %5604 = vmatprep.subr.bf16.mxu0 %v5603_v23 }
 0x64a   : > { %5606 = vmatpush1.bf16.msra.mxu0 %v5605_v43  ;;  %v5649_v43 = vpack.c.bf16 %v4633_v39, %v4631_v62  ;;  %v4671_v62 = vld [vmem:[%s9446_s6 + $0x5a0] sm:$0xff]  ;;  %v4673_v39 = vld [vmem:[%s9446_s6 + $0x5b0] sm:$0xff] }
 0x64b   : > { %5608 = vmatprep.subr.bf16.mxu0 %v5607_v55  ;;  %v5651_v55 = vpack.c.bf16 %v4638_v28, %v4636_v24  ;;  %v4676_v24 = vld [vmem:[%s9446_s6 + $0x5c8] sm:$0xff]  ;;  %v4678_v28 = vld [vmem:[%s9446_s6 + $0x5d8] sm:$0xff] }
 0x64e   : > { %5610 = vmatpush1.bf16.msra.mxu0 %v5609_v51  ;;  %v5653_v51 = vpack.c.bf16 %v4637_v14, %v4635_v29  ;;  %v4675_v29 = vld [vmem:[%s9446_s6 + $0x5c0] sm:$0xff]  ;;  %v4677_v14 = vld [vmem:[%s9446_s6 + $0x5d0] sm:$0xff] }
 0x64f   : > { %5612 = vmatprep.subr.bf16.mxu0 %v5611_v1  ;;  %v5655_v1 = vpack.c.bf16 %v4642_v33, %v4640_v32  ;;  %v4680_v32 = vld [vmem:[%s9446_s6 + $0x5e8] sm:$0xff]  ;;  %v4682_v33 = vld [vmem:[%s9446_s6 + $0x5f8] sm:$0xff] }
 0x652   : > { %5614 = vmatpush1.bf16.msra.mxu0 %v5613_v22  ;;  %v5657_v22 = vpack.c.bf16 %v4641_v38, %v4639_v37  ;;  %v4679_v37 = vld [vmem:[%s9446_s6 + $0x5e0] sm:$0xff]  ;;  %v4681_v38 = vld [vmem:[%s9446_s6 + $0x5f0] sm:$0xff] }
 0x653   : > { %5616 = vmatprep.subr.bf16.mxu0 %v5615_v20  ;;  %v5659_v20 = vpack.c.bf16 %v4646_v26, %v4644_v4  ;;  %v4686_v4 = vld [vmem:[%s9446_s6 + $0x608] sm:$0xff]  ;;  %v4688_v26 = vld [vmem:[%s9446_s6 + $0x618] sm:$0xff] }
 0x656   : > { %5618 = vmatpush1.bf16.msra.mxu0 %v5617_v53  ;;  %v5661_v53 = vpack.c.bf16 %v4645_v25, %v4643_v40  ;;  %v4685_v40 = vld [vmem:[%s9446_s6 + $0x600] sm:$0xff]  ;;  %v4687_v25 = vld [vmem:[%s9446_s6 + $0x610] sm:$0xff] }
 0x657   : > { %5620 = vmatprep.subr.bf16.mxu0 %v5619_v57  ;;  %v5663_v57 = vpack.c.bf16 %v4650_v60, %v4648_v42  ;;  %v4690_v42 = vld [vmem:[%s9446_s6 + $0x628] sm:$0xff]  ;;  %v4692_v60 = vld [vmem:[%s9446_s6 + $0x638] sm:$0xff] }
 0x65a   : > { %5622 = vmatpush1.bf16.msra.mxu0 %v5621_v44  ;;  %v5665_v44 = vpack.c.bf16 %v4649_v63, %v4647_v10  ;;  %v4689_v10 = vld [vmem:[%s9446_s6 + $0x620] sm:$0xff]  ;;  %v4691_v63 = vld [vmem:[%s9446_s6 + $0x630] sm:$0xff] }
 0x65b   : > { %5624 = vmatprep.subr.bf16.mxu0 %v5623_v45  ;;  %v5667_v45 = vpack.c.bf16 %v4654_v30, %v4652_v15  ;;  %v4694_v15 = vld [vmem:[%s9446_s6 + $0x648] sm:$0xff]  ;;  %v4696_v30 = vld [vmem:[%s9446_s6 + $0x658] sm:$0xff] }
 0x65e   : > { %5626 = vmatpush1.bf16.msra.mxu0 %v5625_v50  ;;  %v5669_v50 = vpack.c.bf16 %v4653_v48, %v4651_v46  ;;  %v4693_v46 = vld [vmem:[%s9446_s6 + $0x640] sm:$0xff]  ;;  %v4695_v48 = vld [vmem:[%s9446_s6 + $0x650] sm:$0xff] }
 0x65f   : > { %5628 = vmatprep.subr.bf16.mxu0 %v5627_v52  ;;  %v5671_v52 = vpack.c.bf16 %v4658_v49, %v4656_v41  ;;  %v4698_v41 = vld [vmem:[%s9446_s6 + $0x668] sm:$0xff] }
 0x662   : > { %5630 = vmatpush1.bf16.msra.mxu0 %v5629_v59  ;;  %v5673_v59 = vpack.c.bf16 %v4657_v54, %v4655_v36  ;;  %v4702_v36 = vld [vmem:[%s9446_s6 + $0x688] sm:$0xff]  ;;  %v4704_v54 = vld [vmem:[%s9446_s6 + $0x698] sm:$0xff] }
 0x663   : > { %5636 = vmatprep.subr.bf16.mxu0 %v5635_v11  ;;  %v5675_v11 = vpack.c.bf16 %v4662_v58, %v4660_v56  ;;  %v5719_v58 = vpack.c.bf16 %v4704_v54, %v4702_v36 }
 0x665   : > { %2783 = vmatmul.mubr.f32.vlgmr.msra.gmra.mrb[28].mxu0 %v8040_v27  ;;  %v4634_v27 = vld [vmem:[%s9446_s6 + $0x478] sm:$0xff] }
 0x666   : > { %5638 = vmatpush1.bf16.msra.mxu0 %v5637_v7  ;;  %2994 = vmatprep.mubr.f32.mxu0 %v8062_v5  ;;  %v5645_v5 = vpack.c.bf16 %v4629_v35, %v4627_v19  ;;  %v5647_v23 = vpack.c.bf16 %v4634_v27, %v4632_v47  ;;  %v5677_v7 = vpack.c.bf16 %v4661_v2, %v4659_v61  ;;  %v4667_v19 = vld [vmem:[%s9446_s6 + $0x580] sm:$0xff]  ;;  %v4669_v35 = vld [vmem:[%s9446_s6 + $0x590] sm:$0xff]  ;;  %v4672_v47 = vld [vmem:[%s9446_s6 + $0x5a8] sm:$0xff] }
 0x667   : > { %5640 = vmatprep.subr.bf16.mxu0 %v5639_v16  ;;  %v5679_v16 = vpack.c.bf16 %v4666_v3, %v4664_v21  ;;  %v4674_v27 = vld [vmem:[%s9446_s6 + $0x5b8] sm:$0xff]  ;;  %v4706_v61 = vld [vmem:[%s9446_s6 + $0x6a8] sm:$0xff] }
 0x668   : > { %v4708_v2 = vld [vmem:[%s9446_s6 + $0x6b8] sm:$0xff] }
 0x669   : > { %v5723_v3 = vpack.c.bf16 %v4708_v2, %v4706_v61 }
 0x66a   : > { %5642 = vmatpush1.bf16.msra.mxu0 %v5641_v17  ;;  %v5681_v17 = vpack.c.bf16 %v4665_v9, %v4663_v31  ;;  %v4710_v31 = vld [vmem:[%s9446_s6 + $0x6c8] sm:$0xff]  ;;  %v4712_v9 = vld [vmem:[%s9446_s6 + $0x6d8] sm:$0xff] }
 0x66b   : > { %5644 = vmatprep.subr.bf16.mxu0 %v5643_v18  ;;  %v5683_v18 = vpack.c.bf16 %v4670_v13, %v4668_v12  ;;  %v5727_v13 = vpack.c.bf16 %v4712_v9, %v4710_v31 }
 0x66e   : > { %5646 = vmatpush1.bf16.msra.mxu0 %v5645_v5  ;;  %v5685_v5 = vpack.c.bf16 %v4669_v35, %v4667_v19  ;;  %v4714_v19 = vld [vmem:[%s9446_s6 + $0x6e8] sm:$0xff]  ;;  %v4716_v35 = vld [vmem:[%s9446_s6 + $0x6f8] sm:$0xff] }
 0x66f   : > { %5648 = vmatprep.subr.bf16.mxu0 %v5647_v23  ;;  %v5687_v23 = vpack.c.bf16 %v4674_v27, %v4672_v47  ;;  %v5731_v27 = vpack.c.bf16 %v4716_v35, %v4714_v19 }
 0x672   : > { %5650 = vmatpush1.bf16.msra.mxu0 %v5649_v43  ;;  %v5689_v43 = vpack.c.bf16 %v4673_v39, %v4671_v62  ;;  %v4718_v62 = vld [vmem:[%s9446_s6 + $0x708] sm:$0xff]  ;;  %v4720_v39 = vld [vmem:[%s9446_s6 + $0x718] sm:$0xff] }
 0x673   : > { %5652 = vmatprep.subr.bf16.mxu0 %v5651_v55  ;;  %v5691_v55 = vpack.c.bf16 %v4678_v28, %v4676_v24  ;;  %v5735_v28 = vpack.c.bf16 %v4720_v39, %v4718_v62  ;;  %v4750_v62 = vld [vmem:[%s9447_s7 + $0x4] sm:$0xf] }
 0x676   : > { %5654 = vmatpush1.bf16.msra.mxu0 %v5653_v51  ;;  %v5693_v51 = vpack.c.bf16 %v4677_v14, %v4675_v29  ;;  %v4722_v29 = vld [vmem:[%s9446_s6 + $0x728] sm:$0xff]  ;;  %v4724_v14 = vld [vmem:[%s9446_s6 + $0x738] sm:$0xff] }
 0x677   : > { %5656 = vmatprep.subr.bf16.mxu0 %v5655_v1  ;;  %v5695_v1 = vpack.c.bf16 %v4682_v33, %v4680_v32  ;;  %v5739_v33 = vpack.c.bf16 %v4724_v14, %v4722_v29  ;;  %v4763_v29 = vld [vmem:[%s9448_s8 + $0x258] sm:$0xff] }
 0x67a   : > { %5658 = vmatpush1.bf16.msra.mxu0 %v5657_v22  ;;  %v5697_v22 = vpack.c.bf16 %v4681_v38, %v4679_v37  ;;  %v4726_v37 = vld [vmem:[%s9446_s6 + $0x748] sm:$0xff]  ;;  %v4728_v38 = vld [vmem:[%s9446_s6 + $0x758] sm:$0xff] }
 0x67b   : > { %5660 = vmatprep.subr.bf16.mxu0 %v5659_v20  ;;  %v5703_v20 = vpack.c.bf16 %v4688_v26, %v4686_v4  ;;  %v5743_v26 = vpack.c.bf16 %v4728_v38, %v4726_v37  ;;  %v4767_v37 = vld [vmem:[%s9448_s8 + $0x278] sm:$0xff] }
 0x67e   : > { %5662 = vmatpush1.bf16.msra.mxu0 %v5661_v53  ;;  %v5705_v53 = vpack.c.bf16 %v4687_v25, %v4685_v40  ;;  %v4730_v40 = vld [vmem:[%s9446_s6 + $0x768] sm:$0xff]  ;;  %v4732_v25 = vld [vmem:[%s9446_s6 + $0x778] sm:$0xff] }
 0x67f   : > { %5664 = vmatprep.subr.bf16.mxu0 %v5663_v57  ;;  %v5707_v57 = vpack.c.bf16 %v4692_v60, %v4690_v42  ;;  %v5747_v60 = vpack.c.bf16 %v4732_v25, %v4730_v40  ;;  %v4771_v40 = vld [vmem:[%s9448_s8 + $0x298] sm:$0xff] }
 0x682   : > { %5666 = vmatpush1.bf16.msra.mxu0 %v5665_v44  ;;  %v5709_v44 = vpack.c.bf16 %v4691_v63, %v4689_v10  ;;  %v4734_v10 = vld [vmem:[%s9446_s6 + $0x788] sm:$0xff]  ;;  %v4736_v63 = vld [vmem:[%s9446_s6 + $0x798] sm:$0xff] }
 0x683   : > { %5668 = vmatprep.subr.bf16.mxu0 %v5667_v45  ;;  %v5711_v45 = vpack.c.bf16 %v4696_v30, %v4694_v15  ;;  %v5751_v30 = vpack.c.bf16 %v4736_v63, %v4734_v10  ;;  %v4775_v10 = vld [vmem:[%s9448_s8 + $0x2b8] sm:$0xff] }
 0x686   : > { %5670 = vmatpush1.bf16.msra.mxu0 %v5669_v50  ;;  %v4697_v50 = vld [vmem:[%s9446_s6 + $0x660] sm:$0xff] }
 0x687   : > { %5672 = vmatprep.subr.bf16.mxu0 %v5671_v52  ;;  %v4699_v52 = vld [vmem:[%s9446_s6 + $0x670] sm:$0xff] }
 0x688   : > { %v5717_v56 = vpack.c.bf16 %v4699_v52, %v4697_v50  ;;  %v4742_v50 = vld [vmem:[%s9446_s6 + $0x7c8] sm:$0xff]  ;;  %v4744_v52 = vld [vmem:[%s9446_s6 + $0x7d8] sm:$0xff] }
 0x689   : > { %v5759_v54 = vpack.c.bf16 %v4744_v52, %v4742_v50  ;;  %v4783_v50 = vld [vmem:[%s9448_s8 + $0x2f8] sm:$0xff] }
 0x68a   : > { %5674 = vmatpush1.bf16.msra.mxu0 %v5673_v59  ;;  %v4701_v59 = vld [vmem:[%s9446_s6 + $0x680] sm:$0xff] }
 0x68b   : > { %5676 = vmatprep.subr.bf16.mxu0 %v5675_v11  ;;  %v4703_v11 = vld [vmem:[%s9446_s6 + $0x690] sm:$0xff] }
 0x68c   : > { %v5721_v21 = vpack.c.bf16 %v4703_v11, %v4701_v59  ;;  %v4746_v59 = vld [vmem:[%s9446_s6 + $0x7e8] sm:$0xff]  ;;  %v4748_v11 = vld [vmem:[%s9446_s6 + $0x7f8] sm:$0xff] }
 0x68d   : > { %v5763_v2 = vpack.c.bf16 %v4748_v11, %v4746_v59  ;;  %v4787_v59 = vld [vmem:[%s9448_s8 + $0x318] sm:$0xff] }
 0x68e   : > { %5678 = vmatpush1.bf16.msra.mxu0 %v5677_v7  ;;  %v4705_v7 = vld [vmem:[%s9446_s6 + $0x6a0] sm:$0xff] }
 0x68f   : > { %5680 = vmatprep.subr.bf16.mxu0 %v5679_v16  ;;  %v4707_v16 = vld [vmem:[%s9446_s6 + $0x6b0] sm:$0xff] }
 0x690   : > { %v5725_v12 = vpack.c.bf16 %v4707_v16, %v4705_v7 }
 0x692   : > { %5682 = vmatpush1.bf16.msra.mxu0 %v5681_v17  ;;  %v4709_v17 = vld [vmem:[%s9446_s6 + $0x6c0] sm:$0xff] }
 0x693   : > { %5684 = vmatprep.subr.bf16.mxu0 %v5683_v18  ;;  %v4711_v18 = vld [vmem:[%s9446_s6 + $0x6d0] sm:$0xff] }
 0x694   : > { %v5729_v47 = vpack.c.bf16 %v4711_v18, %v4709_v17  ;;  %v4755_v17 = vld [vmem:[%s9448_s8 + $0x218] sm:$0xff] }
 0x696   : > { %5686 = vmatpush1.bf16.msra.mxu0 %v5685_v5  ;;  %v4713_v5 = vld [vmem:[%s9446_s6 + $0x6e0] sm:$0xff] }
 0x697   : > { %5688 = vmatprep.subr.bf16.mxu0 %v5687_v23  ;;  %v4715_v23 = vld [vmem:[%s9446_s6 + $0x6f0] sm:$0xff] }
 0x698   : > { %v5733_v24 = vpack.c.bf16 %v4715_v23, %v4713_v5  ;;  %v4757_v5 = vld [vmem:[%s9448_s8 + $0x228] sm:$0xff]  ;;  %v4759_v23 = vld [vmem:[%s9448_s8 + $0x238] sm:$0xff] }
 0x69a   : > { %5690 = vmatpush1.bf16.msra.mxu0 %v5689_v43  ;;  %v4717_v43 = vld [vmem:[%s9446_s6 + $0x700] sm:$0xff] }
 0x69b   : > { %5692 = vmatprep.subr.bf16.mxu0 %v5691_v55  ;;  %v4719_v55 = vld [vmem:[%s9446_s6 + $0x710] sm:$0xff] }
 0x69c   : > { %v5737_v32 = vpack.c.bf16 %v4719_v55, %v4717_v43  ;;  %v4758_v43 = vld [vmem:[%s9448_s8 + $0x230] sm:$0xff]  ;;  %v4761_v55 = vld [vmem:[%s9448_s8 + $0x248] sm:$0xff] }
 0x69e   : > { %5694 = vmatpush1.bf16.msra.mxu0 %v5693_v51  ;;  %v4721_v51 = vld [vmem:[%s9446_s6 + $0x720] sm:$0xff] }
 0x69f   : > { %5696 = vmatprep.subr.bf16.mxu0 %v5695_v1  ;;  %v4723_v1 = vld [vmem:[%s9446_s6 + $0x730] sm:$0xff] }
 0x6a0   : > { %v5741_v4 = vpack.c.bf16 %v4723_v1, %v4721_v51  ;;  %v4762_v51 = vld [vmem:[%s9448_s8 + $0x250] sm:$0xff]  ;;  %v4765_v1 = vld [vmem:[%s9448_s8 + $0x268] sm:$0xff] }
 0x6a2   : > { %5698 = vmatpush1.bf16.msra.mxu0 %v5697_v22  ;;  %v4725_v22 = vld [vmem:[%s9446_s6 + $0x740] sm:$0xff] }
 0x6a3   : > { %5704 = vmatprep.subr.bf16.mxu0 %v5703_v20  ;;  %v4727_v20 = vld [vmem:[%s9446_s6 + $0x750] sm:$0xff] }
 0x6a4   : > { %v5745_v42 = vpack.c.bf16 %v4727_v20, %v4725_v22  ;;  %v4766_v22 = vld [vmem:[%s9448_s8 + $0x270] sm:$0xff]  ;;  %v4769_v20 = vld [vmem:[%s9448_s8 + $0x288] sm:$0xff] }
 0x6a5   : > { %2995 = vmatmul.mubr.f32.vlgmr.msra.gmra.mrb[28].mxu0 %v8054_v34  ;;  %v4700_v34 = vld [vmem:[%s9446_s6 + $0x678] sm:$0xff] }
 0x6a6   : > { %5706 = vmatpush1.bf16.msra.mxu0 %v5705_v53  ;;  %3208 = vmatprep.mubr.f32.mxu0 %v8252_v8  ;;  %v5713_v8 = vpack.c.bf16 %v4695_v48, %v4693_v46  ;;  %v5715_v49 = vpack.c.bf16 %v4700_v34, %v4698_v41  ;;  %v4729_v53 = vld [vmem:[%s9446_s6 + $0x760] sm:$0xff]  ;;  %v4738_v46 = vld [vmem:[%s9446_s6 + $0x7a8] sm:$0xff]  ;;  %v4740_v48 = vld [vmem:[%s9446_s6 + $0x7b8] sm:$0xff] }
 0x6a7   : > { %5708 = vmatprep.subr.bf16.mxu0 %v5707_v57  ;;  %v4731_v57 = vld [vmem:[%s9446_s6 + $0x770] sm:$0xff]  ;;  %v5755_v34 = vpack.c.bf16 %v4740_v48, %v4738_v46  ;;  %v4779_v46 = vld [vmem:[%s9448_s8 + $0x2d8] sm:$0xff] }
 0x6a8   : > { %v5749_v15 = vpack.c.bf16 %v4731_v57, %v4729_v53  ;;  %v4770_v53 = vld [vmem:[%s9448_s8 + $0x290] sm:$0xff]  ;;  %v4773_v57 = vld [vmem:[%s9448_s8 + $0x2a8] sm:$0xff] }
 0x6aa   : > { %5710 = vmatpush1.bf16.msra.mxu0 %v5709_v44  ;;  %v4733_v44 = vld [vmem:[%s9446_s6 + $0x780] sm:$0xff] }
 0x6ab   : > { %5712 = vmatprep.subr.bf16.mxu0 %v5711_v45  ;;  %v4735_v45 = vld [vmem:[%s9446_s6 + $0x790] sm:$0xff] }
 0x6ac   : > { %v5753_v41 = vpack.c.bf16 %v4735_v45, %v4733_v44  ;;  %v4774_v44 = vld [vmem:[%s9448_s8 + $0x2b0] sm:$0xff]  ;;  %v4777_v45 = vld [vmem:[%s9448_s8 + $0x2c8] sm:$0xff] }
 0x6ae   : > { %5714 = vmatpush1.bf16.msra.mxu0 %v5713_v8  ;;  %v4737_v8 = vld [vmem:[%s9446_s6 + $0x7a0] sm:$0xff] }
 0x6af   : > { %5716 = vmatprep.subr.bf16.mxu0 %v5715_v49  ;;  %v4739_v49 = vld [vmem:[%s9446_s6 + $0x7b0] sm:$0xff] }
 0x6b0   : > { %v5757_v36 = vpack.c.bf16 %v4739_v49, %v4737_v8  ;;  %v4778_v8 = vld [vmem:[%s9448_s8 + $0x2d0] sm:$0xff]  ;;  %v4781_v49 = vld [vmem:[%s9448_s8 + $0x2e8] sm:$0xff] }
 0x6b2   : > { %5718 = vmatpush1.bf16.msra.mxu0 %v5717_v56  ;;  %v4741_v56 = vld [vmem:[%s9446_s6 + $0x7c0] sm:$0xff] }
 0x6b3   : > { %5720 = vmatprep.subr.bf16.mxu0 %v5719_v58  ;;  %v4743_v58 = vld [vmem:[%s9446_s6 + $0x7d0] sm:$0xff] }
 0x6b4   : > { %v5761_v61 = vpack.c.bf16 %v4743_v58, %v4741_v56  ;;  %v4782_v56 = vld [vmem:[%s9448_s8 + $0x2f0] sm:$0xff]  ;;  %v4785_v58 = vld [vmem:[%s9448_s8 + $0x308] sm:$0xff] }
 0x6b6   : > { %5722 = vmatpush1.bf16.msra.mxu0 %v5721_v21  ;;  %v4745_v21 = vld [vmem:[%s9446_s6 + $0x7e0] sm:$0xff] }
 0x6b7   : > { %5724 = vmatprep.subr.bf16.mxu0 %v5723_v3  ;;  %v4747_v3 = vld [vmem:[%s9446_s6 + $0x7f0] sm:$0xff] }
 0x6b8   : > { %v5765_v7 = vpack.c.bf16 %v4747_v3, %v4745_v21  ;;  %v4786_v21 = vld [vmem:[%s9448_s8 + $0x310] sm:$0xff]  ;;  %v4789_v3 = vld [vmem:[%s9448_s8 + $0x328] sm:$0xff] }
 0x6ba   : > { %5726 = vmatpush1.bf16.msra.mxu0 %v5725_v12 }
 0x6bb   : > { %5728 = vmatprep.subr.bf16.mxu0 %v5727_v13  ;;  %v4753_v13 = vld [vmem:[%s9448_s8 + $0x208] sm:$0xff] }
 0x6bc   : > { %v5767_v35 = vpack.c.bf16 %v4755_v17, %v4753_v13  ;;  %v4793_v13 = vld [vmem:[%s9448_s8 + $0x348] sm:$0xff]  ;;  %v4795_v17 = vld [vmem:[%s9448_s8 + $0x358] sm:$0xff] }
 0x6be   : > { %5730 = vmatpush1.bf16.msra.mxu0 %v5729_v47  ;;  %v4752_v47 = vld [vmem:[%s9448_s8 + $0x200] sm:$0xff] }
 0x6bf   : > { %5732 = vmatprep.subr.bf16.mxu0 %v5731_v27  ;;  %v4754_v27 = vld [vmem:[%s9448_s8 + $0x210] sm:$0xff] }
 0x6c0   : > { %v5769_v39 = vpack.c.bf16 %v4754_v27, %v4752_v47  ;;  %v4792_v47 = vld [vmem:[%s9448_s8 + $0x340] sm:$0xff]  ;;  %v4794_v27 = vld [vmem:[%s9448_s8 + $0x350] sm:$0xff] }
 0x6c2   : > { %5734 = vmatpush1.bf16.msra.mxu0 %v5733_v24  ;;  %v5771_v24 = vpack.c.bf16 %v4759_v23, %v4757_v5  ;;  %v4797_v5 = vld [vmem:[%s9448_s8 + $0x368] sm:$0xff]  ;;  %v4799_v23 = vld [vmem:[%s9448_s8 + $0x378] sm:$0xff] }
 0x6c3   : > { %5736 = vmatprep.subr.bf16.mxu0 %v5735_v28  ;;  %v4756_v28 = vld [vmem:[%s9448_s8 + $0x220] sm:$0xff] }
 0x6c4   : > { %v5773_v14 = vpack.c.bf16 %v4758_v43, %v4756_v28  ;;  %v4798_v28 = vld [vmem:[%s9448_s8 + $0x370] sm:$0xff]  ;;  %v4801_v43 = vld [vmem:[%s9448_s8 + $0x388] sm:$0xff] }
 0x6c6   : > { %5738 = vmatpush1.bf16.msra.mxu0 %v5737_v32  ;;  %v5775_v32 = vpack.c.bf16 %v4763_v29, %v4761_v55  ;;  %v4803_v55 = vld [vmem:[%s9448_s8 + $0x398] sm:$0xff] }
 0x6c7   : > { %5740 = vmatprep.subr.bf16.mxu0 %v5739_v33  ;;  %v4760_v33 = vld [vmem:[%s9448_s8 + $0x240] sm:$0xff] }
 0x6c8   : > { %v5777_v38 = vpack.c.bf16 %v4762_v51, %v4760_v33  ;;  %v4802_v33 = vld [vmem:[%s9448_s8 + $0x390] sm:$0xff]  ;;  %v4805_v51 = vld [vmem:[%s9448_s8 + $0x3a8] sm:$0xff] }
 0x6ca   : > { %5742 = vmatpush1.bf16.msra.mxu0 %v5741_v4  ;;  %v5779_v4 = vpack.c.bf16 %v4767_v37, %v4765_v1  ;;  %v4807_v1 = vld [vmem:[%s9448_s8 + $0x3b8] sm:$0xff] }
 0x6cb   : > { %5744 = vmatprep.subr.bf16.mxu0 %v5743_v26  ;;  %v4764_v26 = vld [vmem:[%s9448_s8 + $0x260] sm:$0xff] }
 0x6cc   : > { %v5781_v25 = vpack.c.bf16 %v4766_v22, %v4764_v26  ;;  %v4806_v26 = vld [vmem:[%s9448_s8 + $0x3b0] sm:$0xff]  ;;  %v4809_v22 = vld [vmem:[%s9448_s8 + $0x3c8] sm:$0xff] }
 0x6ce   : > { %5746 = vmatpush1.bf16.msra.mxu0 %v5745_v42  ;;  %v5783_v42 = vpack.c.bf16 %v4771_v40, %v4769_v20  ;;  %v4811_v20 = vld [vmem:[%s9448_s8 + $0x3d8] sm:$0xff] }
 0x6cf   : > { %5748 = vmatprep.subr.bf16.mxu0 %v5747_v60  ;;  %v4768_v60 = vld [vmem:[%s9448_s8 + $0x280] sm:$0xff] }
 0x6d0   : > { %v5785_v63 = vpack.c.bf16 %v4770_v53, %v4768_v60  ;;  %v4810_v60 = vld [vmem:[%s9448_s8 + $0x3d0] sm:$0xff] }
 0x6d2   : > { %5750 = vmatpush1.bf16.msra.mxu0 %v5749_v15  ;;  %v5787_v15 = vpack.c.bf16 %v4775_v10, %v4773_v57  ;;  %v4813_v57 = vld [vmem:[%s9448_s8 + $0x3e8] sm:$0xff]  ;;  %v4815_v10 = vld [vmem:[%s9448_s8 + $0x3f8] sm:$0xff] }
 0x6d3   : > { %5752 = vmatprep.subr.bf16.mxu0 %v5751_v30  ;;  %v4772_v30 = vld [vmem:[%s9448_s8 + $0x2a0] sm:$0xff] }
 0x6d4   : > { %v5789_v48 = vpack.c.bf16 %v4774_v44, %v4772_v30  ;;  %v4814_v30 = vld [vmem:[%s9448_s8 + $0x3f0] sm:$0xff] }
 0x6d6   : > { %5754 = vmatpush1.bf16.msra.mxu0 %v5753_v41  ;;  %v5791_v41 = vpack.c.bf16 %v4779_v46, %v4777_v45  ;;  %v3300_v45 = vld [vmem:[%s9448_s8 + $0x8] sm:$0xff]  ;;  %v3302_v46 = vld [vmem:[%s9448_s8 + $0x18] sm:$0xff] }
 0x6d7   : > { %5756 = vmatprep.subr.bf16.mxu0 %v5755_v34  ;;  %v4776_v34 = vld [vmem:[%s9448_s8 + $0x2c0] sm:$0xff] }
 0x6d8   : > { %v5793_v52 = vpack.c.bf16 %v4778_v8, %v4776_v34 }
 0x6da   : > { %5758 = vmatpush1.bf16.msra.mxu0 %v5757_v36  ;;  %v5795_v36 = vpack.c.bf16 %v4783_v50, %v4781_v49  ;;  %v3299_v49 = vld [vmem:[%s9448_s8] sm:$0xff]  ;;  %v3301_v50 = vld [vmem:[%s9448_s8 + $0x10] sm:$0xff] }
 0x6db   : > { %5760 = vmatprep.subr.bf16.mxu0 %v5759_v54  ;;  %v4780_v54 = vld [vmem:[%s9448_s8 + $0x2e0] sm:$0xff] }
 0x6dc   : > { %v5797_v11 = vpack.c.bf16 %v4782_v56, %v4780_v54  ;;  %v5833_v56 = vpack.c.bf16 %v3301_v50, %v3299_v49 }
 0x6de   : > { %5762 = vmatpush1.bf16.msra.mxu0 %v5761_v61  ;;  %v5799_v61 = vpack.c.bf16 %v4787_v59, %v4785_v58 }
 0x6df   : > { %5764 = vmatprep.subr.bf16.mxu0 %v5763_v2  ;;  %v4784_v2 = vld [vmem:[%s9448_s8 + $0x300] sm:$0xff] }
 0x6e2   : > { %5766 = vmatpush1.bf16.msra.mxu0 %v5765_v7  ;;  %v4791_v7 = vld [vmem:[%s9448_s8 + $0x338] sm:$0xff] }
 0x6e5   : > { %3209 = vmatmul.mubr.f32.vlgmr.msra.gmra.mrb[28].mxu0 %v8244_v6  ;;  %v3223_v6 = vld [vmem:[%s9447_s7] sm:$0xf] }
 0x6e6   : > { %3929 = vmatprep.mubr.f32.mxu0 %v6091_v0 }
 0x7b8   : > { %v3210_v16 = vpop.f32.mrb[28].mxu0 }
 0x7b9   : > { %v3219_v31 = vmul.f32 0.2, %v3210_v16  ;;  %v3212_v9 = vpop.f32.mrb[29].mxu0  ;;  %vm3217_vm15 = vcmp.ge.f32.partialorder %v3210_v16, 0.0 }
 0x7ba   : > { %vm3218_vm0 = vcmp.ge.f32.partialorder %v3212_v9, 0.0  ;;  %v3220_v12 = vmul.f32 0.2, %v3212_v9 }
 0x7bb   : > { %v8639_v19 = vsel %vm3217_vm15, %v3210_v16, %v3219_v31  ;;  %v5801_v16 = vpack.c.bf16 %v4786_v21, %v4784_v2  ;;  %v5803_v31 = vpack.c.bf16 %v4791_v7, %v4789_v3  ;;  %v3308_v2 = vld [vmem:[%s9448_s8 + $0x48] sm:$0xff]  ;;  %v3310_v21 = vld [vmem:[%s9448_s8 + $0x58] sm:$0xff] }
 0x7bc   : > { %v8632_v18 = vsel %vm3218_vm0, %v3212_v9, %v3220_v12  ;;  %v4788_v9 = vld [vmem:[%s9448_s8 + $0x320] sm:$0xff]  ;;  %v4790_v12 = vld [vmem:[%s9448_s8 + $0x330] sm:$0xff]  ;;  %v5839_v7 = vpack.c.bf16 %v3310_v21, %v3308_v2  ;;  %v3348_v2 = vld [vmem:[%s9448_s8 + $0x188] sm:$0xff] }
 0x7bd   : > { %3228 = vmatprep.subr.mxu1 %v8632_v18  ;;  %3865 = vmatprep.subr.mxu0 %v8632_v18  ;;  %v3350_v21 = vld [vmem:[%s9448_s8 + $0x198] sm:$0xff] }
 0x7be   : > { %3229 = vmatpush1.msra.mxu1 %v8639_v19  ;;  %3866 = vmatpush1.msra.mxu0 %v8639_v19 }
 0x7bf   : > { %4749 = vmatmul.mubr.msk.f32.vlgmr.msra.gmra.mrb[44].mxu1 %vm3224_vm1, %v3223_v6  ;;  %3368 = vmatprep.subr.mxu1 %v8632_v18  ;;  %v5805_v6 = vpack.c.bf16 %v4790_v12, %v4788_v9  ;;  %v3312_v9 = vld [vmem:[%s9448_s8 + $0x68] sm:$0xff]  ;;  %v3314_v12 = vld [vmem:[%s9448_s8 + $0x78] sm:$0xff] }
 0x7c0   : > { %3369 = vmatpush1.msra.mxu1 %v8639_v19  ;;  %3432 = vmatprep.mubr.f32.mxu1 %v6091_v0 }
 0x7c1   : > { %5768 = vmatprep.subr.bf16.mxu1 %v5767_v35  ;;  %v5807_v35 = vpack.c.bf16 %v4795_v17, %v4793_v13  ;;  %v5843_v17 = vpack.c.bf16 %v3314_v12, %v3312_v9  ;;  %v3352_v9 = vld [vmem:[%s9448_s8 + $0x1a8] sm:$0xff]  ;;  %v3354_v12 = vld [vmem:[%s9448_s8 + $0x1b8] sm:$0xff] }
 0x7c3   : > { %4751 = vmatmul.mubr.msk.f32.vlgmr.msra.gmra.mrb[46].mxu1 %vm3224_vm1, %v4750_v62  ;;  %v5809_v62 = vpack.c.bf16 %v4794_v27, %v4792_v47  ;;  %v3316_v47 = vld [vmem:[%s9448_s8 + $0x88] sm:$0xff]  ;;  %v3318_v27 = vld [vmem:[%s9448_s8 + $0x98] sm:$0xff] }
 0x7c4   : > { %5770 = vmatpush1.bf16.msra.mxu1 %v5769_v39  ;;  %v5811_v39 = vpack.c.bf16 %v4799_v23, %v4797_v5  ;;  %v5847_v23 = vpack.c.bf16 %v3318_v27, %v3316_v47  ;;  %v3356_v47 = vld [vmem:[%s9448_s8 + $0x1c8] sm:$0xff]  ;;  %v3358_v27 = vld [vmem:[%s9448_s8 + $0x1d8] sm:$0xff] }
 0x7c5   : > { %5772 = vmatprep.subr.bf16.mxu1 %v5771_v24  ;;  %v4796_v24 = vld [vmem:[%s9448_s8 + $0x360] sm:$0xff] }
 0x7c6   : > { %v5813_v29 = vpack.c.bf16 %v4798_v28, %v4796_v24  ;;  %v3320_v24 = vld [vmem:[%s9448_s8 + $0xa8] sm:$0xff]  ;;  %v3322_v28 = vld [vmem:[%s9448_s8 + $0xb8] sm:$0xff] }
 0x7c8   : > { %5774 = vmatpush1.bf16.msra.mxu1 %v5773_v14  ;;  %v5815_v14 = vpack.c.bf16 %v4803_v55, %v4801_v43  ;;  %v5851_v55 = vpack.c.bf16 %v3322_v28, %v3320_v24  ;;  %v3360_v24 = vld [vmem:[%s9448_s8 + $0x1e8] sm:$0xff]  ;;  %v3362_v28 = vld [vmem:[%s9448_s8 + $0x1f8] sm:$0xff] }
 0x7c9   : > { %5776 = vmatprep.subr.bf16.mxu1 %v5775_v32  ;;  %v4800_v32 = vld [vmem:[%s9448_s8 + $0x380] sm:$0xff] }
 0x7ca   : > { %v5817_v37 = vpack.c.bf16 %v4802_v33, %v4800_v32  ;;  %v3324_v32 = vld [vmem:[%s9448_s8 + $0xc8] sm:$0xff]  ;;  %v3326_v33 = vld [vmem:[%s9448_s8 + $0xd8] sm:$0xff] }
 0x7cc   : > { %5778 = vmatpush1.bf16.msra.mxu1 %v5777_v38  ;;  %v5819_v38 = vpack.c.bf16 %v4807_v1, %v4805_v51  ;;  %v5855_v1 = vpack.c.bf16 %v3326_v33, %v3324_v32  ;;  %v4819_v33 = vld [vmem:[%s9448_s8 + $0x408] sm:$0xff] }
 0x7cd   : > { %5780 = vmatprep.subr.bf16.mxu1 %v5779_v4  ;;  %v4804_v4 = vld [vmem:[%s9448_s8 + $0x3a0] sm:$0xff] }
 0x7ce   : > { %v5821_v40 = vpack.c.bf16 %v4806_v26, %v4804_v4  ;;  %v3328_v4 = vld [vmem:[%s9448_s8 + $0xe8] sm:$0xff]  ;;  %v3330_v26 = vld [vmem:[%s9448_s8 + $0xf8] sm:$0xff] }
 0x7d0   : > { %5782 = vmatpush1.bf16.msra.mxu1 %v5781_v25  ;;  %v5823_v25 = vpack.c.bf16 %v4811_v20, %v4809_v22  ;;  %v5859_v20 = vpack.c.bf16 %v3330_v26, %v3328_v4  ;;  %v4823_v4 = vld [vmem:[%s9448_s8 + $0x428] sm:$0xff]  ;;  %v4825_v26 = vld [vmem:[%s9448_s8 + $0x438] sm:$0xff] }
 0x7d1   : > { %5784 = vmatprep.subr.bf16.mxu1 %v5783_v42  ;;  %v4808_v42 = vld [vmem:[%s9448_s8 + $0x3c0] sm:$0xff] }
 0x7d2   : > { %v5825_v53 = vpack.c.bf16 %v4810_v60, %v4808_v42  ;;  %v3332_v42 = vld [vmem:[%s9448_s8 + $0x108] sm:$0xff]  ;;  %v3334_v60 = vld [vmem:[%s9448_s8 + $0x118] sm:$0xff] }
 0x7d4   : > { %5786 = vmatpush1.bf16.msra.mxu1 %v5785_v63  ;;  %v5827_v63 = vpack.c.bf16 %v4815_v10, %v4813_v57  ;;  %v5863_v57 = vpack.c.bf16 %v3334_v60, %v3332_v42  ;;  %v3331_v10 = vld [vmem:[%s9448_s8 + $0x100] sm:$0xff] }
 0x7d5   : > { %5788 = vmatprep.subr.bf16.mxu1 %v5787_v15  ;;  %v4812_v15 = vld [vmem:[%s9448_s8 + $0x3e0] sm:$0xff] }
 0x7d6   : > { %v5829_v44 = vpack.c.bf16 %v4814_v30, %v4812_v15  ;;  %v3336_v15 = vld [vmem:[%s9448_s8 + $0x128] sm:$0xff]  ;;  %v3338_v30 = vld [vmem:[%s9448_s8 + $0x138] sm:$0xff]  ;;  %v4826_v60 = vld [vmem:[%s9448_s8 + $0x440] sm:$0xff] }
 0x7d8   : > { %5790 = vmatpush1.bf16.msra.mxu1 %v5789_v48  ;;  %v5831_v48 = vpack.c.bf16 %v3302_v46, %v3300_v45  ;;  %v5867_v45 = vpack.c.bf16 %v3338_v30, %v3336_v15  ;;  %v3335_v46 = vld [vmem:[%s9448_s8 + $0x120] sm:$0xff] }
 0x7d9   : > { %5792 = vmatprep.subr.bf16.mxu1 %v5791_v41  ;;  %v4882_v41 = vld [vmem:[%s9447_s7 + $0xc] sm:$0xf]  ;;  %v4830_v30 = vld [vmem:[%s9448_s8 + $0x460] sm:$0xff] }
 0x7da   : > { %4883 = vmatmul.mubr.msk.f32.vlgmr.msra.gmra.mrb[30].mxu0 %vm3224_vm1, %v4882_v41  ;;  %v3340_v41 = vld [vmem:[%s9448_s8 + $0x148] sm:$0xff] }
 0x7dc   : > { %5794 = vmatpush1.bf16.msra.mxu1 %v5793_v52  ;;  %v3304_v52 = vld [vmem:[%s9448_s8 + $0x28] sm:$0xff] }
 0x7dd   : > { %5796 = vmatprep.subr.bf16.mxu1 %v5795_v36  ;;  %v3306_v36 = vld [vmem:[%s9448_s8 + $0x38] sm:$0xff] }
 0x7de   : > { %v5835_v59 = vpack.c.bf16 %v3306_v36, %v3304_v52  ;;  %v3339_v52 = vld [vmem:[%s9448_s8 + $0x140] sm:$0xff]  ;;  %v3341_v36 = vld [vmem:[%s9448_s8 + $0x150] sm:$0xff] }
 0x7e0   : > { %5798 = vmatpush1.bf16.msra.mxu1 %v5797_v11  ;;  %v3303_v11 = vld [vmem:[%s9448_s8 + $0x20] sm:$0xff] }
 0x7e1   : > { %5800 = vmatprep.subr.bf16.mxu1 %v5799_v61  ;;  %v3305_v61 = vld [vmem:[%s9448_s8 + $0x30] sm:$0xff] }
 0x7e2   : > { %v5837_v3 = vpack.c.bf16 %v3305_v61, %v3303_v11  ;;  %v3343_v11 = vld [vmem:[%s9448_s8 + $0x160] sm:$0xff]  ;;  %v3345_v61 = vld [vmem:[%s9448_s8 + $0x170] sm:$0xff] }
 0x7e4   : > { %5802 = vmatpush1.bf16.msra.mxu1 %v5801_v16  ;;  %v3307_v16 = vld [vmem:[%s9448_s8 + $0x40] sm:$0xff] }
 0x7e5   : > { %5804 = vmatprep.subr.bf16.mxu1 %v5803_v31  ;;  %v3309_v31 = vld [vmem:[%s9448_s8 + $0x50] sm:$0xff] }
 0x7e6   : > { %v5841_v13 = vpack.c.bf16 %v3309_v31, %v3307_v16  ;;  %v3347_v16 = vld [vmem:[%s9448_s8 + $0x180] sm:$0xff]  ;;  %v3349_v31 = vld [vmem:[%s9448_s8 + $0x190] sm:$0xff] }
 0x7e8   : > { %5806 = vmatpush1.bf16.msra.mxu1 %v5805_v6  ;;  %v3311_v6 = vld [vmem:[%s9448_s8 + $0x60] sm:$0xff] }
 0x7e9   : > { %5808 = vmatprep.subr.bf16.mxu1 %v5807_v35  ;;  %v3313_v35 = vld [vmem:[%s9448_s8 + $0x70] sm:$0xff] }
 0x7ea   : > { %v5845_v5 = vpack.c.bf16 %v3313_v35, %v3311_v6  ;;  %v3351_v6 = vld [vmem:[%s9448_s8 + $0x1a0] sm:$0xff]  ;;  %v3353_v35 = vld [vmem:[%s9448_s8 + $0x1b0] sm:$0xff] }
 0x7ec   : > { %5810 = vmatpush1.bf16.msra.mxu1 %v5809_v62  ;;  %v3315_v62 = vld [vmem:[%s9448_s8 + $0x80] sm:$0xff] }
 0x7ed   : > { %5812 = vmatprep.subr.bf16.mxu1 %v5811_v39  ;;  %v3317_v39 = vld [vmem:[%s9448_s8 + $0x90] sm:$0xff] }
 0x7ee   : > { %v5849_v43 = vpack.c.bf16 %v3317_v39, %v3315_v62  ;;  %v3355_v62 = vld [vmem:[%s9448_s8 + $0x1c0] sm:$0xff]  ;;  %v3357_v39 = vld [vmem:[%s9448_s8 + $0x1d0] sm:$0xff] }
 0x7f0   : > { %5814 = vmatpush1.bf16.msra.mxu1 %v5813_v29  ;;  %v3319_v29 = vld [vmem:[%s9448_s8 + $0xa0] sm:$0xff] }
 0x7f1   : > { %5816 = vmatprep.subr.bf16.mxu1 %v5815_v14  ;;  %v3321_v14 = vld [vmem:[%s9448_s8 + $0xb0] sm:$0xff] }
 0x7f2   : > { %v5853_v51 = vpack.c.bf16 %v3321_v14, %v3319_v29  ;;  %v3359_v29 = vld [vmem:[%s9448_s8 + $0x1e0] sm:$0xff]  ;;  %v3361_v14 = vld [vmem:[%s9448_s8 + $0x1f0] sm:$0xff] }
 0x7f3   : > { %v5893_v32 = vpack.c.bf16 %v3361_v14, %v3359_v29  ;;  %v4861_v29 = vld [vmem:[%s9448_s8 + $0x558] sm:$0xff] }
 0x7f4   : > { %5818 = vmatpush1.bf16.msra.mxu1 %v5817_v37  ;;  %v3323_v37 = vld [vmem:[%s9448_s8 + $0xc0] sm:$0xff] }
 0x7f5   : > { %5820 = vmatprep.subr.bf16.mxu1 %v5819_v38  ;;  %v3325_v38 = vld [vmem:[%s9448_s8 + $0xd0] sm:$0xff] }
 0x7f6   : > { %v5857_v22 = vpack.c.bf16 %v3325_v38, %v3323_v37  ;;  %v4818_v37 = vld [vmem:[%s9448_s8 + $0x400] sm:$0xff]  ;;  %v4820_v38 = vld [vmem:[%s9448_s8 + $0x410] sm:$0xff] }
 0x7f8   : > { %5822 = vmatpush1.bf16.msra.mxu1 %v5821_v40  ;;  %v3327_v40 = vld [vmem:[%s9448_s8 + $0xe0] sm:$0xff] }
 0x7f9   : > { %5824 = vmatprep.subr.bf16.mxu1 %v5823_v25  ;;  %v3329_v25 = vld [vmem:[%s9448_s8 + $0xf0] sm:$0xff] }
 0x7fc   : > { %5826 = vmatpush1.bf16.msra.mxu1 %v5825_v53  ;;  %v5861_v53 = vpack.c.bf16 %v3329_v25, %v3327_v40  ;;  %v4822_v40 = vld [vmem:[%s9448_s8 + $0x420] sm:$0xff]  ;;  %v4824_v25 = vld [vmem:[%s9448_s8 + $0x430] sm:$0xff] }
 0x7fd   : > { %5828 = vmatprep.subr.bf16.mxu1 %v5827_v63  ;;  %v3333_v63 = vld [vmem:[%s9448_s8 + $0x110] sm:$0xff] }
 0x800   : > { %5830 = vmatpush1.bf16.msra.mxu1 %v5829_v44  ;;  %v5865_v44 = vpack.c.bf16 %v3333_v63, %v3331_v10  ;;  %v4833_v10 = vld [vmem:[%s9448_s8 + $0x478] sm:$0xff] }
 0x801   : > { %5832 = vmatprep.subr.bf16.mxu1 %v5831_v48  ;;  %v3337_v48 = vld [vmem:[%s9448_s8 + $0x130] sm:$0xff] }
 0x802   : > { %v5869_v49 = vpack.c.bf16 %v3337_v48, %v3335_v46  ;;  %v4837_v46 = vld [vmem:[%s9448_s8 + $0x498] sm:$0xff] }
 0x892   : > { %v8847_v34 = vpop.f32.mrb[44].mxu1 }
 0x893   : > { %v3296_v8 = vpop.f32.mrb[45].mxu1 }
 0x896   : > { %v3434_v54 = vpop.f32.mrb[46].mxu1 }
 0x897   : > { %v3436_v58 = vpop.f32.mrb[47].mxu1 }
 0x898   : > { %3568 = vmatprep.mubr.f32.mxu1 %v3436_v58  ;;  %v5873_v58 = vpack.c.bf16 %v3341_v36, %v3339_v52  ;;  %v4841_v52 = vld [vmem:[%s9448_s8 + $0x4b8] sm:$0xff] }
 0x899   : > { %3569 = vmatmul.mubr.f32.vlgmr.msra.gmra.mrb[48].mxu1 %v3434_v54  ;;  %v3344_v54 = vld [vmem:[%s9448_s8 + $0x168] sm:$0xff] }
 0x89a   : > { %5834 = vmatpush1.bf16.msra.mxu1 %v5833_v56  ;;  %3639 = vmatprep.mubr.f32.mxu1 %v3296_v8  ;;  %v3342_v8 = vld [vmem:[%s9448_s8 + $0x158] sm:$0xff] }
 0x89b   : > { %5836 = vmatprep.subr.bf16.mxu1 %v5835_v59  ;;  %v5871_v50 = vpack.c.bf16 %v3342_v8, %v3340_v41  ;;  %v3346_v56 = vld [vmem:[%s9448_s8 + $0x178] sm:$0xff]  ;;  %v4834_v8 = vld [vmem:[%s9448_s8 + $0x480] sm:$0xff] }
 0x89c   : > { %v5875_v59 = vpack.c.bf16 %v3346_v56, %v3344_v54  ;;  %v4838_v56 = vld [vmem:[%s9448_s8 + $0x4a0] sm:$0xff] }
 0x89e   : > { %5838 = vmatpush1.bf16.msra.mxu1 %v5837_v3  ;;  %v5877_v3 = vpack.c.bf16 %v3345_v61, %v3343_v11  ;;  %v4845_v11 = vld [vmem:[%s9448_s8 + $0x4d8] sm:$0xff] }
 0x89f   : > { %5840 = vmatprep.subr.bf16.mxu1 %v5839_v7  ;;  %v5879_v7 = vpack.c.bf16 %v3350_v21, %v3348_v2  ;;  %v4842_v21 = vld [vmem:[%s9448_s8 + $0x4c0] sm:$0xff] }
 0x8a2   : > { %5842 = vmatpush1.bf16.msra.mxu1 %v5841_v13  ;;  %v5881_v13 = vpack.c.bf16 %v3349_v31, %v3347_v16  ;;  %v4849_v16 = vld [vmem:[%s9448_s8 + $0x4f8] sm:$0xff] }
 0x8a3   : > { %5844 = vmatprep.subr.bf16.mxu1 %v5843_v17  ;;  %v5883_v17 = vpack.c.bf16 %v3354_v12, %v3352_v9  ;;  %v4846_v12 = vld [vmem:[%s9448_s8 + $0x4e0] sm:$0xff] }
 0x8a6   : > { %5846 = vmatpush1.bf16.msra.mxu1 %v5845_v5  ;;  %v5885_v5 = vpack.c.bf16 %v3353_v35, %v3351_v6  ;;  %v4853_v6 = vld [vmem:[%s9448_s8 + $0x518] sm:$0xff] }
 0x8a7   : > { %5848 = vmatprep.subr.bf16.mxu1 %v5847_v23  ;;  %v5887_v23 = vpack.c.bf16 %v3358_v27, %v3356_v47  ;;  %v4850_v27 = vld [vmem:[%s9448_s8 + $0x500] sm:$0xff] }
 0x8aa   : > { %5850 = vmatpush1.bf16.msra.mxu1 %v5849_v43  ;;  %v5889_v43 = vpack.c.bf16 %v3357_v39, %v3355_v62  ;;  %v4857_v62 = vld [vmem:[%s9448_s8 + $0x538] sm:$0xff] }
 0x8ab   : > { %5852 = vmatprep.subr.bf16.mxu1 %v5851_v55  ;;  %v5891_v55 = vpack.c.bf16 %v3362_v28, %v3360_v24  ;;  %v4854_v28 = vld [vmem:[%s9448_s8 + $0x520] sm:$0xff] }
 0x8ae   : > { %5854 = vmatpush1.bf16.msra.mxu1 %v5853_v51  ;;  %v4821_v51 = vld [vmem:[%s9448_s8 + $0x418] sm:$0xff] }
 0x8af   : > { %5856 = vmatprep.subr.bf16.mxu1 %v5855_v1  ;;  %v5895_v1 = vpack.c.bf16 %v4821_v51, %v4819_v33  ;;  %v4858_v33 = vld [vmem:[%s9448_s8 + $0x540] sm:$0xff]  ;;  %v4860_v51 = vld [vmem:[%s9448_s8 + $0x550] sm:$0xff] }
 0x8b2   : > { %5858 = vmatpush1.bf16.msra.mxu1 %v5857_v22  ;;  %v5897_v22 = vpack.c.bf16 %v4820_v38, %v4818_v37  ;;  %v4865_v37 = vld [vmem:[%s9448_s8 + $0x578] sm:$0xff]  ;;  %v5937_v38 = vpack.c.bf16 %v4860_v51, %v4858_v33  ;;  %v4900_v33 = vld [vmem:[%s9448_s8 + $0x680] sm:$0xff]  ;;  %v4902_v51 = vld [vmem:[%s9448_s8 + $0x690] sm:$0xff] }
 0x8b3   : > { %5860 = vmatprep.subr.bf16.mxu1 %v5859_v20  ;;  %v5899_v20 = vpack.c.bf16 %v4825_v26, %v4823_v4  ;;  %v4862_v26 = vld [vmem:[%s9448_s8 + $0x560] sm:$0xff] }
 0x8b6   : > { %5862 = vmatpush1.bf16.msra.mxu1 %v5861_v53  ;;  %v4828_v53 = vld [vmem:[%s9448_s8 + $0x450] sm:$0xff] }
 0x8b7   : > { %5864 = vmatprep.subr.bf16.mxu1 %v5863_v57  ;;  %v4831_v57 = vld [vmem:[%s9448_s8 + $0x468] sm:$0xff]  ;;  %v5905_v63 = vpack.c.bf16 %v4828_v53, %v4826_v60 }
 0x8b8   : > { %v5907_v15 = vpack.c.bf16 %v4833_v10, %v4831_v57  ;;  %v4870_v57 = vld [vmem:[%s9448_s8 + $0x5a0] sm:$0xff]  ;;  %v4872_v10 = vld [vmem:[%s9448_s8 + $0x5b0] sm:$0xff] }
 0x8ba   : > { %5866 = vmatpush1.bf16.msra.mxu1 %v5865_v44  ;;  %v4832_v44 = vld [vmem:[%s9448_s8 + $0x470] sm:$0xff] }
 0x8bb   : > { %5868 = vmatprep.subr.bf16.mxu1 %v5867_v45  ;;  %v4835_v45 = vld [vmem:[%s9448_s8 + $0x488] sm:$0xff]  ;;  %v5909_v48 = vpack.c.bf16 %v4832_v44, %v4830_v30  ;;  %v5949_v30 = vpack.c.bf16 %v4872_v10, %v4870_v57  ;;  %v4912_v57 = vld [vmem:[%s9448_s8 + $0x6e0] sm:$0xff]  ;;  %v4914_v10 = vld [vmem:[%s9448_s8 + $0x6f0] sm:$0xff] }
 0x8bc   : > { %v5911_v41 = vpack.c.bf16 %v4837_v46, %v4835_v45  ;;  %v4874_v45 = vld [vmem:[%s9448_s8 + $0x5c0] sm:$0xff]  ;;  %v4876_v46 = vld [vmem:[%s9448_s8 + $0x5d0] sm:$0xff] }
 0x8be   : > { %5870 = vmatpush1.bf16.msra.mxu1 %v5869_v49  ;;  %v4836_v49 = vld [vmem:[%s9448_s8 + $0x490] sm:$0xff] }
 0x8bf   : > { %5872 = vmatprep.subr.bf16.mxu1 %v5871_v50  ;;  %v4839_v50 = vld [vmem:[%s9448_s8 + $0x4a8] sm:$0xff]  ;;  %v5913_v36 = vpack.c.bf16 %v4836_v49, %v4834_v8  ;;  %v5953_v8 = vpack.c.bf16 %v4876_v46, %v4874_v45  ;;  %v4916_v45 = vld [vmem:[%s9448_s8 + $0x700] sm:$0xff]  ;;  %v4918_v46 = vld [vmem:[%s9448_s8 + $0x710] sm:$0xff] }
 0x8c0   : > { %v5915_v54 = vpack.c.bf16 %v4841_v52, %v4839_v50  ;;  %v4878_v50 = vld [vmem:[%s9448_s8 + $0x5e0] sm:$0xff]  ;;  %v4880_v52 = vld [vmem:[%s9448_s8 + $0x5f0] sm:$0xff] }
 0x8c2   : > { %5874 = vmatpush1.bf16.msra.mxu1 %v5873_v58  ;;  %v4840_v58 = vld [vmem:[%s9448_s8 + $0x4b0] sm:$0xff] }
 0x8c3   : > { %5876 = vmatprep.subr.bf16.mxu1 %v5875_v59  ;;  %v4843_v59 = vld [vmem:[%s9448_s8 + $0x4c8] sm:$0xff]  ;;  %v5917_v61 = vpack.c.bf16 %v4840_v58, %v4838_v56  ;;  %v4887_v56 = vld [vmem:[%s9448_s8 + $0x618] sm:$0xff] }
 0x8c4   : > { %v5919_v2 = vpack.c.bf16 %v4845_v11, %v4843_v59  ;;  %v9241_v59 = vpop.f32.mrb[30].mxu0 }
 0x8c5   : > { %v3933_v11 = vpop.f32.mrb[31].mxu0 }
 0x8c6   : > { %5878 = vmatpush1.bf16.msra.mxu1 %v5877_v3  ;;  %v4844_v3 = vld [vmem:[%s9448_s8 + $0x4d0] sm:$0xff] }
 0x8c7   : > { %5880 = vmatprep.subr.bf16.mxu1 %v5879_v7  ;;  %v4847_v7 = vld [vmem:[%s9448_s8 + $0x4e8] sm:$0xff]  ;;  %v5921_v31 = vpack.c.bf16 %v4844_v3, %v4842_v21  ;;  %v4891_v3 = vld [vmem:[%s9448_s8 + $0x638] sm:$0xff] }
 0x8c8   : > { %v5923_v9 = vpack.c.bf16 %v4849_v16, %v4847_v7  ;;  %v4889_v21 = vld [vmem:[%s9448_s8 + $0x628] sm:$0xff] }
 0x8ca   : > { %5882 = vmatpush1.bf16.msra.mxu1 %v5881_v13  ;;  %v4848_v13 = vld [vmem:[%s9448_s8 + $0x4f0] sm:$0xff] }
 0x8cb   : > { %5884 = vmatprep.subr.bf16.mxu1 %v5883_v17  ;;  %v4851_v17 = vld [vmem:[%s9448_s8 + $0x508] sm:$0xff]  ;;  %v5925_v35 = vpack.c.bf16 %v4848_v13, %v4846_v12  ;;  %v4888_v12 = vld [vmem:[%s9448_s8 + $0x620] sm:$0xff]  ;;  %v4890_v13 = vld [vmem:[%s9448_s8 + $0x630] sm:$0xff] }
 0x8cc   : > { %v5927_v47 = vpack.c.bf16 %v4853_v6, %v4851_v17  ;;  %v4893_v17 = vld [vmem:[%s9448_s8 + $0x648] sm:$0xff]  ;;  %v4895_v6 = vld [vmem:[%s9448_s8 + $0x658] sm:$0xff] }
 0x8ce   : > { %5886 = vmatpush1.bf16.msra.mxu1 %v5885_v5  ;;  %v4852_v5 = vld [vmem:[%s9448_s8 + $0x510] sm:$0xff] }
 0x8cf   : > { %5888 = vmatprep.subr.bf16.mxu1 %v5887_v23  ;;  %v4855_v23 = vld [vmem:[%s9448_s8 + $0x528] sm:$0xff]  ;;  %v5929_v39 = vpack.c.bf16 %v4852_v5, %v4850_v27  ;;  %v4892_v27 = vld [vmem:[%s9448_s8 + $0x640] sm:$0xff]  ;;  %v4894_v5 = vld [vmem:[%s9448_s8 + $0x650] sm:$0xff] }
 0x8d0   : > { %v5931_v24 = vpack.c.bf16 %v4857_v62, %v4855_v23  ;;  %v4897_v23 = vld [vmem:[%s9448_s8 + $0x668] sm:$0xff]  ;;  %v4899_v62 = vld [vmem:[%s9448_s8 + $0x678] sm:$0xff] }
 0x8d2   : > { %5890 = vmatpush1.bf16.msra.mxu1 %v5889_v43  ;;  %v4856_v43 = vld [vmem:[%s9448_s8 + $0x530] sm:$0xff] }
 0x8d3   : > { %5892 = vmatprep.subr.bf16.mxu1 %v5891_v55  ;;  %v4859_v55 = vld [vmem:[%s9448_s8 + $0x548] sm:$0xff]  ;;  %v5933_v14 = vpack.c.bf16 %v4856_v43, %v4854_v28  ;;  %v4896_v28 = vld [vmem:[%s9448_s8 + $0x660] sm:$0xff]  ;;  %v4898_v43 = vld [vmem:[%s9448_s8 + $0x670] sm:$0xff] }
 0x8d6   : > { %5894 = vmatpush1.bf16.msra.mxu1 %v5893_v32  ;;  %v5935_v32 = vpack.c.bf16 %v4861_v29, %v4859_v55  ;;  %v4901_v55 = vld [vmem:[%s9448_s8 + $0x688] sm:$0xff]  ;;  %v4903_v29 = vld [vmem:[%s9448_s8 + $0x698] sm:$0xff] }
 0x8d7   : > { %3651 = vmatprep.subr.mxu1 %v8632_v18  ;;  %v4816_v18 = vld [vmem:[%s9447_s7 + $0x8] sm:$0xf] }
 0x8d9   : > { %3640 = vmatmul.mubr.f32.vlgmr.msra.gmra.mrb[48].mxu1 %v8847_v34  ;;  %v5901_v34 = vpack.c.bf16 %v4824_v25, %v4822_v40 }
 0x8da   : > { %3652 = vmatpush1.msra.mxu1 %v8639_v19  ;;  %3715 = vmatprep.mubr.f32.mxu1 %v6091_v0  ;;  %v4827_v19 = vld [vmem:[%s9448_s8 + $0x448] sm:$0xff]  ;;  %v4829_v0 = vld [vmem:[%s9448_s8 + $0x458] sm:$0xff] }
 0x8db   : > { %5896 = vmatprep.subr.bf16.mxu1 %v5895_v1  ;;  %v5903_v42 = vpack.c.bf16 %v4829_v0, %v4827_v19  ;;  %v4863_v1 = vld [vmem:[%s9448_s8 + $0x568] sm:$0xff]  ;;  %v4866_v19 = vld [vmem:[%s9448_s8 + $0x580] sm:$0xff]  ;;  %v4868_v0 = vld [vmem:[%s9448_s8 + $0x590] sm:$0xff] }
 0x8dc   : > { %v5939_v4 = vpack.c.bf16 %v4865_v37, %v4863_v1  ;;  %v5945_v60 = vpack.c.bf16 %v4868_v0, %v4866_v19  ;;  %v4905_v1 = vld [vmem:[%s9448_s8 + $0x6a8] sm:$0xff]  ;;  %v4907_v37 = vld [vmem:[%s9448_s8 + $0x6b8] sm:$0xff]  ;;  %v4908_v19 = vld [vmem:[%s9448_s8 + $0x6c0] sm:$0xff] }
 0x8dd   : > { %4817 = vmatmul.mubr.msk.f32.vlgmr.msra.gmra.mrb[50].mxu1 %vm3224_vm1, %v4816_v18  ;;  %v4864_v18 = vld [vmem:[%s9448_s8 + $0x570] sm:$0xff] }
 0x8de   : > { %5898 = vmatpush1.bf16.msra.mxu1 %v5897_v22  ;;  %v4867_v22 = vld [vmem:[%s9448_s8 + $0x588] sm:$0xff]  ;;  %v5941_v40 = vpack.c.bf16 %v4864_v18, %v4862_v26  ;;  %v4904_v26 = vld [vmem:[%s9448_s8 + $0x6a0] sm:$0xff]  ;;  %v4906_v18 = vld [vmem:[%s9448_s8 + $0x6b0] sm:$0xff] }
 0x8df   : > { %5900 = vmatprep.subr.bf16.mxu1 %v5899_v20  ;;  %v4869_v20 = vld [vmem:[%s9448_s8 + $0x598] sm:$0xff]  ;;  %v4910_v0 = vld [vmem:[%s9448_s8 + $0x6d0] sm:$0xff] }
 0x8e0   : > { %v5943_v25 = vpack.c.bf16 %v4869_v20, %v4867_v22  ;;  %v4909_v22 = vld [vmem:[%s9448_s8 + $0x6c8] sm:$0xff]  ;;  %v4911_v20 = vld [vmem:[%s9448_s8 + $0x6d8] sm:$0xff] }
 0x8e2   : > { %5902 = vmatpush1.bf16.msra.mxu1 %v5901_v34  ;;  %v4871_v34 = vld [vmem:[%s9448_s8 + $0x5a8] sm:$0xff] }
 0x8e3   : > { %5904 = vmatprep.subr.bf16.mxu1 %v5903_v42  ;;  %v4873_v42 = vld [vmem:[%s9448_s8 + $0x5b8] sm:$0xff] }
 0x8e4   : > { %v5947_v53 = vpack.c.bf16 %v4873_v42, %v4871_v34  ;;  %v4913_v34 = vld [vmem:[%s9448_s8 + $0x6e8] sm:$0xff]  ;;  %v4915_v42 = vld [vmem:[%s9448_s8 + $0x6f8] sm:$0xff] }
 0x8e6   : > { %5906 = vmatpush1.bf16.msra.mxu1 %v5905_v63  ;;  %v4875_v63 = vld [vmem:[%s9448_s8 + $0x5c8] sm:$0xff] }
 0x8e7   : > { %5908 = vmatprep.subr.bf16.mxu1 %v5907_v15  ;;  %v4877_v15 = vld [vmem:[%s9448_s8 + $0x5d8] sm:$0xff] }
 0x8e8   : > { %v5951_v44 = vpack.c.bf16 %v4877_v15, %v4875_v63  ;;  %v4917_v63 = vld [vmem:[%s9448_s8 + $0x708] sm:$0xff]  ;;  %v4919_v15 = vld [vmem:[%s9448_s8 + $0x718] sm:$0xff] }
 0x8ea   : > { %5910 = vmatpush1.bf16.msra.mxu1 %v5909_v48  ;;  %v4879_v48 = vld [vmem:[%s9448_s8 + $0x5e8] sm:$0xff] }
 0x8eb   : > { %5912 = vmatprep.subr.bf16.mxu1 %v5911_v41  ;;  %v4881_v41 = vld [vmem:[%s9448_s8 + $0x5f8] sm:$0xff] }
 0x8ec   : > { %v5955_v49 = vpack.c.bf16 %v4881_v41, %v4879_v48  ;;  %v4921_v48 = vld [vmem:[%s9448_s8 + $0x728] sm:$0xff]  ;;  %v4923_v41 = vld [vmem:[%s9448_s8 + $0x738] sm:$0xff] }
 0x8ee   : > { %5914 = vmatpush1.bf16.msra.mxu1 %v5913_v36  ;;  %v5957_v36 = vpack.c.bf16 %v4880_v52, %v4878_v50  ;;  %v4920_v50 = vld [vmem:[%s9448_s8 + $0x720] sm:$0xff]  ;;  %v4922_v52 = vld [vmem:[%s9448_s8 + $0x730] sm:$0xff] }
 0x8ef   : > { %5916 = vmatprep.subr.bf16.mxu1 %v5915_v54  ;;  %v4885_v54 = vld [vmem:[%s9448_s8 + $0x608] sm:$0xff] }
 0x8f0   : > { %v5959_v58 = vpack.c.bf16 %v4887_v56, %v4885_v54  ;;  %v4927_v54 = vld [vmem:[%s9448_s8 + $0x758] sm:$0xff]  ;;  %v5997_v56 = vpack.c.bf16 %v4922_v52, %v4920_v50 }
 0x8f2   : > { %5918 = vmatpush1.bf16.msra.mxu1 %v5917_v61  ;;  %v4884_v61 = vld [vmem:[%s9448_s8 + $0x600] sm:$0xff] }
 0x8f3   : > { %5920 = vmatprep.subr.bf16.mxu1 %v5919_v2  ;;  %v4886_v2 = vld [vmem:[%s9448_s8 + $0x610] sm:$0xff] }
 0x8f4   : > { %v5961_v16 = vpack.c.bf16 %v4886_v2, %v4884_v61  ;;  %v4926_v61 = vld [vmem:[%s9448_s8 + $0x750] sm:$0xff]  ;;  %v4929_v2 = vld [vmem:[%s9448_s8 + $0x768] sm:$0xff] }
 0x8f6   : > { %5922 = vmatpush1.bf16.msra.mxu1 %v5921_v31 }
 0x8f7   : > { %5924 = vmatprep.subr.bf16.mxu1 %v5923_v9  ;;  %v5963_v9 = vpack.c.bf16 %v4891_v3, %v4889_v21  ;;  %v4931_v21 = vld [vmem:[%s9448_s8 + $0x778] sm:$0xff] }
 0x8fa   : > { %5926 = vmatpush1.bf16.msra.mxu1 %v5925_v35  ;;  %v5965_v35 = vpack.c.bf16 %v4890_v13, %v4888_v12  ;;  %v4935_v12 = vld [vmem:[%s9448_s8 + $0x798] sm:$0xff] }
 0x8fb   : > { %5928 = vmatprep.subr.bf16.mxu1 %v5927_v47  ;;  %v5967_v47 = vpack.c.bf16 %v4895_v6, %v4893_v17  ;;  %v4932_v6 = vld [vmem:[%s9448_s8 + $0x780] sm:$0xff] }
 0x8fe   : > { %5930 = vmatpush1.bf16.msra.mxu1 %v5929_v39  ;;  %v5969_v39 = vpack.c.bf16 %v4894_v5, %v4892_v27  ;;  %v4939_v27 = vld [vmem:[%s9448_s8 + $0x7b8] sm:$0xff] }
 0x8ff   : > { %5932 = vmatprep.subr.bf16.mxu1 %v5931_v24  ;;  %v5971_v24 = vpack.c.bf16 %v4899_v62, %v4897_v23  ;;  %v4936_v62 = vld [vmem:[%s9448_s8 + $0x7a0] sm:$0xff] }
 0x902   : > { %5934 = vmatpush1.bf16.msra.mxu1 %v5933_v14  ;;  %v5973_v14 = vpack.c.bf16 %v4898_v43, %v4896_v28  ;;  %v4943_v28 = vld [vmem:[%s9448_s8 + $0x7d8] sm:$0xff] }
 0x903   : > { %5936 = vmatprep.subr.bf16.mxu1 %v5935_v32  ;;  %v5975_v32 = vpack.c.bf16 %v4903_v29, %v4901_v55  ;;  %v4940_v29 = vld [vmem:[%s9448_s8 + $0x7c0] sm:$0xff] }
 0x906   : > { %5938 = vmatpush1.bf16.msra.mxu1 %v5937_v38  ;;  %v5977_v38 = vpack.c.bf16 %v4902_v51, %v4900_v33  ;;  %v4947_v33 = vld [vmem:[%s9448_s8 + $0x7f8] sm:$0xff] }
 0x907   : > { %5940 = vmatprep.subr.bf16.mxu1 %v5939_v4  ;;  %v5979_v4 = vpack.c.bf16 %v4907_v37, %v4905_v1  ;;  %v4944_v37 = vld [vmem:[%s9448_s8 + $0x7e0] sm:$0xff] }
 0x90a   : > { %5942 = vmatpush1.bf16.msra.mxu1 %v5941_v40  ;;  %v5981_v40 = vpack.c.bf16 %v4906_v18, %v4904_v26  ;;  %v4080_v26 = vld [vmem:[%s9449_s9] sm:$0xff] }
 0x90b   : > { %5944 = vmatprep.subr.bf16.mxu1 %v5943_v25  ;;  %v5983_v25 = vpack.c.bf16 %v4911_v20, %v4909_v22 }
 0x90e   : > { %5946 = vmatpush1.bf16.msra.mxu1 %v5945_v60  ;;  %v5985_v60 = vpack.c.bf16 %v4910_v0, %v4908_v19 }
 0x90f   : > { %5948 = vmatprep.subr.bf16.mxu1 %v5947_v53  ;;  %v5987_v53 = vpack.c.bf16 %v4915_v42, %v4913_v34 }
 0x912   : > { %5950 = vmatpush1.bf16.msra.mxu1 %v5949_v30  ;;  %v5989_v30 = vpack.c.bf16 %v4914_v10, %v4912_v57 }
 0x913   : > { %5952 = vmatprep.subr.bf16.mxu1 %v5951_v44  ;;  %v5991_v44 = vpack.c.bf16 %v4919_v15, %v4917_v63 }
 0x916   : > { %5954 = vmatpush1.bf16.msra.mxu1 %v5953_v8  ;;  %v5993_v8 = vpack.c.bf16 %v4918_v46, %v4916_v45 }
 0x917   : > { %5956 = vmatprep.subr.bf16.mxu1 %v5955_v49  ;;  %v5995_v49 = vpack.c.bf16 %v4923_v41, %v4921_v48 }
 0x91a   : > { %5958 = vmatpush1.bf16.msra.mxu1 %v5957_v36  ;;  %v4925_v36 = vld [vmem:[%s9448_s8 + $0x748] sm:$0xff] }
 0x91b   : > { %5960 = vmatprep.subr.bf16.mxu1 %v5959_v58  ;;  %v5999_v58 = vpack.c.bf16 %v4927_v54, %v4925_v36 }
 0x9b0   : > { %v3717_v7 = vpop.f32.mrb[50].mxu1 }
 0x9b1   : > { %v3719_v31 = vpop.f32.mrb[51].mxu1 }
 0x9b2   : > { %3851 = vmatprep.mubr.f32.mxu1 %v3719_v31  ;;  %v4930_v31 = vld [vmem:[%s9448_s8 + $0x770] sm:$0xff] }
 0x9b3   : > { %3852 = vmatmul.mubr.f32.vlgmr.msra.gmra.mrb[48].mxu1 %v3717_v7  ;;  %v6003_v7 = vpack.c.bf16 %v4931_v21, %v4929_v2 }
 0x9b4   : > { %5962 = vmatpush1.bf16.msra.mxu1 %v5961_v16  ;;  %4065 = vmatprep.mubr.f32.mxu1 %v3933_v11  ;;  %v4924_v11 = vld [vmem:[%s9448_s8 + $0x740] sm:$0xff] }
 0x9b5   : > { %5964 = vmatprep.subr.bf16.mxu1 %v5963_v9  ;;  %v6001_v3 = vpack.c.bf16 %v4926_v61, %v4924_v11  ;;  %v4928_v16 = vld [vmem:[%s9448_s8 + $0x760] sm:$0xff]  ;;  %v4933_v9 = vld [vmem:[%s9448_s8 + $0x788] sm:$0xff] }
 0x9b6   : > { %v6005_v13 = vpack.c.bf16 %v4930_v31, %v4928_v16  ;;  %v6007_v17 = vpack.c.bf16 %v4935_v12, %v4933_v9 }
 0x9b8   : > { %5966 = vmatpush1.bf16.msra.mxu1 %v5965_v35  ;;  %v4934_v35 = vld [vmem:[%s9448_s8 + $0x790] sm:$0xff] }
 0x9b9   : > { %5968 = vmatprep.subr.bf16.mxu1 %v5967_v47  ;;  %v4937_v47 = vld [vmem:[%s9448_s8 + $0x7a8] sm:$0xff]  ;;  %v6009_v5 = vpack.c.bf16 %v4934_v35, %v4932_v6 }
 0x9ba   : > { %v6011_v23 = vpack.c.bf16 %v4939_v27, %v4937_v47 }
 0x9bc   : > { %5970 = vmatpush1.bf16.msra.mxu1 %v5969_v39  ;;  %v4938_v39 = vld [vmem:[%s9448_s8 + $0x7b0] sm:$0xff] }
 0x9bd   : > { %5972 = vmatprep.subr.bf16.mxu1 %v5971_v24  ;;  %v4941_v24 = vld [vmem:[%s9448_s8 + $0x7c8] sm:$0xff]  ;;  %v6013_v43 = vpack.c.bf16 %v4938_v39, %v4936_v62 }
 0x9be   : > { %v6015_v55 = vpack.c.bf16 %v4943_v28, %v4941_v24 }
 0x9c0   : > { %5974 = vmatpush1.bf16.msra.mxu1 %v5973_v14  ;;  %v4942_v14 = vld [vmem:[%s9448_s8 + $0x7d0] sm:$0xff] }
 0x9c1   : > { %5976 = vmatprep.subr.bf16.mxu1 %v5975_v32  ;;  %v4945_v32 = vld [vmem:[%s9448_s8 + $0x7e8] sm:$0xff]  ;;  %v6017_v51 = vpack.c.bf16 %v4942_v14, %v4940_v29 }
 0x9c2   : > { %v6019_v1 = vpack.c.bf16 %v4947_v33, %v4945_v32 }
 0x9c4   : > { %5978 = vmatpush1.bf16.msra.mxu1 %v5977_v38  ;;  %v4946_v38 = vld [vmem:[%s9448_s8 + $0x7f0] sm:$0xff] }
 0x9c5   : > { %5980 = vmatprep.subr.bf16.mxu1 %v5979_v4  ;;  %v6021_v4 = vpack.c.bf16 %v4946_v38, %v4944_v37 }
 0x9c8   : > { %5982 = vmatpush1.bf16.msra.mxu1 %v5981_v40  ;;  %v4082_v40 = vcombine.high %v4080_v26, %v4080_v26 }
 0x9c9   : > { %5984 = vmatprep.subr.bf16.mxu1 %v5983_v25 }
 0x9cc   : > { %5986 = vmatpush1.bf16.msra.mxu1 %v5985_v60 }
 0x9cd   : > { %5988 = vmatprep.subr.bf16.mxu1 %v5987_v53 }
 0x9d0   : > { %5990 = vmatpush1.bf16.msra.mxu1 %v5989_v30 }
 0x9d1   : > { %5992 = vmatprep.subr.bf16.mxu1 %v5991_v44 }
 0x9d4   : > { %5994 = vmatpush1.bf16.msra.mxu1 %v5993_v8 }
 0x9d5   : > { %5996 = vmatprep.subr.bf16.mxu1 %v5995_v49 }
 0x9d8   : > { %5998 = vmatpush1.bf16.msra.mxu1 %v5997_v56 }
 0x9d9   : > { %6000 = vmatprep.subr.bf16.mxu1 %v5999_v58 }
 0x9dc   : > { %6002 = vmatpush1.bf16.msra.mxu1 %v6001_v3 }
 0x9dd   : > { %6004 = vmatprep.subr.bf16.mxu1 %v6003_v7 }
 0x9e0   : > { %6006 = vmatpush1.bf16.msra.mxu1 %v6005_v13 }
 0x9e1   : > { %6008 = vmatprep.subr.bf16.mxu1 %v6007_v17 }
 0x9e4   : > { %6010 = vmatpush1.bf16.msra.mxu1 %v6009_v5 }
 0x9e5   : > { %6012 = vmatprep.subr.bf16.mxu1 %v6011_v23 }
 0x9e8   : > { %6014 = vmatpush1.bf16.msra.mxu1 %v6013_v43 }
 0x9e9   : > { %6016 = vmatprep.subr.bf16.mxu1 %v6015_v55 }
 0x9ec   : > { %6018 = vmatpush1.bf16.msra.mxu1 %v6017_v51 }
 0x9ed   : > { %6020 = vmatprep.subr.bf16.mxu1 %v6019_v1 }
 0x9f0   : > { %6022 = vmatpush1.bf16.msra.mxu1 %v6021_v4 }
 0x9f3   : > { %4066 = vmatmul.mubr.f32.vlgmr.msra.gmra.mrb[48].mxu1 %v9241_v59 }
 0xac6   : > { %v4067_v18 = vpop.f32.mrb[48].mxu1 }
 0xac7   : > { %vm4074_vm2 = vcmp.ge.f32.partialorder %v4067_v18, 0.0  ;;  %v4076_v22 = vmul.f32 0.2, %v4067_v18  ;;  %v4069_v20 = vpop.f32.mrb[49].mxu1 }
 0xac8   : > { %vm4075_vm3 = vcmp.ge.f32.partialorder %v4069_v20, 0.0  ;;  %v4077_v25 = vmul.f32 0.2, %v4069_v20 }
 0xac9   : > { %v4078_v19 = vsel %vm4074_vm2, %v4067_v18, %v4076_v22 }
 0xaca   : > { %v4079_v0 = vsel %vm4075_vm3, %v4069_v20, %v4077_v25  ;;  %v4084_v34 = vmul.f32 %v4080_v26, %v4078_v19 }
 0xacb   : > { %v4085_v42 = vmul.f32 %v4082_v40, %v4079_v0 }
 0xacc   : > { %v4087_v60 = vsel %vm4086_vm4, %v4084_v34, 0.0 }
 0xacd   : > { %v4088_v53 = vsel %vm4086_vm4, %v4085_v42, 0.0 }
 0xace   : > { %v4089_v59 = vadd.f32 %v4088_v53, %v4087_v60 }
 0xad0   : > { %4090 = vadd.xlane.f32.xlu0 %v4089_v59 }
 0xb5d   : > { %v4091_v57 = vpop.xlane.xlu0 %4090 }
 0xb5e   : > { %v4092_v10 = vrot.slane %v4091_v57, 4 }
 0xb60   : > { %v4093_v63 = vadd.f32 %v4092_v10, %v4091_v57 }
 0xb62   : > { %v4094_v15 = vrot.slane %v4093_v63, 2 }
 0xb64   : > { %v4095_v30 = vadd.f32 %v4094_v15, %v4093_v63 }
 0xb66   : > { %v4096_v44 = vrot.slane %v4095_v30, 1 }
 0xb68   : > { %v4097_v45 = vadd.f32 %v4096_v44, %v4095_v30 }
 0xb6a   : > { %6071 = vpush %v4097_v45 }
 0xb9b   : > { %s6072_s28 = spop %6071 }
 0xb9c   : > { %v4099_v46 = vstv %s6072_s28 }
 0xb9d   : > { %4101 = vst.msk [vmem:[%s355_s27] sm:$0x1] %vm4100_vm5, %v4099_v46 }
 0xb9e PF: > { %s20_s13 = sadd.s32 1, %s6089_s13  }
 0xb9f   : > { %p17_p4 = scmp.ge.s32.totalorder %s20_s13, 4  }
 0xba1   :  { %19 = sbr.rel (!%p17_p4) target bundleno = 1 (0x1), region = 114 }

</bundles_post_ra>
